<compile_context>
chip_gen: v7x
topology: tpu7x:2x2x1
jax: 0.10.0
libtpu: 0.0.40
codegen_flags: <defaults>
</compile_context>

<pallas_src>
import math

import jax
import jax.numpy as jnp
from jax import lax
from jax.experimental import pallas as pl
from jax.experimental.pallas import tpu as pltpu  # noqa: F401  (used by the TODO'd scaled-up variant)

# ----------------------------- small config ---------------------------------
B = 2
IMG_C, IMG_H, IMG_W = 3, 32, 32          # stand-in for (3, 224, 224)
PATCH = 4
N_PATCH = (IMG_H // PATCH) * (IMG_W // PATCH)   # 64 patches per image
C_FEAT = 48                              # stand-in for convnext_base's 1024-d feature
TAB_IN = 3                               # num_tabular_features
TAB_HID = 32                             # stand-in for 128
TAB_OUT = 16                             # stand-in for 64
D_MODEL = C_FEAT + TAB_OUT               # 64 (stand-in for 1024 + 64 = 1088)
N_HEAD = 8
HEAD_DIM = D_MODEL // N_HEAD             # 8
D_FF = 128                               # stand-in for nn.Transformer default 2048
N_LAYERS = 2                             # num_encoder_layers
N_CLASSES = 2
LN_EPS = 1e-5
OUT_PAD = 128                            # lane-dense padded width of the head output


def _offsets(sizes):
    offs, o = [], 0
    for s in sizes:
        offs.append(o)
        o += s
    return tuple(offs), o


# packed (1, n) f32 vector holding every backbone / tabular / head bias & LN param
# order: stem_b, stem_ln_g, stem_ln_b, blk_b1, blk_b2, tab_b1, tab_b2, out_b
MISC_SIZES = (C_FEAT, C_FEAT, C_FEAT, 4 * C_FEAT, C_FEAT, TAB_HID, TAB_OUT, OUT_PAD)
MISC_OFF, MISC_LEN = _offsets(MISC_SIZES)

# packed per-layer (1, n) f32 vector
# order: b_qkv (head-major packed, scale folded into b_q), b_o, ln1_g, ln1_b,
#        ff_b1, ff_b2, ln2_g, ln2_b
LVEC_SIZES = (3 * D_MODEL, D_MODEL, D_MODEL, D_MODEL, D_FF, D_MODEL, D_MODEL, D_MODEL)
LVEC_OFF, LVEC_LEN = _offsets(LVEC_SIZES)


# ------------------------------ Pallas kernel --------------------------------
def _full_spec(shape):
    """Whole-array VMEM block (no grid)."""
    return pl.BlockSpec(shape, lambda: (0,) * len(shape))


def _fused_forward_kernel(
    # activations (pre-cast bf16 in the wrapper)
    patches_ref, tab_ref, pool_ref,
    # packed backbone / tabular weights (bf16) and packed f32 bias/LN vector
    bb_wa_ref, bb_wb_ref, tab_w_ref, misc_ref,
    # packed transformer layer weights (bf16) and per-layer f32 vector
    l_wa_ref, l_wo3_ref, l_wb_ref, l_vec_ref,
    # output head weight (bf16, lane-padded to OUT_PAD)
    out_w_ref,
    # output
    o_ref,
):
    f32 = jnp.float32
    bf16 = jnp.bfloat16

    def mm(x_bf16, w_bf16):
        # bf16 MXU matmul with f32 accumulation (weights stored bf16).
        return jnp.dot(x_bf16, w_bf16, preferred_element_type=f32)

    def layer_norm(x, g, b, eps):
        # statistics kept in f32 (v5e has no bf16 VPU/EUP anyway).
        mu = jnp.mean(x, axis=-1, keepdims=True)
        var = jnp.mean(jnp.square(x - mu), axis=-1, keepdims=True)
        return (x - mu) * lax.rsqrt(var + eps) * g + b

    # ---- unpack the misc bias / LN vector with static lane slices
    msc = [misc_ref[:, o:o + s] for o, s in zip(MISC_OFF, MISC_SIZES)]
    stem_b, stem_g, stem_beta, blk_b1, blk_b2, tab_b1, tab_b2, out_b = msc

    # ---- image backbone (stand-in for pretrained convnext_base features+avgpool)
    # TODO(synk): the depthwise 7x7 conv of the real ConvNeXt block is omitted in
    # this stand-in backbone (pretrained convnext_base weights are not reproducible).
    stem_w = bb_wa_ref[:, 0:C_FEAT]                                   # (48, 48)
    blk_w1 = bb_wa_ref[:, C_FEAT:C_FEAT + 4 * C_FEAT]                 # (48, 192)
    h0 = mm(patches_ref[...], stem_w) + stem_b                        # (B*P, C_FEAT)
    h0 = layer_norm(h0, stem_g, stem_beta, 1e-6)
    # TODO(synk): tanh-approximate GELU; PyTorch nn.GELU default is exact erf.
    h1 = jax.nn.gelu(mm(h0.astype(bf16), blk_w1) + blk_b1, approximate=True)
    h2 = mm(h1.astype(bf16), bb_wb_ref[...]) + blk_b2 + h0            # (B*P, C_FEAT)
    # global average pool as a bf16 matmul with a constant (B, B*P) pooling matrix
    feature = mm(pool_ref[...], h2.astype(bf16))                      # (B, C_FEAT)

    # ---- tabular encoder: Linear -> ReLU -> Linear (weights packed in tab_w)
    tab_w2 = tab_w_ref[0:TAB_HID, 0:TAB_OUT]                          # (32, 16)
    tab_w1 = tab_w_ref[TAB_HID:TAB_HID + TAB_IN, :]                   # (3, 32)
    t = jnp.maximum(mm(tab_ref[...], tab_w1) + tab_b1, 0.0)
    t = mm(t.astype(bf16), tab_w2) + tab_b2                           # (B, TAB_OUT)

    # ---- concat (torch.cat((tabular_features, flatten_featur), dim=1)),
    # built directly in vregs (no VMEM scratch round-trip).
    src = jnp.concatenate([t, feature], axis=-1)                      # (B, D_MODEL) f32

    seq = src.shape[0]
    hd3 = 3 * HEAD_DIM

    # ---- transformer encoder stack (post-LN, ReLU FFN, dropout = identity)
    # TODO(synk): original calls nn.Transformer(src) with a single arg (would raise);
    # decoder is omitted and only the 2-layer encoder is applied to (S=B, E=D_MODEL).
    # Samples attend to each other (seq = batch), faithfully reproducing the
    # original unbatched-(S, E) behaviour.
    for layer in range(N_LAYERS):
        lv = [l_vec_ref[layer, :, o:o + s] for o, s in zip(LVEC_OFF, LVEC_SIZES)]
        bqkv, bo, ln1_g, ln1_b, ff_b1, ff_b2, ln2_g, ln2_b = lv
        ff_w1 = l_wa_ref[layer, :, 0:D_FF]                            # (D_MODEL, D_FF)
        wqkv = l_wa_ref[layer, :, D_FF:D_FF + 3 * D_MODEL]            # (D_MODEL, 3*D_MODEL)
        ff_w2 = l_wb_ref[layer]                                       # (D_FF, D_MODEL)
        wo3 = l_wo3_ref[layer]                                        # (N_HEAD, HEAD_DIM, D_MODEL)

        # fused QKV projection: ONE matmul, head-major packed output columns
        # [h][q(8) | k(8) | v(8)];  1/sqrt(head_dim) already folded into W_q/b_q.
        srcb = src.astype(bf16)                                       # cast once per layer
        qkv = (mm(srcb, wqkv) + bqkv).astype(bf16)                    # (seq, 3*D_MODEL)

        # split heads onto a leading (batch) axis: (N_HEAD, seq, 3*HEAD_DIM)
        qkv_h = jnp.stack(
            [qkv[:, h * hd3:(h + 1) * hd3] for h in range(N_HEAD)], axis=0)
        qh = qkv_h[..., 0:HEAD_DIM]
        kh = qkv_h[..., HEAD_DIM:2 * HEAD_DIM]
        vh = qkv_h[..., 2 * HEAD_DIM:3 * HEAD_DIM]

        # all heads at once: one batched QK^T, one softmax, one batched PV
        s = lax.dot_general(qh, kh, (((2,), (2,)), ((0,), (0,))),
                            preferred_element_type=f32)               # (H, S, S)
        s = s - jnp.max(s, axis=-1, keepdims=True)
        e = jnp.exp(s)
        p = (e * pl.reciprocal(jnp.sum(e, axis=-1, keepdims=True),
                               approx=True)).astype(bf16)
        oh = lax.dot_general(p, vh, (((2,), (1,)), ((0,), (0,))),
                             preferred_element_type=f32)              # (H, S, HEAD_DIM)

        # merge heads + output projection W_O: batched per-head matmul then sum
        # over heads (== concat-heads @ W_O, without a lane-merging reshape).
        a = jnp.sum(
            lax.dot_general(oh.astype(bf16), wo3, (((2,), (1,)), ((0,), (0,))),
                            preferred_element_type=f32),
            axis=0) + bo                                              # (S, D_MODEL)

        src = layer_norm(src + a, ln1_g, ln1_b, LN_EPS)

        f = jnp.maximum(mm(src.astype(bf16), ff_w1) + ff_b1, 0.0)
        f = mm(f.astype(bf16), ff_w2) + ff_b2
        src = layer_norm(src + f, ln2_g, ln2_b, LN_EPS)

    # ---- output head (lane-dense padded to OUT_PAD; wrapper slices N_CLASSES)
    # TODO(synk): original output_layer is Linear(192, num_classes) which is
    # dimensionally inconsistent with d_model; implemented as Linear(d_model, num_classes).
    o_ref[...] = mm(src.astype(bf16), out_w_ref[...]) + out_b


# ------------------------------ parameters ----------------------------------
def init_params(key):
    keys = iter(jax.random.split(key, 64))
    bf16 = jnp.bfloat16

    def nrm(shape, scale=0.02):
        return scale * jax.random.normal(next(keys), shape, dtype=jnp.float32)

    # ---- logical (unpacked) parameters, f32
    stem_w = nrm((PATCH * PATCH * IMG_C, C_FEAT))
    stem_b = nrm((1, C_FEAT))
    stem_g = jnp.ones((1, C_FEAT), jnp.float32)
    stem_beta = jnp.zeros((1, C_FEAT), jnp.float32)
    blk_w1 = nrm((C_FEAT, 4 * C_FEAT))
    blk_b1 = nrm((1, 4 * C_FEAT))
    blk_w2 = nrm((4 * C_FEAT, C_FEAT))
    blk_b2 = nrm((1, C_FEAT))
    tab_w1 = nrm((TAB_IN, TAB_HID))
    tab_b1 = nrm((1, TAB_HID))
    tab_w2 = nrm((TAB_HID, TAB_OUT))
    tab_b2 = nrm((1, TAB_OUT))

    scale = 1.0 / math.sqrt(HEAD_DIM)
    l_wa, l_wo3, l_wb, l_vec = [], [], [], []
    for _ in range(N_LAYERS):
        wq = nrm((D_MODEL, D_MODEL)) * scale     # attention scale folded into W_q / b_q
        bq = nrm((1, D_MODEL)) * scale
        wk = nrm((D_MODEL, D_MODEL))
        bk = nrm((1, D_MODEL))
        wv = nrm((D_MODEL, D_MODEL))
        bv = nrm((1, D_MODEL))
        wo = nrm((D_MODEL, D_MODEL))
        bo = nrm((1, D_MODEL))
        ln1_g = jnp.ones((1, D_MODEL), jnp.float32)
        ln1_b = jnp.zeros((1, D_MODEL), jnp.float32)
        ff_w1 = nrm((D_MODEL, D_FF))
        ff_b1 = nrm((1, D_FF))
        ff_w2 = nrm((D_FF, D_MODEL))
        ff_b2 = nrm((1, D_MODEL))
        ln2_g = jnp.ones((1, D_MODEL), jnp.float32)
        ln2_b = jnp.zeros((1, D_MODEL), jnp.float32)

        # fused QKV weight/bias, columns packed head-major: [h][q(8) | k(8) | v(8)]
        def _headmajor(q, k, v):
            return jnp.concatenate(
                [jnp.concatenate([q[:, h * HEAD_DIM:(h + 1) * HEAD_DIM],
                                  k[:, h * HEAD_DIM:(h + 1) * HEAD_DIM],
                                  v[:, h * HEAD_DIM:(h + 1) * HEAD_DIM]], axis=1)
                 for h in range(N_HEAD)], axis=1)

        wqkv = _headmajor(wq, wk, wv)                                  # (D_MODEL, 3*D_MODEL)
        bqkv = _headmajor(bq, bk, bv)                                  # (1, 3*D_MODEL)
        wo3 = wo.reshape(N_HEAD, HEAD_DIM, D_MODEL)                    # per-head W_O

        l_wa.append(jnp.concatenate([ff_w1, wqkv], axis=1))            # (D_MODEL, D_FF+3*D_MODEL)
        l_wo3.append(wo3)
        l_wb.append(ff_w2)
        l_vec.append(jnp.concatenate(
            [bqkv, bo, ln1_g, ln1_b, ff_b1, ff_b2, ln2_g, ln2_b], axis=1))  # (1, LVEC_LEN)

    # ---- output head, zero-padded to OUT_PAD lanes for a lane-dense store
    out_w = jnp.pad(nrm((D_MODEL, N_CLASSES)), ((0, 0), (0, OUT_PAD - N_CLASSES)))
    out_b = jnp.pad(nrm((1, N_CLASSES)), ((0, 0), (0, OUT_PAD - N_CLASSES)))

    # ---- packed kernel inputs (12 arrays total at call time)
    tab_w = jnp.zeros((TAB_HID + TAB_IN, TAB_HID), jnp.float32)
    tab_w = tab_w.at[0:TAB_HID, 0:TAB_OUT].set(tab_w2)
    tab_w = tab_w.at[TAB_HID:TAB_HID + TAB_IN, :].set(tab_w1)

    params = {
        "bb_wa": jnp.concatenate([stem_w, blk_w1], axis=1).astype(bf16),   # (48, 240)
        "bb_wb": blk_w2.astype(bf16),                                      # (192, 48)
        "tab_w": tab_w.astype(bf16),                                       # (35, 32)
        "misc": jnp.concatenate(
            [stem_b, stem_g, stem_beta, blk_b1, blk_b2, tab_b1, tab_b2, out_b],
            axis=1),                                                       # (1, MISC_LEN)
        "l_wa": jnp.stack(l_wa).astype(bf16),     # (N_LAYERS, D_MODEL, D_FF+3*D_MODEL)
        "l_wo3": jnp.stack(l_wo3).astype(bf16),   # (N_LAYERS, N_HEAD, HEAD_DIM, D_MODEL)
        "l_wb": jnp.stack(l_wb).astype(bf16),     # (N_LAYERS, D_FF, D_MODEL)
        "l_vec": jnp.stack(l_vec),                # (N_LAYERS, 1, LVEC_LEN) f32
        "out_w": out_w.astype(bf16),              # (D_MODEL, OUT_PAD)
    }
    return params


# ------------------------------ forward pass --------------------------------
def forward(params, tabular, image):
    b, c, h, w = image.shape
    n_patch = (h // PATCH) * (w // PATCH)

    # NCHW -> channels-last 4x4 patches; stem conv (k=4, s=4) == patchify matmul.
    x = jnp.transpose(image, (0, 2, 3, 1))                       # NHWC
    x = x.reshape(b, h // PATCH, PATCH, w // PATCH, PATCH, c)
    patches = x.transpose(0, 1, 3, 2, 4, 5).reshape(
        b * n_patch, PATCH * PATCH * c).astype(jnp.bfloat16)

    # constant global-average-pool matrix: (B, B*N_PATCH); 1/n_patch is exactly
    # representable in bf16, so the bf16 pool matmul is exact up to accumulation.
    pool = (jnp.repeat(jnp.eye(b, dtype=jnp.float32), n_patch, axis=1)
            / n_patch).astype(jnp.bfloat16)

    args = (
        patches, tabular.astype(jnp.bfloat16), pool,
        params["bb_wa"], params["bb_wb"], params["tab_w"], params["misc"],
        params["l_wa"], params["l_wo3"], params["l_wb"], params["l_vec"],
        params["out_w"],
    )

    # Single fused pallas_call: all weights + activations fit comfortably in VMEM
    # at these stand-in shapes, so no grid / no HBM bounce between ops.
    # TODO(synk): at real ConvNeXt/1088-d shapes replace with gridded,
    # K-accumulating BlockSpecs ('parallel' row axes for v7x's 2 TensorCores,
    # 'arbitrary' layer-streaming axis) and an explicit vmem_limit_bytes.
    out = pl.pallas_call(
        _fused_forward_kernel,
        out_shape=jax.ShapeDtypeStruct((b, OUT_PAD), jnp.float32),
        in_specs=[_full_spec(a.shape) for a in args],
        out_specs=_full_spec((b, OUT_PAD)),
    )(*args)

    return out[:, :N_CLASSES]                                    # (B, N_CLASSES)


# ---------------------------------- main -------------------------------------
if __name__ == "__main__":
    key = jax.random.PRNGKey(0)
    k_params, k_tab, k_img = jax.random.split(key, 3)
    params = init_params(k_params)
    tabular_data = jax.random.normal(k_tab, (B, TAB_IN), dtype=jnp.float32)
    image_data = jax.random.normal(k_img, (B, IMG_C, IMG_H, IMG_W), dtype=jnp.float32)

    out = jax.jit(forward)(params, tabular_data, image_data)
    out = jax.block_until_ready(out)
    assert out.shape == (B, N_CLASSES), out.shape
    assert bool(jnp.all(jnp.isfinite(out)))
    print("KERNEL_OK")
</pallas_src>

<mosaic_0001>
module attributes {stable_mosaic.version = 11 : i64} {
  func.func @_fused_forward_kernel(%arg0: memref<128x48xbf16, #tpu.memory_space<vmem>>, %arg1: memref<2x3xbf16, #tpu.memory_space<vmem>>, %arg2: memref<2x128xbf16, #tpu.memory_space<vmem>>, %arg3: memref<48x240xbf16, #tpu.memory_space<vmem>>, %arg4: memref<192x48xbf16, #tpu.memory_space<vmem>>, %arg5: memref<35x32xbf16, #tpu.memory_space<vmem>>, %arg6: memref<1x560xf32, #tpu.memory_space<vmem>>, %arg7: memref<2x64x320xbf16, #tpu.memory_space<vmem>>, %arg8: memref<2x8x8x64xbf16, #tpu.memory_space<vmem>>, %arg9: memref<2x128x64xbf16, #tpu.memory_space<vmem>>, %arg10: memref<2x1x704xf32, #tpu.memory_space<vmem>>, %arg11: memref<64x128xbf16, #tpu.memory_space<vmem>>, %arg12: memref<2x128xf32, #tpu.memory_space<vmem>>) attributes {dimension_semantics = [], scalar_prefetch = 0 : i64, scratch_operands = 0 : i64, tpu.core_type = #tpu.core_type<tc>} {
    %c0 = arith.constant 0 : index
    %c0_0 = arith.constant 0 : index
    %0 = vector.load %arg6[%c0, %c0_0] : memref<1x560xf32, #tpu.memory_space<vmem>>, vector<1x48xf32>
    %c0_1 = arith.constant 0 : index
    %c48 = arith.constant 48 : index
    %1 = vector.load %arg6[%c0_1, %c48] : memref<1x560xf32, #tpu.memory_space<vmem>>, vector<1x48xf32>
    %c0_2 = arith.constant 0 : index
    %c96 = arith.constant 96 : index
    %2 = vector.load %arg6[%c0_2, %c96] : memref<1x560xf32, #tpu.memory_space<vmem>>, vector<1x48xf32>
    %c0_3 = arith.constant 0 : index
    %c144 = arith.constant 144 : index
    %3 = vector.load %arg6[%c0_3, %c144] : memref<1x560xf32, #tpu.memory_space<vmem>>, vector<1x192xf32>
    %c0_4 = arith.constant 0 : index
    %c336 = arith.constant 336 : index
    %4 = vector.load %arg6[%c0_4, %c336] : memref<1x560xf32, #tpu.memory_space<vmem>>, vector<1x48xf32>
    %c0_5 = arith.constant 0 : index
    %c384 = arith.constant 384 : index
    %5 = vector.load %arg6[%c0_5, %c384] : memref<1x560xf32, #tpu.memory_space<vmem>>, vector<1x32xf32>
    %c0_6 = arith.constant 0 : index
    %c416 = arith.constant 416 : index
    %6 = vector.load %arg6[%c0_6, %c416] : memref<1x560xf32, #tpu.memory_space<vmem>>, vector<1x16xf32>
    %c0_7 = arith.constant 0 : index
    %c432 = arith.constant 432 : index
    %7 = vector.load %arg6[%c0_7, %c432] : memref<1x560xf32, #tpu.memory_space<vmem>>, vector<1x128xf32>
    %c0_8 = arith.constant 0 : index
    %c0_9 = arith.constant 0 : index
    %8 = vector.load %arg3[%c0_8, %c0_9] : memref<48x240xbf16, #tpu.memory_space<vmem>>, vector<48x48xbf16>
    %c0_10 = arith.constant 0 : index
    %c48_11 = arith.constant 48 : index
    %9 = vector.load %arg3[%c0_10, %c48_11] : memref<48x240xbf16, #tpu.memory_space<vmem>>, vector<48x192xbf16>
    %c0_12 = arith.constant 0 : index
    %c0_13 = arith.constant 0 : index
    %10 = vector.load %arg0[%c0_12, %c0_13] : memref<128x48xbf16, #tpu.memory_space<vmem>>, vector<128x48xbf16>
    %cst = arith.constant dense<0.000000e+00> : vector<128x48xf32>
    %11 = tpu.matmul %10, %8, %cst {dimension_numbers = #tpu.dot_dimension_numbers<[1], [0], [0], [1], [0, 0, 1, 1], [], []>} : vector<128x48xbf16>, vector<48x48xbf16>, vector<128x48xf32> -> vector<128x48xf32>
    %12 = vector.broadcast %0 : vector<1x48xf32> to vector<128x48xf32>
    %13 = arith.addf %11, %12 : vector<128x48xf32>
    %cst_14 = arith.constant dense<0.000000e+00> : vector<128xf32>
    %14 = vector.multi_reduction <add>, %13, %cst_14 [1] : vector<128x48xf32> to vector<128xf32>
    %15 = vector.shape_cast %14 : vector<128xf32> to vector<128x1xf32>
    %cst_15 = arith.constant 4.800000e+01 : f32
    %16 = vector.broadcast %cst_15 : f32 to vector<128x1xf32>
    %17 = arith.divf %15, %16 : vector<128x1xf32>
    %18 = vector.broadcast %17 : vector<128x1xf32> to vector<128x48xf32>
    %19 = arith.subf %13, %18 : vector<128x48xf32>
    %20 = arith.mulf %19, %19 : vector<128x48xf32>
    %cst_16 = arith.constant dense<0.000000e+00> : vector<128xf32>
    %21 = vector.multi_reduction <add>, %20, %cst_16 [1] : vector<128x48xf32> to vector<128xf32>
    %22 = vector.shape_cast %21 : vector<128xf32> to vector<128x1xf32>
    %cst_17 = arith.constant 4.800000e+01 : f32
    %23 = vector.broadcast %cst_17 : f32 to vector<128x1xf32>
    %24 = arith.divf %22, %23 : vector<128x1xf32>
    %25 = vector.broadcast %17 : vector<128x1xf32> to vector<128x48xf32>
    %26 = arith.subf %13, %25 : vector<128x48xf32>
    %cst_18 = arith.constant 9.99999997E-7 : f32
    %27 = vector.broadcast %cst_18 : f32 to vector<128x1xf32>
    %28 = arith.addf %24, %27 : vector<128x1xf32>
    %29 = math.rsqrt %28 : vector<128x1xf32>
    %30 = vector.broadcast %29 : vector<128x1xf32> to vector<128x48xf32>
    %31 = arith.mulf %26, %30 : vector<128x48xf32>
    %32 = vector.broadcast %1 : vector<1x48xf32> to vector<128x48xf32>
    %33 = arith.mulf %31, %32 : vector<128x48xf32>
    %34 = vector.broadcast %2 : vector<1x48xf32> to vector<128x48xf32>
    %35 = arith.addf %33, %34 : vector<128x48xf32>
    %36 = arith.truncf %35 : vector<128x48xf32> to vector<128x48xbf16>
    %cst_19 = arith.constant dense<0.000000e+00> : vector<128x192xf32>
    %37 = tpu.matmul %36, %9, %cst_19 {dimension_numbers = #tpu.dot_dimension_numbers<[1], [0], [0], [1], [0, 0, 1, 1], [], []>} : vector<128x48xbf16>, vector<48x192xbf16>, vector<128x192xf32> -> vector<128x192xf32>
    %38 = vector.broadcast %3 : vector<1x192xf32> to vector<128x192xf32>
    %39 = arith.addf %37, %38 : vector<128x192xf32>
    %40 = arith.mulf %39, %39 : vector<128x192xf32>
    %41 = arith.mulf %39, %40 : vector<128x192xf32>
    %cst_20 = arith.constant 4.471500e-02 : f32
    %42 = vector.broadcast %cst_20 : f32 to vector<128x192xf32>
    %43 = arith.mulf %42, %41 : vector<128x192xf32>
    %44 = arith.addf %39, %43 : vector<128x192xf32>
    %cst_21 = arith.constant 0.797884583 : f32
    %45 = vector.broadcast %cst_21 : f32 to vector<128x192xf32>
    %46 = arith.mulf %45, %44 : vector<128x192xf32>
    %47 = math.tanh %46 : vector<128x192xf32>
    %cst_22 = arith.constant 1.000000e+00 : f32
    %48 = vector.broadcast %cst_22 : f32 to vector<128x192xf32>
    %49 = arith.addf %48, %47 : vector<128x192xf32>
    %cst_23 = arith.constant 5.000000e-01 : f32
    %50 = vector.broadcast %cst_23 : f32 to vector<128x192xf32>
    %51 = arith.mulf %50, %49 : vector<128x192xf32>
    %52 = arith.mulf %39, %51 : vector<128x192xf32>
    %53 = arith.truncf %52 : vector<128x192xf32> to vector<128x192xbf16>
    %c0_24 = arith.constant 0 : index
    %c0_25 = arith.constant 0 : index
    %54 = vector.load %arg4[%c0_24, %c0_25] : memref<192x48xbf16, #tpu.memory_space<vmem>>, vector<192x48xbf16>
    %cst_26 = arith.constant dense<0.000000e+00> : vector<128x48xf32>
    %55 = tpu.matmul %53, %54, %cst_26 {dimension_numbers = #tpu.dot_dimension_numbers<[1], [0], [0], [1], [0, 0, 1, 1], [], []>} : vector<128x192xbf16>, vector<192x48xbf16>, vector<128x48xf32> -> vector<128x48xf32>
    %56 = vector.broadcast %4 : vector<1x48xf32> to vector<128x48xf32>
    %57 = arith.addf %55, %56 : vector<128x48xf32>
    %58 = arith.addf %57, %35 : vector<128x48xf32>
    %c0_27 = arith.constant 0 : index
    %c0_28 = arith.constant 0 : index
    %59 = vector.load %arg2[%c0_27, %c0_28] : memref<2x128xbf16, #tpu.memory_space<vmem>>, vector<2x128xbf16>
    %60 = arith.truncf %58 : vector<128x48xf32> to vector<128x48xbf16>
    %cst_29 = arith.constant dense<0.000000e+00> : vector<2x48xf32>
    %61 = tpu.matmul %59, %60, %cst_29 {dimension_numbers = #tpu.dot_dimension_numbers<[1], [0], [0], [1], [0, 0, 1, 1], [], []>} : vector<2x128xbf16>, vector<128x48xbf16>, vector<2x48xf32> -> vector<2x48xf32>
    %c0_30 = arith.constant 0 : index
    %c0_31 = arith.constant 0 : index
    %62 = vector.load %arg5[%c0_30, %c0_31] : memref<35x32xbf16, #tpu.memory_space<vmem>>, vector<32x16xbf16>
    %c32 = arith.constant 32 : index
    %c0_32 = arith.constant 0 : index
    %63 = vector.load %arg5[%c32, %c0_32] : memref<35x32xbf16, #tpu.memory_space<vmem>>, vector<3x32xbf16>
    %c0_33 = arith.constant 0 : index
    %c0_34 = arith.constant 0 : index
    %64 = vector.load %arg1[%c0_33, %c0_34] : memref<2x3xbf16, #tpu.memory_space<vmem>>, vector<2x3xbf16>
    %cst_35 = arith.constant dense<0.000000e+00> : vector<2x32xf32>
    %65 = tpu.matmul %64, %63, %cst_35 {dimension_numbers = #tpu.dot_dimension_numbers<[1], [0], [0], [1], [0, 0, 1, 1], [], []>} : vector<2x3xbf16>, vector<3x32xbf16>, vector<2x32xf32> -> vector<2x32xf32>
    %66 = vector.broadcast %5 : vector<1x32xf32> to vector<2x32xf32>
    %67 = arith.addf %65, %66 : vector<2x32xf32>
    %cst_36 = arith.constant 0.000000e+00 : f32
    %68 = vector.broadcast %cst_36 : f32 to vector<2x32xf32>
    %69 = arith.maximumf %67, %68 : vector<2x32xf32>
    %70 = arith.truncf %69 : vector<2x32xf32> to vector<2x32xbf16>
    %cst_37 = arith.constant dense<0.000000e+00> : vector<2x16xf32>
    %71 = tpu.matmul %70, %62, %cst_37 {dimension_numbers = #tpu.dot_dimension_numbers<[1], [0], [0], [1], [0, 0, 1, 1], [], []>} : vector<2x32xbf16>, vector<32x16xbf16>, vector<2x16xf32> -> vector<2x16xf32>
    %72 = vector.broadcast %6 : vector<1x16xf32> to vector<2x16xf32>
    %73 = arith.addf %71, %72 : vector<2x16xf32>
    %74 = tpu.concatenate %73, %61 in 1 : vector<2x16xf32>, vector<2x48xf32> -> vector<2x64xf32>
    %c0_38 = arith.constant 0 : index
    %c0_39 = arith.constant 0 : index
    %c0_40 = arith.constant 0 : index
    %75 = vector.load %arg10[%c0_38, %c0_39, %c0_40] : memref<2x1x704xf32, #tpu.memory_space<vmem>>, vector<1x1x192xf32>
    %76 = vector.shape_cast %75 : vector<1x1x192xf32> to vector<1x192xf32>
    %c0_41 = arith.constant 0 : index
    %c0_42 = arith.constant 0 : index
    %c192 = arith.constant 192 : index
    %77 = vector.load %arg10[%c0_41, %c0_42, %c192] : memref<2x1x704xf32, #tpu.memory_space<vmem>>, vector<1x1x64xf32>
    %78 = vector.shape_cast %77 : vector<1x1x64xf32> to vector<1x64xf32>
    %c0_43 = arith.constant 0 : index
    %c0_44 = arith.constant 0 : index
    %c256 = arith.constant 256 : index
    %79 = vector.load %arg10[%c0_43, %c0_44, %c256] : memref<2x1x704xf32, #tpu.memory_space<vmem>>, vector<1x1x64xf32>
    %80 = vector.shape_cast %79 : vector<1x1x64xf32> to vector<1x64xf32>
    %c0_45 = arith.constant 0 : index
    %c0_46 = arith.constant 0 : index
    %c320 = arith.constant 320 : index
    %81 = vector.load %arg10[%c0_45, %c0_46, %c320] : memref<2x1x704xf32, #tpu.memory_space<vmem>>, vector<1x1x64xf32>
    %82 = vector.shape_cast %81 : vector<1x1x64xf32> to vector<1x64xf32>
    %c0_47 = arith.constant 0 : index
    %c0_48 = arith.constant 0 : index
    %c384_49 = arith.constant 384 : index
    %83 = vector.load %arg10[%c0_47, %c0_48, %c384_49] : memref<2x1x704xf32, #tpu.memory_space<vmem>>, vector<1x1x128xf32>
    %84 = vector.shape_cast %83 : vector<1x1x128xf32> to vector<1x128xf32>
    %c0_50 = arith.constant 0 : index
    %c0_51 = arith.constant 0 : index
    %c512 = arith.constant 512 : index
    %85 = vector.load %arg10[%c0_50, %c0_51, %c512] : memref<2x1x704xf32, #tpu.memory_space<vmem>>, vector<1x1x64xf32>
    %86 = vector.shape_cast %85 : vector<1x1x64xf32> to vector<1x64xf32>
    %c0_52 = arith.constant 0 : index
    %c0_53 = arith.constant 0 : index
    %c576 = arith.constant 576 : index
    %87 = vector.load %arg10[%c0_52, %c0_53, %c576] : memref<2x1x704xf32, #tpu.memory_space<vmem>>, vector<1x1x64xf32>
    %88 = vector.shape_cast %87 : vector<1x1x64xf32> to vector<1x64xf32>
    %c0_54 = arith.constant 0 : index
    %c0_55 = arith.constant 0 : index
    %c640 = arith.constant 640 : index
    %89 = vector.load %arg10[%c0_54, %c0_55, %c640] : memref<2x1x704xf32, #tpu.memory_space<vmem>>, vector<1x1x64xf32>
    %90 = vector.shape_cast %89 : vector<1x1x64xf32> to vector<1x64xf32>
    %c0_56 = arith.constant 0 : index
    %c0_57 = arith.constant 0 : index
    %c0_58 = arith.constant 0 : index
    %91 = vector.load %arg7[%c0_56, %c0_57, %c0_58] : memref<2x64x320xbf16, #tpu.memory_space<vmem>>, vector<1x64x128xbf16>
    %92 = vector.shape_cast %91 : vector<1x64x128xbf16> to vector<64x128xbf16>
    %c0_59 = arith.constant 0 : index
    %c0_60 = arith.constant 0 : index
    %c128 = arith.constant 128 : index
    %93 = vector.load %arg7[%c0_59, %c0_60, %c128] : memref<2x64x320xbf16, #tpu.memory_space<vmem>>, vector<1x64x192xbf16>
    %94 = vector.shape_cast %93 : vector<1x64x192xbf16> to vector<64x192xbf16>
    %c0_61 = arith.constant 0 : index
    %c0_62 = arith.constant 0 : index
    %c0_63 = arith.constant 0 : index
    %95 = vector.load %arg9[%c0_61, %c0_62, %c0_63] : memref<2x128x64xbf16, #tpu.memory_space<vmem>>, vector<1x128x64xbf16>
    %96 = vector.shape_cast %95 : vector<1x128x64xbf16> to vector<128x64xbf16>
    %c0_64 = arith.constant 0 : index
    %c0_65 = arith.constant 0 : index
    %c0_66 = arith.constant 0 : index
    %c0_67 = arith.constant 0 : index
    %97 = vector.load %arg8[%c0_64, %c0_65, %c0_66, %c0_67] : memref<2x8x8x64xbf16, #tpu.memory_space<vmem>>, vector<1x8x8x64xbf16>
    %98 = vector.shape_cast %97 : vector<1x8x8x64xbf16> to vector<8x8x64xbf16>
    %99 = arith.truncf %74 : vector<2x64xf32> to vector<2x64xbf16>
    %cst_68 = arith.constant dense<0.000000e+00> : vector<2x192xf32>
    %100 = tpu.matmul %99, %94, %cst_68 {dimension_numbers = #tpu.dot_dimension_numbers<[1], [0], [0], [1], [0, 0, 1, 1], [], []>} : vector<2x64xbf16>, vector<64x192xbf16>, vector<2x192xf32> -> vector<2x192xf32>
    %101 = vector.broadcast %76 : vector<1x192xf32> to vector<2x192xf32>
    %102 = arith.addf %100, %101 : vector<2x192xf32>
    %103 = arith.truncf %102 : vector<2x192xf32> to vector<2x192xbf16>
    %104 = vector.extract_strided_slice %103 {offsets = [0, 0], sizes = [2, 24], strides = [1, 1]} : vector<2x192xbf16> to vector<2x24xbf16>
    %105 = vector.extract_strided_slice %103 {offsets = [0, 24], sizes = [2, 24], strides = [1, 1]} : vector<2x192xbf16> to vector<2x24xbf16>
    %106 = vector.extract_strided_slice %103 {offsets = [0, 48], sizes = [2, 24], strides = [1, 1]} : vector<2x192xbf16> to vector<2x24xbf16>
    %107 = vector.extract_strided_slice %103 {offsets = [0, 72], sizes = [2, 24], strides = [1, 1]} : vector<2x192xbf16> to vector<2x24xbf16>
    %108 = vector.extract_strided_slice %103 {offsets = [0, 96], sizes = [2, 24], strides = [1, 1]} : vector<2x192xbf16> to vector<2x24xbf16>
    %109 = vector.extract_strided_slice %103 {offsets = [0, 120], sizes = [2, 24], strides = [1, 1]} : vector<2x192xbf16> to vector<2x24xbf16>
    %110 = vector.extract_strided_slice %103 {offsets = [0, 144], sizes = [2, 24], strides = [1, 1]} : vector<2x192xbf16> to vector<2x24xbf16>
    %111 = vector.extract_strided_slice %103 {offsets = [0, 168], sizes = [2, 24], strides = [1, 1]} : vector<2x192xbf16> to vector<2x24xbf16>
    %112 = vector.shape_cast %104 : vector<2x24xbf16> to vector<1x2x24xbf16>
    %113 = vector.shape_cast %105 : vector<2x24xbf16> to vector<1x2x24xbf16>
    %114 = vector.shape_cast %106 : vector<2x24xbf16> to vector<1x2x24xbf16>
    %115 = vector.shape_cast %107 : vector<2x24xbf16> to vector<1x2x24xbf16>
    %116 = vector.shape_cast %108 : vector<2x24xbf16> to vector<1x2x24xbf16>
    %117 = vector.shape_cast %109 : vector<2x24xbf16> to vector<1x2x24xbf16>
    %118 = vector.shape_cast %110 : vector<2x24xbf16> to vector<1x2x24xbf16>
    %119 = vector.shape_cast %111 : vector<2x24xbf16> to vector<1x2x24xbf16>
    %120 = tpu.concatenate %112, %113, %114, %115, %116, %117, %118, %119 in 0 : vector<1x2x24xbf16>, vector<1x2x24xbf16>, vector<1x2x24xbf16>, vector<1x2x24xbf16>, vector<1x2x24xbf16>, vector<1x2x24xbf16>, vector<1x2x24xbf16>, vector<1x2x24xbf16> -> vector<8x2x24xbf16>
    %121 = vector.extract_strided_slice %120 {offsets = [0, 0, 0], sizes = [8, 2, 8], strides = [1, 1, 1]} : vector<8x2x24xbf16> to vector<8x2x8xbf16>
    %122 = vector.extract_strided_slice %120 {offsets = [0, 0, 8], sizes = [8, 2, 8], strides = [1, 1, 1]} : vector<8x2x24xbf16> to vector<8x2x8xbf16>
    %123 = vector.extract_strided_slice %120 {offsets = [0, 0, 16], sizes = [8, 2, 8], strides = [1, 1, 1]} : vector<8x2x24xbf16> to vector<8x2x8xbf16>
    %cst_69 = arith.constant dense<0.000000e+00> : vector<8x2x2xf32>
    %124 = tpu.matmul %121, %122, %cst_69 {dimension_numbers = #tpu.dot_dimension_numbers<[2], [2], [1], [1], [0, 0, 0, 1, 1, 1], [0], [0]>} : vector<8x2x8xbf16>, vector<8x2x8xbf16>, vector<8x2x2xf32> -> vector<8x2x2xf32>
    %cst_70 = arith.constant dense<0xFF800000> : vector<8x2xf32>
    %125 = vector.multi_reduction <maximumf>, %124, %cst_70 [2] : vector<8x2x2xf32> to vector<8x2xf32>
    %126 = vector.shape_cast %125 : vector<8x2xf32> to vector<8x2x1xf32>
    %127 = vector.broadcast %126 : vector<8x2x1xf32> to vector<8x2x2xf32>
    %128 = arith.subf %124, %127 : vector<8x2x2xf32>
    %129 = math.exp %128 : vector<8x2x2xf32>
    %cst_71 = arith.constant dense<0.000000e+00> : vector<8x2xf32>
    %130 = vector.multi_reduction <add>, %129, %cst_71 [2] : vector<8x2x2xf32> to vector<8x2xf32>
    %131 = vector.shape_cast %130 : vector<8x2xf32> to vector<8x2x1xf32>
    %132 = tpu.reciprocal %131 {approx = true} : vector<8x2x1xf32> -> vector<8x2x1xf32>
    %133 = vector.broadcast %132 : vector<8x2x1xf32> to vector<8x2x2xf32>
    %134 = arith.mulf %129, %133 : vector<8x2x2xf32>
    %135 = arith.truncf %134 : vector<8x2x2xf32> to vector<8x2x2xbf16>
    %cst_72 = arith.constant dense<0.000000e+00> : vector<8x2x8xf32>
    %136 = tpu.matmul %135, %123, %cst_72 {dimension_numbers = #tpu.dot_dimension_numbers<[2], [1], [1], [2], [0, 0, 0, 1, 1, 2], [0], [0]>} : vector<8x2x2xbf16>, vector<8x2x8xbf16>, vector<8x2x8xf32> -> vector<8x2x8xf32>
    %137 = arith.truncf %136 : vector<8x2x8xf32> to vector<8x2x8xbf16>
    %cst_73 = arith.constant dense<0.000000e+00> : vector<8x2x64xf32>
    %138 = tpu.matmul %137, %98, %cst_73 {dimension_numbers = #tpu.dot_dimension_numbers<[2], [1], [1], [2], [0, 0, 0, 1, 1, 2], [0], [0]>} : vector<8x2x8xbf16>, vector<8x8x64xbf16>, vector<8x2x64xf32> -> vector<8x2x64xf32>
    %cst_74 = arith.constant dense<0.000000e+00> : vector<2x64xf32>
    %139 = vector.multi_reduction <add>, %138, %cst_74 [0] : vector<8x2x64xf32> to vector<2x64xf32>
    %140 = vector.broadcast %78 : vector<1x64xf32> to vector<2x64xf32>
    %141 = arith.addf %139, %140 : vector<2x64xf32>
    %142 = arith.addf %74, %141 : vector<2x64xf32>
    %cst_75 = arith.constant dense<0.000000e+00> : vector<2xf32>
    %143 = vector.multi_reduction <add>, %142, %cst_75 [1] : vector<2x64xf32> to vector<2xf32>
    %144 = vector.shape_cast %143 : vector<2xf32> to vector<2x1xf32>
    %cst_76 = arith.constant 6.400000e+01 : f32
    %145 = vector.broadcast %cst_76 : f32 to vector<2x1xf32>
    %146 = arith.divf %144, %145 : vector<2x1xf32>
    %147 = vector.broadcast %146 : vector<2x1xf32> to vector<2x64xf32>
    %148 = arith.subf %142, %147 : vector<2x64xf32>
    %149 = arith.mulf %148, %148 : vector<2x64xf32>
    %cst_77 = arith.constant dense<0.000000e+00> : vector<2xf32>
    %150 = vector.multi_reduction <add>, %149, %cst_77 [1] : vector<2x64xf32> to vector<2xf32>
    %151 = vector.shape_cast %150 : vector<2xf32> to vector<2x1xf32>
    %cst_78 = arith.constant 6.400000e+01 : f32
    %152 = vector.broadcast %cst_78 : f32 to vector<2x1xf32>
    %153 = arith.divf %151, %152 : vector<2x1xf32>
    %154 = vector.broadcast %146 : vector<2x1xf32> to vector<2x64xf32>
    %155 = arith.subf %142, %154 : vector<2x64xf32>
    %cst_79 = arith.constant 9.99999974E-6 : f32
    %156 = vector.broadcast %cst_79 : f32 to vector<2x1xf32>
    %157 = arith.addf %153, %156 : vector<2x1xf32>
    %158 = math.rsqrt %157 : vector<2x1xf32>
    %159 = vector.broadcast %158 : vector<2x1xf32> to vector<2x64xf32>
    %160 = arith.mulf %155, %159 : vector<2x64xf32>
    %161 = vector.broadcast %80 : vector<1x64xf32> to vector<2x64xf32>
    %162 = arith.mulf %160, %161 : vector<2x64xf32>
    %163 = vector.broadcast %82 : vector<1x64xf32> to vector<2x64xf32>
    %164 = arith.addf %162, %163 : vector<2x64xf32>
    %165 = arith.truncf %164 : vector<2x64xf32> to vector<2x64xbf16>
    %cst_80 = arith.constant dense<0.000000e+00> : vector<2x128xf32>
    %166 = tpu.matmul %165, %92, %cst_80 {dimension_numbers = #tpu.dot_dimension_numbers<[1], [0], [0], [1], [0, 0, 1, 1], [], []>} : vector<2x64xbf16>, vector<64x128xbf16>, vector<2x128xf32> -> vector<2x128xf32>
    %167 = vector.broadcast %84 : vector<1x128xf32> to vector<2x128xf32>
    %168 = arith.addf %166, %167 : vector<2x128xf32>
    %cst_81 = arith.constant 0.000000e+00 : f32
    %169 = vector.broadcast %cst_81 : f32 to vector<2x128xf32>
    %170 = arith.maximumf %168, %169 : vector<2x128xf32>
    %171 = arith.truncf %170 : vector<2x128xf32> to vector<2x128xbf16>
    %cst_82 = arith.constant dense<0.000000e+00> : vector<2x64xf32>
    %172 = tpu.matmul %171, %96, %cst_82 {dimension_numbers = #tpu.dot_dimension_numbers<[1], [0], [0], [1], [0, 0, 1, 1], [], []>} : vector<2x128xbf16>, vector<128x64xbf16>, vector<2x64xf32> -> vector<2x64xf32>
    %173 = vector.broadcast %86 : vector<1x64xf32> to vector<2x64xf32>
    %174 = arith.addf %172, %173 : vector<2x64xf32>
    %175 = arith.addf %164, %174 : vector<2x64xf32>
    %cst_83 = arith.constant dense<0.000000e+00> : vector<2xf32>
    %176 = vector.multi_reduction <add>, %175, %cst_83 [1] : vector<2x64xf32> to vector<2xf32>
    %177 = vector.shape_cast %176 : vector<2xf32> to vector<2x1xf32>
    %cst_84 = arith.constant 6.400000e+01 : f32
    %178 = vector.broadcast %cst_84 : f32 to vector<2x1xf32>
    %179 = arith.divf %177, %178 : vector<2x1xf32>
    %180 = vector.broadcast %179 : vector<2x1xf32> to vector<2x64xf32>
    %181 = arith.subf %175, %180 : vector<2x64xf32>
    %182 = arith.mulf %181, %181 : vector<2x64xf32>
    %cst_85 = arith.constant dense<0.000000e+00> : vector<2xf32>
    %183 = vector.multi_reduction <add>, %182, %cst_85 [1] : vector<2x64xf32> to vector<2xf32>
    %184 = vector.shape_cast %183 : vector<2xf32> to vector<2x1xf32>
    %cst_86 = arith.constant 6.400000e+01 : f32
    %185 = vector.broadcast %cst_86 : f32 to vector<2x1xf32>
    %186 = arith.divf %184, %185 : vector<2x1xf32>
    %187 = vector.broadcast %179 : vector<2x1xf32> to vector<2x64xf32>
    %188 = arith.subf %175, %187 : vector<2x64xf32>
    %cst_87 = arith.constant 9.99999974E-6 : f32
    %189 = vector.broadcast %cst_87 : f32 to vector<2x1xf32>
    %190 = arith.addf %186, %189 : vector<2x1xf32>
    %191 = math.rsqrt %190 : vector<2x1xf32>
    %192 = vector.broadcast %191 : vector<2x1xf32> to vector<2x64xf32>
    %193 = arith.mulf %188, %192 : vector<2x64xf32>
    %194 = vector.broadcast %88 : vector<1x64xf32> to vector<2x64xf32>
    %195 = arith.mulf %193, %194 : vector<2x64xf32>
    %196 = vector.broadcast %90 : vector<1x64xf32> to vector<2x64xf32>
    %197 = arith.addf %195, %196 : vector<2x64xf32>
    %c1 = arith.constant 1 : index
    %c0_88 = arith.constant 0 : index
    %c0_89 = arith.constant 0 : index
    %198 = vector.load %arg10[%c1, %c0_88, %c0_89] : memref<2x1x704xf32, #tpu.memory_space<vmem>>, vector<1x1x192xf32>
    %199 = vector.shape_cast %198 : vector<1x1x192xf32> to vector<1x192xf32>
    %c1_90 = arith.constant 1 : index
    %c0_91 = arith.constant 0 : index
    %c192_92 = arith.constant 192 : index
    %200 = vector.load %arg10[%c1_90, %c0_91, %c192_92] : memref<2x1x704xf32, #tpu.memory_space<vmem>>, vector<1x1x64xf32>
    %201 = vector.shape_cast %200 : vector<1x1x64xf32> to vector<1x64xf32>
    %c1_93 = arith.constant 1 : index
    %c0_94 = arith.constant 0 : index
    %c256_95 = arith.constant 256 : index
    %202 = vector.load %arg10[%c1_93, %c0_94, %c256_95] : memref<2x1x704xf32, #tpu.memory_space<vmem>>, vector<1x1x64xf32>
    %203 = vector.shape_cast %202 : vector<1x1x64xf32> to vector<1x64xf32>
    %c1_96 = arith.constant 1 : index
    %c0_97 = arith.constant 0 : index
    %c320_98 = arith.constant 320 : index
    %204 = vector.load %arg10[%c1_96, %c0_97, %c320_98] : memref<2x1x704xf32, #tpu.memory_space<vmem>>, vector<1x1x64xf32>
    %205 = vector.shape_cast %204 : vector<1x1x64xf32> to vector<1x64xf32>
    %c1_99 = arith.constant 1 : index
    %c0_100 = arith.constant 0 : index
    %c384_101 = arith.constant 384 : index
    %206 = vector.load %arg10[%c1_99, %c0_100, %c384_101] : memref<2x1x704xf32, #tpu.memory_space<vmem>>, vector<1x1x128xf32>
    %207 = vector.shape_cast %206 : vector<1x1x128xf32> to vector<1x128xf32>
    %c1_102 = arith.constant 1 : index
    %c0_103 = arith.constant 0 : index
    %c512_104 = arith.constant 512 : index
    %208 = vector.load %arg10[%c1_102, %c0_103, %c512_104] : memref<2x1x704xf32, #tpu.memory_space<vmem>>, vector<1x1x64xf32>
    %209 = vector.shape_cast %208 : vector<1x1x64xf32> to vector<1x64xf32>
    %c1_105 = arith.constant 1 : index
    %c0_106 = arith.constant 0 : index
    %c576_107 = arith.constant 576 : index
    %210 = vector.load %arg10[%c1_105, %c0_106, %c576_107] : memref<2x1x704xf32, #tpu.memory_space<vmem>>, vector<1x1x64xf32>
    %211 = vector.shape_cast %210 : vector<1x1x64xf32> to vector<1x64xf32>
    %c1_108 = arith.constant 1 : index
    %c0_109 = arith.constant 0 : index
    %c640_110 = arith.constant 640 : index
    %212 = vector.load %arg10[%c1_108, %c0_109, %c640_110] : memref<2x1x704xf32, #tpu.memory_space<vmem>>, vector<1x1x64xf32>
    %213 = vector.shape_cast %212 : vector<1x1x64xf32> to vector<1x64xf32>
    %c1_111 = arith.constant 1 : index
    %c0_112 = arith.constant 0 : index
    %c0_113 = arith.constant 0 : index
    %214 = vector.load %arg7[%c1_111, %c0_112, %c0_113] : memref<2x64x320xbf16, #tpu.memory_space<vmem>>, vector<1x64x128xbf16>
    %215 = vector.shape_cast %214 : vector<1x64x128xbf16> to vector<64x128xbf16>
    %c1_114 = arith.constant 1 : index
    %c0_115 = arith.constant 0 : index
    %c128_116 = arith.constant 128 : index
    %216 = vector.load %arg7[%c1_114, %c0_115, %c128_116] : memref<2x64x320xbf16, #tpu.memory_space<vmem>>, vector<1x64x192xbf16>
    %217 = vector.shape_cast %216 : vector<1x64x192xbf16> to vector<64x192xbf16>
    %c1_117 = arith.constant 1 : index
    %c0_118 = arith.constant 0 : index
    %c0_119 = arith.constant 0 : index
    %218 = vector.load %arg9[%c1_117, %c0_118, %c0_119] : memref<2x128x64xbf16, #tpu.memory_space<vmem>>, vector<1x128x64xbf16>
    %219 = vector.shape_cast %218 : vector<1x128x64xbf16> to vector<128x64xbf16>
    %c1_120 = arith.constant 1 : index
    %c0_121 = arith.constant 0 : index
    %c0_122 = arith.constant 0 : index
    %c0_123 = arith.constant 0 : index
    %220 = vector.load %arg8[%c1_120, %c0_121, %c0_122, %c0_123] : memref<2x8x8x64xbf16, #tpu.memory_space<vmem>>, vector<1x8x8x64xbf16>
    %221 = vector.shape_cast %220 : vector<1x8x8x64xbf16> to vector<8x8x64xbf16>
    %222 = arith.truncf %197 : vector<2x64xf32> to vector<2x64xbf16>
    %cst_124 = arith.constant dense<0.000000e+00> : vector<2x192xf32>
    %223 = tpu.matmul %222, %217, %cst_124 {dimension_numbers = #tpu.dot_dimension_numbers<[1], [0], [0], [1], [0, 0, 1, 1], [], []>} : vector<2x64xbf16>, vector<64x192xbf16>, vector<2x192xf32> -> vector<2x192xf32>
    %224 = vector.broadcast %199 : vector<1x192xf32> to vector<2x192xf32>
    %225 = arith.addf %223, %224 : vector<2x192xf32>
    %226 = arith.truncf %225 : vector<2x192xf32> to vector<2x192xbf16>
    %227 = vector.extract_strided_slice %226 {offsets = [0, 0], sizes = [2, 24], strides = [1, 1]} : vector<2x192xbf16> to vector<2x24xbf16>
    %228 = vector.extract_strided_slice %226 {offsets = [0, 24], sizes = [2, 24], strides = [1, 1]} : vector<2x192xbf16> to vector<2x24xbf16>
    %229 = vector.extract_strided_slice %226 {offsets = [0, 48], sizes = [2, 24], strides = [1, 1]} : vector<2x192xbf16> to vector<2x24xbf16>
    %230 = vector.extract_strided_slice %226 {offsets = [0, 72], sizes = [2, 24], strides = [1, 1]} : vector<2x192xbf16> to vector<2x24xbf16>
    %231 = vector.extract_strided_slice %226 {offsets = [0, 96], sizes = [2, 24], strides = [1, 1]} : vector<2x192xbf16> to vector<2x24xbf16>
    %232 = vector.extract_strided_slice %226 {offsets = [0, 120], sizes = [2, 24], strides = [1, 1]} : vector<2x192xbf16> to vector<2x24xbf16>
    %233 = vector.extract_strided_slice %226 {offsets = [0, 144], sizes = [2, 24], strides = [1, 1]} : vector<2x192xbf16> to vector<2x24xbf16>
    %234 = vector.extract_strided_slice %226 {offsets = [0, 168], sizes = [2, 24], strides = [1, 1]} : vector<2x192xbf16> to vector<2x24xbf16>
    %235 = vector.shape_cast %227 : vector<2x24xbf16> to vector<1x2x24xbf16>
    %236 = vector.shape_cast %228 : vector<2x24xbf16> to vector<1x2x24xbf16>
    %237 = vector.shape_cast %229 : vector<2x24xbf16> to vector<1x2x24xbf16>
    %238 = vector.shape_cast %230 : vector<2x24xbf16> to vector<1x2x24xbf16>
    %239 = vector.shape_cast %231 : vector<2x24xbf16> to vector<1x2x24xbf16>
    %240 = vector.shape_cast %232 : vector<2x24xbf16> to vector<1x2x24xbf16>
    %241 = vector.shape_cast %233 : vector<2x24xbf16> to vector<1x2x24xbf16>
    %242 = vector.shape_cast %234 : vector<2x24xbf16> to vector<1x2x24xbf16>
    %243 = tpu.concatenate %235, %236, %237, %238, %239, %240, %241, %242 in 0 : vector<1x2x24xbf16>, vector<1x2x24xbf16>, vector<1x2x24xbf16>, vector<1x2x24xbf16>, vector<1x2x24xbf16>, vector<1x2x24xbf16>, vector<1x2x24xbf16>, vector<1x2x24xbf16> -> vector<8x2x24xbf16>
    %244 = vector.extract_strided_slice %243 {offsets = [0, 0, 0], sizes = [8, 2, 8], strides = [1, 1, 1]} : vector<8x2x24xbf16> to vector<8x2x8xbf16>
    %245 = vector.extract_strided_slice %243 {offsets = [0, 0, 8], sizes = [8, 2, 8], strides = [1, 1, 1]} : vector<8x2x24xbf16> to vector<8x2x8xbf16>
    %246 = vector.extract_strided_slice %243 {offsets = [0, 0, 16], sizes = [8, 2, 8], strides = [1, 1, 1]} : vector<8x2x24xbf16> to vector<8x2x8xbf16>
    %cst_125 = arith.constant dense<0.000000e+00> : vector<8x2x2xf32>
    %247 = tpu.matmul %244, %245, %cst_125 {dimension_numbers = #tpu.dot_dimension_numbers<[2], [2], [1], [1], [0, 0, 0, 1, 1, 1], [0], [0]>} : vector<8x2x8xbf16>, vector<8x2x8xbf16>, vector<8x2x2xf32> -> vector<8x2x2xf32>
    %cst_126 = arith.constant dense<0xFF800000> : vector<8x2xf32>
    %248 = vector.multi_reduction <maximumf>, %247, %cst_126 [2] : vector<8x2x2xf32> to vector<8x2xf32>
    %249 = vector.shape_cast %248 : vector<8x2xf32> to vector<8x2x1xf32>
    %250 = vector.broadcast %249 : vector<8x2x1xf32> to vector<8x2x2xf32>
    %251 = arith.subf %247, %250 : vector<8x2x2xf32>
    %252 = math.exp %251 : vector<8x2x2xf32>
    %cst_127 = arith.constant dense<0.000000e+00> : vector<8x2xf32>
    %253 = vector.multi_reduction <add>, %252, %cst_127 [2] : vector<8x2x2xf32> to vector<8x2xf32>
    %254 = vector.shape_cast %253 : vector<8x2xf32> to vector<8x2x1xf32>
    %255 = tpu.reciprocal %254 {approx = true} : vector<8x2x1xf32> -> vector<8x2x1xf32>
    %256 = vector.broadcast %255 : vector<8x2x1xf32> to vector<8x2x2xf32>
    %257 = arith.mulf %252, %256 : vector<8x2x2xf32>
    %258 = arith.truncf %257 : vector<8x2x2xf32> to vector<8x2x2xbf16>
    %cst_128 = arith.constant dense<0.000000e+00> : vector<8x2x8xf32>
    %259 = tpu.matmul %258, %246, %cst_128 {dimension_numbers = #tpu.dot_dimension_numbers<[2], [1], [1], [2], [0, 0, 0, 1, 1, 2], [0], [0]>} : vector<8x2x2xbf16>, vector<8x2x8xbf16>, vector<8x2x8xf32> -> vector<8x2x8xf32>
    %260 = arith.truncf %259 : vector<8x2x8xf32> to vector<8x2x8xbf16>
    %cst_129 = arith.constant dense<0.000000e+00> : vector<8x2x64xf32>
    %261 = tpu.matmul %260, %221, %cst_129 {dimension_numbers = #tpu.dot_dimension_numbers<[2], [1], [1], [2], [0, 0, 0, 1, 1, 2], [0], [0]>} : vector<8x2x8xbf16>, vector<8x8x64xbf16>, vector<8x2x64xf32> -> vector<8x2x64xf32>
    %cst_130 = arith.constant dense<0.000000e+00> : vector<2x64xf32>
    %262 = vector.multi_reduction <add>, %261, %cst_130 [0] : vector<8x2x64xf32> to vector<2x64xf32>
    %263 = vector.broadcast %201 : vector<1x64xf32> to vector<2x64xf32>
    %264 = arith.addf %262, %263 : vector<2x64xf32>
    %265 = arith.addf %197, %264 : vector<2x64xf32>
    %cst_131 = arith.constant dense<0.000000e+00> : vector<2xf32>
    %266 = vector.multi_reduction <add>, %265, %cst_131 [1] : vector<2x64xf32> to vector<2xf32>
    %267 = vector.shape_cast %266 : vector<2xf32> to vector<2x1xf32>
    %cst_132 = arith.constant 6.400000e+01 : f32
    %268 = vector.broadcast %cst_132 : f32 to vector<2x1xf32>
    %269 = arith.divf %267, %268 : vector<2x1xf32>
    %270 = vector.broadcast %269 : vector<2x1xf32> to vector<2x64xf32>
    %271 = arith.subf %265, %270 : vector<2x64xf32>
    %272 = arith.mulf %271, %271 : vector<2x64xf32>
    %cst_133 = arith.constant dense<0.000000e+00> : vector<2xf32>
    %273 = vector.multi_reduction <add>, %272, %cst_133 [1] : vector<2x64xf32> to vector<2xf32>
    %274 = vector.shape_cast %273 : vector<2xf32> to vector<2x1xf32>
    %cst_134 = arith.constant 6.400000e+01 : f32
    %275 = vector.broadcast %cst_134 : f32 to vector<2x1xf32>
    %276 = arith.divf %274, %275 : vector<2x1xf32>
    %277 = vector.broadcast %269 : vector<2x1xf32> to vector<2x64xf32>
    %278 = arith.subf %265, %277 : vector<2x64xf32>
    %cst_135 = arith.constant 9.99999974E-6 : f32
    %279 = vector.broadcast %cst_135 : f32 to vector<2x1xf32>
    %280 = arith.addf %276, %279 : vector<2x1xf32>
    %281 = math.rsqrt %280 : vector<2x1xf32>
    %282 = vector.broadcast %281 : vector<2x1xf32> to vector<2x64xf32>
    %283 = arith.mulf %278, %282 : vector<2x64xf32>
    %284 = vector.broadcast %203 : vector<1x64xf32> to vector<2x64xf32>
    %285 = arith.mulf %283, %284 : vector<2x64xf32>
    %286 = vector.broadcast %205 : vector<1x64xf32> to vector<2x64xf32>
    %287 = arith.addf %285, %286 : vector<2x64xf32>
    %288 = arith.truncf %287 : vector<2x64xf32> to vector<2x64xbf16>
    %cst_136 = arith.constant dense<0.000000e+00> : vector<2x128xf32>
    %289 = tpu.matmul %288, %215, %cst_136 {dimension_numbers = #tpu.dot_dimension_numbers<[1], [0], [0], [1], [0, 0, 1, 1], [], []>} : vector<2x64xbf16>, vector<64x128xbf16>, vector<2x128xf32> -> vector<2x128xf32>
    %290 = vector.broadcast %207 : vector<1x128xf32> to vector<2x128xf32>
    %291 = arith.addf %289, %290 : vector<2x128xf32>
    %cst_137 = arith.constant 0.000000e+00 : f32
    %292 = vector.broadcast %cst_137 : f32 to vector<2x128xf32>
    %293 = arith.maximumf %291, %292 : vector<2x128xf32>
    %294 = arith.truncf %293 : vector<2x128xf32> to vector<2x128xbf16>
    %cst_138 = arith.constant dense<0.000000e+00> : vector<2x64xf32>
    %295 = tpu.matmul %294, %219, %cst_138 {dimension_numbers = #tpu.dot_dimension_numbers<[1], [0], [0], [1], [0, 0, 1, 1], [], []>} : vector<2x128xbf16>, vector<128x64xbf16>, vector<2x64xf32> -> vector<2x64xf32>
    %296 = vector.broadcast %209 : vector<1x64xf32> to vector<2x64xf32>
    %297 = arith.addf %295, %296 : vector<2x64xf32>
    %298 = arith.addf %287, %297 : vector<2x64xf32>
    %cst_139 = arith.constant dense<0.000000e+00> : vector<2xf32>
    %299 = vector.multi_reduction <add>, %298, %cst_139 [1] : vector<2x64xf32> to vector<2xf32>
    %300 = vector.shape_cast %299 : vector<2xf32> to vector<2x1xf32>
    %cst_140 = arith.constant 6.400000e+01 : f32
    %301 = vector.broadcast %cst_140 : f32 to vector<2x1xf32>
    %302 = arith.divf %300, %301 : vector<2x1xf32>
    %303 = vector.broadcast %302 : vector<2x1xf32> to vector<2x64xf32>
    %304 = arith.subf %298, %303 : vector<2x64xf32>
    %305 = arith.mulf %304, %304 : vector<2x64xf32>
    %cst_141 = arith.constant dense<0.000000e+00> : vector<2xf32>
    %306 = vector.multi_reduction <add>, %305, %cst_141 [1] : vector<2x64xf32> to vector<2xf32>
    %307 = vector.shape_cast %306 : vector<2xf32> to vector<2x1xf32>
    %cst_142 = arith.constant 6.400000e+01 : f32
    %308 = vector.broadcast %cst_142 : f32 to vector<2x1xf32>
    %309 = arith.divf %307, %308 : vector<2x1xf32>
    %310 = vector.broadcast %302 : vector<2x1xf32> to vector<2x64xf32>
    %311 = arith.subf %298, %310 : vector<2x64xf32>
    %cst_143 = arith.constant 9.99999974E-6 : f32
    %312 = vector.broadcast %cst_143 : f32 to vector<2x1xf32>
    %313 = arith.addf %309, %312 : vector<2x1xf32>
    %314 = math.rsqrt %313 : vector<2x1xf32>
    %315 = vector.broadcast %314 : vector<2x1xf32> to vector<2x64xf32>
    %316 = arith.mulf %311, %315 : vector<2x64xf32>
    %317 = vector.broadcast %211 : vector<1x64xf32> to vector<2x64xf32>
    %318 = arith.mulf %316, %317 : vector<2x64xf32>
    %319 = vector.broadcast %213 : vector<1x64xf32> to vector<2x64xf32>
    %320 = arith.addf %318, %319 : vector<2x64xf32>
    %321 = arith.truncf %320 : vector<2x64xf32> to vector<2x64xbf16>
    %c0_144 = arith.constant 0 : index
    %c0_145 = arith.constant 0 : index
    %322 = vector.load %arg11[%c0_144, %c0_145] : memref<64x128xbf16, #tpu.memory_space<vmem>>, vector<64x128xbf16>
    %cst_146 = arith.constant dense<0.000000e+00> : vector<2x128xf32>
    %323 = tpu.matmul %321, %322, %cst_146 {dimension_numbers = #tpu.dot_dimension_numbers<[1], [0], [0], [1], [0, 0, 1, 1], [], []>} : vector<2x64xbf16>, vector<64x128xbf16>, vector<2x128xf32> -> vector<2x128xf32>
    %324 = vector.broadcast %7 : vector<1x128xf32> to vector<2x128xf32>
    %325 = arith.addf %323, %324 : vector<2x128xf32>
    %c0_147 = arith.constant 0 : index
    %c0_148 = arith.constant 0 : index
    %326 = vector.load %arg12[%c0_147, %c0_148] : memref<2x128xf32, #tpu.memory_space<vmem>>, vector<2x128xf32>
    tpu.vector_store %arg12[%c0_147, %c0_148], %325 {strides = array<i32>} : memref<2x128xf32, #tpu.memory_space<vmem>>, vector<2x128xf32>,
    return
  }
}

</mosaic_0001>

<bundles_post_ra>
// kernel: forward.1
= control target key start
LH: loop header
LB: loop body
LE: loop exit
PB: predicated region body
PF: predicated region fallthrough
CT: control target
= control target key end

     0   :  { %vm141_vm0 = vcmask 392192   ;;  %s5949_s17 = smov 80   ;;  %s7637_s0 = inlined_call_operand.vmem [shape: bf16[128,48], index: 0, kind: input, shape index: {}]   ;;  %s7638_s1 = inlined_call_operand.vmem [shape: bf16[2,3], index: 1, kind: input, shape index: {}]   ;;  %s7639_s2 = inlined_call_operand.vmem [shape: bf16[2,128], index: 2, kind: input, shape index: {}]   ;;  %s7640_s3 = inlined_call_operand.vmem [shape: bf16[48,240], index: 3, kind: input, shape index: {}]   ;;  %s7641_s4 = inlined_call_operand.vmem [shape: bf16[192,48], index: 4, kind: input, shape index: {}]   ;;  %s7642_s5 = inlined_call_operand.vmem [shape: bf16[35,32], index: 5, kind: input, shape index: {}]   ;;  %s7643_s6 = inlined_call_operand.vmem [shape: f32[1,560], index: 6, kind: input, shape index: {}]   ;;  %s7644_s7 = inlined_call_operand.vmem [shape: bf16[2,64,320], index: 7, kind: input, shape index: {}]   ;;  %s7645_s8 = inlined_call_operand.vmem [shape: bf16[2,8,8,64], index: 8, kind: input, shape index: {}]   ;;  %s7646_s9 = inlined_call_operand.vmem [shape: bf16[2,128,64], index: 9, kind: input, shape index: {}]   ;;  %s7647_s10 = inlined_call_operand.vmem [shape: f32[2,1,704], index: 10, kind: input, shape index: {}]   ;;  %s7648_s11 = inlined_call_operand.vmem [shape: bf16[64,128], index: 11, kind: input, shape index: {}]   ;;  %s7649_s12 = inlined_call_operand.hbm [shape: f32[2,128], index: 12, kind: output, shape index: {}]  }
   0x1   :  { %v5671_v0 = vld [vmem:[%s7640_s3] ss:$8 sps:$4 sm:$0xff]   ;;  %v5672_v1 = vld [vmem:[%s7640_s3 + $0x10] ss:$8 sps:$4 sm:$0xff]   ;;  %v5682_v6 = vld [vmem:[%s7640_s3 + $0x4] ss:$8 sps:$4 sm:$0xff]  }
   0x2   :  { %5234 = vmatprep.subr.bf16.mxu0 %v5671_v0  ;;  %v5674_v2 = vld [vmem:[%s7637_s0] sm:$0xff]   ;;  %v5675_v4 = vld [vmem:[%s7637_s0 + $0x8] sm:$0xff]   ;;  %v5676_v5 = vld [vmem:[%s7637_s0 + $0x10] sm:$0xff]   ;;  %566 = vrot.lane.b32.xlu1 %v5682_v6, %s5949_s17 }
   0x3   :  { %5235 = vmatpush3.bf16.msra.mxu0 %v5671_v0  ;;  %v5673_v3 = vld [vmem:[%s7640_s3 + $0x20] ss:$8 sps:$4 sm:$0xff]   ;;  %5240 = vmatprep.mubr.msk.bf16.mxu0 %vm141_vm0, %v5674_v2  ;;  %v5684_v7 = vld [vmem:[%s7640_s3 + $0x10] ss:$8 sps:$4 sm:$0xff]   ;;  %v5687_v10 = vld [vmem:[%s7640_s3 + $0x14] ss:$8 sps:$4 sm:$0xff]  }
   0x4   :  { %5236 = vmatprep.subr.bf16.mxu0 %v5672_v1  ;;  %v5686_v8 = vld [vmem:[%s7640_s3] ss:$8 sps:$4 sm:$0xff]   ;;  %v5677_v11 = vld [vmem:[%s7637_s0 + $0x18] sm:$0xff]   ;;  %v5680_v14 = vld [vmem:[%s7637_s0 + $0x30] sm:$0xff]  }
   0x5   :  { %v6064_v9 = vld [vmem:[%s7643_s6] ss:$0 sm:$0xff]  ;;  %564 = vrot.lane.b32.xlu0 %v5686_v8, %s5949_s17  ;;  %v5679_v13 = vld [vmem:[%s7637_s0 + $0x28] sm:$0xff]   ;;  %v5681_v15 = vld [vmem:[%s7637_s0 + $0x38] sm:$0xff]  }
   0x6   :  { %v5678_v12 = vld [vmem:[%s7637_s0 + $0x20] sm:$0xff]   ;;  %568 = vrot.lane.b32.xlu1 %v5684_v7, %s5949_s17 }
   0x7   :  { %5237 = vmatpush3.bf16.msra.mxu0 %v5672_v1 }
   0x8   :  { %5238 = vmatprep.subr.bf16.mxu0 %v5673_v3 }
   0x9   :  { %472 = vrot.lane.b32.xlu0 %v6064_v9, %s5949_s17 }
   0xa   :  { %570 = vrot.lane.b32.xlu1 %v5687_v10, %s5949_s17 }
   0xb   :  { %5239 = vmatpush3.bf16.msra.mxu0 %v5673_v3 }
   0xe   :  { %5241 = vmatmul.mubr.msk.bf16.vlgmr.msra.gmra.mrb[0].mxu0 %vm141_vm0, %v5675_v4 }
   0xf   :  { %5244 = vmatprep.mubr.msk.bf16.mxu0 %vm141_vm0, %v5676_v5 }
  0x16   :  { %5245 = vmatmul.mubr.msk.bf16.gmra.mrb[4].mxu0 %vm141_vm0, %v5677_v11 }
  0x17   :  { %5248 = vmatprep.mubr.msk.bf16.mxu0 %vm141_vm0, %v5678_v12 }
  0x1e   :  { %5249 = vmatmul.mubr.msk.bf16.gmra.mrb[8].mxu0 %vm141_vm0, %v5679_v13 }
  0x1f   :  { %5252 = vmatprep.mubr.msk.bf16.mxu0 %vm141_vm0, %v5680_v14 }
  0x26   :  { %5253 = vmatmul.mubr.msk.bf16.gmra.mrb[12].mxu0 %vm141_vm0, %v5681_v15 }
  0x27   :  { %17 = vsyncpa [#allocation3], 0  ;;  %vm576_vm1 = vcmask 654336   ;;  %v492_v61 = vlaneseq  ;;  %v44_v1 = vld [vmem:[%s7643_s6] sm:$0x3]  ;;  %s5950_s20 = smov 32  }
  0x28   :  { %s5952_s30 = smov 112   ;;  %vm504_vm2 = vcmask 261120   ;;  %s5953_s0 = smov 48   ;;  %vm590_vm3 = vcmask 916480   ;;  %vm1139_vm4 = vcmask 523264   ;;  %vm5955_vm5 = vmmov 0  }
  0x29   :  { %v493_v63 = vshrl.u32 %v492_v61, 7  ;;  %s5956_s21 = smov 96   ;;  %vm1342_vm6 = vcmask 1040384   ;;  %vm1343_vm7 = vcmask 1041408   ;;  %vm1338_vm8 = vcmask 23552   ;;  %s5959_s28 = smov 104  }
  0x2a   :  { %vm1453_vm9 = vcmask 130048   ;;  %s5960_s29 = smov 56   ;;  %s5961_s13 = smov 8   ;;  %vm1613_vm10 = vcmask 64512   ;;  %vm2004_vm11 = vcmask 9216   ;;  %vm2103_vm12 = vcmask 15360  }
  0x2b   :  { %v6157_v0 = vsub.s32 1, %v493_v63  ;;  %v6163_v3 = vsub.s32 0, %v493_v63  ;;  %s5962_s14 = smov 88   ;;  %vm2497_vm13 = vcmask 1043456   ;;  %s5964_s22 = smov 64   ;;  %vm2863_vm14 = vcmask 517120  }
  0x2d   :  { %v499_v2 = vrot.slane %v44_v1, %v6157_v0  ;;  %v495_v4 = vrot.slane %v44_v1, %v6163_v3 }
  0x74   :  { %v567_v16 = vpop.permute.xlu1 %566 }
  0x75   :  { %618 = vmatprep.subr.bf16.mxu1 %v567_v16 }
  0x77   :  { %v565_v17 = vpop.permute.xlu0 %564 }
  0x78   :  { %v577_v18 = vsel %vm576_vm1, %v565_v17, %v567_v16  ;;  %v569_v19 = vpop.permute.xlu1 %568 }
  0x79   :  { %619 = vmatpush1.bf16.msra.mxu1 %v577_v18 }
  0x7b   :  { %v6188_v14 = vpop.permute.xlu0 %472 }
  0x7c   :  { %v571_v20 = vpop.permute.xlu1 %570 }
  0x7d   :  { %620 = vmatprep.subr.bf16.mxu1 %v571_v20  ;;  %v578_v21 = vsel %vm576_vm1, %v569_v19, %v571_v20 }
  0x7e   :  { %621 = vmatpush1.bf16.msra.mxu1 %v578_v21 }
  0xe1   :  { %v5242_v22 = vpop.f32.mrb[0].mxu0 }
  0xe2   :  { %v6098_v23 = vadd.f32 %v5242_v22, %v6064_v9  ;;  %v200_v24 = vpop.f32.mrb[1].mxu0 }
  0xe3   :  { %v6101_v25 = vadd.f32 %v6064_v9, %v200_v24  ;;  %v5243_v26 = vpop.f32.mrb[2].mxu0 }
  0xe4   :  { %v6104_v27 = vadd.f32 %v5243_v26, %v6064_v9  ;;  %v203_v28 = vpop.f32.mrb[3].mxu0  ;;  %v269_v29 = vsel %vm141_vm0, %v6098_v23, 0.0 }
  0xe5   :  { %v6109_v30 = vadd.f32 %v6064_v9, %v203_v28  ;;  %270 = vadd.xlane.f32.xlu1 %v269_v29  ;;  %v263_v31 = vsel %vm141_vm0, %v6101_v25, 0.0 }
  0xe6   :  { %264 = vadd.xlane.f32.xlu0 %v263_v31  ;;  %v272_v32 = vsel %vm141_vm0, %v6104_v27, 0.0 }
  0xe7   :  { %v266_v34 = vsel %vm141_vm0, %v6109_v30, 0.0 }
  0xe9   :  { %273 = vadd.xlane.f32.xlu1 %v272_v32  ;;  %v5246_v33 = vpop.f32.mrb[4].mxu0 }
  0xea   :  { %v6118_v35 = vadd.f32 %v5246_v33, %v6064_v9  ;;  %v216_v36 = vpop.f32.mrb[5].mxu0  ;;  %267 = vadd.xlane.f32.xlu0 %v266_v34 }
  0xeb   :  { %v5247_v37 = vpop.f32.mrb[6].mxu0  ;;  %v6126_v41 = vadd.f32 %v6064_v9, %v216_v36 }
  0xec   :  { %v6121_v38 = vadd.f32 %v5247_v37, %v6064_v9  ;;  %v219_v39 = vpop.f32.mrb[7].mxu0  ;;  %v281_v40 = vsel %vm141_vm0, %v6118_v35, 0.0 }
  0xed   :  { %v6129_v42 = vadd.f32 %v6064_v9, %v219_v39  ;;  %v275_v45 = vsel %vm141_vm0, %v6126_v41, 0.0 }
  0xee   :  { %282 = vadd.xlane.f32.xlu0 %v281_v40  ;;  %v284_v43 = vsel %vm141_vm0, %v6121_v38, 0.0 }
  0xef   :  { %285 = vadd.xlane.f32.xlu1 %v284_v43  ;;  %v278_v48 = vsel %vm141_vm0, %v6129_v42, 0.0 }
  0xf1   :  { %v5250_v44 = vpop.f32.mrb[8].mxu0 }
  0xf2   :  { %v6136_v46 = vadd.f32 %v5250_v44, %v6064_v9  ;;  %v232_v47 = vpop.f32.mrb[9].mxu0  ;;  %276 = vadd.xlane.f32.xlu0 %v275_v45 }
  0xf3   :  { %v5251_v49 = vpop.f32.mrb[10].mxu0  ;;  %279 = vadd.xlane.f32.xlu1 %v278_v48  ;;  %v6146_v53 = vadd.f32 %v6064_v9, %v232_v47 }
  0xf4   :  { %v6141_v50 = vadd.f32 %v5251_v49, %v6064_v9  ;;  %v235_v51 = vpop.f32.mrb[11].mxu0  ;;  %v293_v52 = vsel %vm141_vm0, %v6136_v46, 0.0 }
  0xf5   :  { %v6149_v54 = vadd.f32 %v6064_v9, %v235_v51  ;;  %v287_v56 = vsel %vm141_vm0, %v6146_v53, 0.0 }
  0xf6   :  { %294 = vadd.xlane.f32.xlu0 %v293_v52  ;;  %v296_v55 = vsel %vm141_vm0, %v6141_v50, 0.0 }
  0xf7   :  { %297 = vadd.xlane.f32.xlu1 %v296_v55  ;;  %v290_v58 = vsel %vm141_vm0, %v6149_v54, 0.0 }
  0xf9   :  { %v5254_v57 = vpop.f32.mrb[12].mxu0 }
  0xfa   :  { %288 = vadd.xlane.f32.xlu0 %v287_v56  ;;  %v248_v59 = vpop.f32.mrb[13].mxu0  ;;  %v6169_v5 = vadd.f32 %v5254_v57, %v6064_v9 }
  0xfb   :  { %291 = vadd.xlane.f32.xlu1 %v290_v58  ;;  %v5255_v60 = vpop.f32.mrb[14].mxu0  ;;  %v6179_v10 = vadd.f32 %v6064_v9, %v248_v59 }
  0xfc   :  { %v251_v62 = vpop.f32.mrb[15].mxu0  ;;  %v6172_v6 = vadd.f32 %v5255_v60, %v6064_v9  ;;  %v305_v7 = vsel %vm141_vm0, %v6169_v5, 0.0 }
  0xfd   :  { %v6182_v11 = vadd.f32 %v6064_v9, %v251_v62  ;;  %v299_v12 = vsel %vm141_vm0, %v6179_v10, 0.0 }
  0xfe   :  { %v308_v8 = vsel %vm141_vm0, %v6172_v6, 0.0 }
  0xff   :  { %v302_v13 = vsel %vm141_vm0, %v6182_v11, 0.0 }
 0x10c   :  { %502 = vrot.lane.b32.xlu1 %v499_v2, %s5950_s20 }
 0x110   :  { %500 = vrot.lane.b32.xlu0 %v495_v4, %s5950_s20 }
 0x12f   :  { %306 = vadd.xlane.f32.xlu0 %v305_v7 }
 0x130   :  { %309 = vadd.xlane.f32.xlu1 %v308_v8 }
 0x133   :  { %300 = vadd.xlane.f32.xlu0 %v299_v12 }
 0x134   :  { %303 = vadd.xlane.f32.xlu1 %v302_v13  ;;  %v5951_v13 = vmov 0  }
 0x135   :  { %650 = vmatprep.mubr.bf16.mxu1 %v5951_v13  ;;  %1164 = vmatprep.subr.bf16.mxu0 %v5951_v13 }
 0x172   :  { %v271_v15 = vpop.xlane.xlu1 %270 }
 0x173   :  { %v314_v16 = vmul.f32 0.020833334, %v271_v15  ;;  %v265_v17 = vpop.xlane.xlu0 %264 }
 0x174   :  { %v312_v18 = vmul.f32 0.020833334, %v265_v17 }
 0x175   :  { %v6191_v19 = vsub.f32 %v6098_v23, %v314_v16 }
 0x176   :  { %v6194_v9 = vsub.f32 %v6101_v25, %v312_v18  ;;  %v274_v20 = vpop.xlane.xlu1 %273 }
 0x177   :  { %v315_v21 = vmul.f32 0.020833334, %v274_v20  ;;  %v268_v22 = vpop.xlane.xlu0 %267  ;;  %v346_v24 = vmul.f32 %v6191_v19, %v6191_v19 }
 0x178   :  { %v313_v26 = vmul.f32 0.020833334, %v268_v22  ;;  %v344_v31 = vmul.f32 %v6194_v9, %v6194_v9 }
 0x179   :  { %v6199_v28 = vsub.f32 %v6104_v27, %v315_v21  ;;  %v366_v29 = vsel %vm141_vm0, %v346_v24, 0.0 }
 0x17a   :  { %v6205_v23 = vsub.f32 %v6109_v30, %v313_v26  ;;  %367 = vadd.xlane.f32.xlu0 %v366_v29  ;;  %v360_v27 = vsel %vm141_vm0, %v344_v31, 0.0 }
 0x17b   :  { %v283_v25 = vpop.xlane.xlu0 %282  ;;  %v347_v32 = vmul.f32 %v6199_v28, %v6199_v28 }
 0x17c   :  { %v318_v33 = vmul.f32 0.020833334, %v283_v25  ;;  %v286_v34 = vpop.xlane.xlu1 %285  ;;  %v345_v39 = vmul.f32 %v6205_v23, %v6205_v23 }
 0x17d   :  { %v319_v36 = vmul.f32 0.020833334, %v286_v34  ;;  %v369_v37 = vsel %vm141_vm0, %v347_v32, 0.0 }
 0x17e   :  { %v6214_v40 = vsub.f32 %v6118_v35, %v318_v33  ;;  %370 = vadd.xlane.f32.xlu1 %v369_v37  ;;  %361 = vadd.xlane.f32.xlu0 %v360_v27  ;;  %v363_v49 = vsel %vm141_vm0, %v345_v39, 0.0 }
 0x17f   :  { %v6217_v30 = vsub.f32 %v6121_v38, %v319_v36  ;;  %v277_v43 = vpop.xlane.xlu0 %276 }
 0x180   :  { %v316_v44 = vmul.f32 0.020833334, %v277_v43  ;;  %v280_v45 = vpop.xlane.xlu1 %279  ;;  %v350_v47 = vmul.f32 %v6214_v40, %v6214_v40 }
 0x181   :  { %v317_v48 = vmul.f32 0.020833334, %v280_v45  ;;  %v351_v51 = vmul.f32 %v6217_v30, %v6217_v30 }
 0x182   :  { %v6225_v35 = vsub.f32 %v6126_v41, %v316_v44  ;;  %364 = vadd.xlane.f32.xlu1 %v363_v49  ;;  %v378_v52 = vsel %vm141_vm0, %v350_v47, 0.0 }
 0x183   :  { %v6229_v38 = vsub.f32 %v6129_v42, %v317_v48  ;;  %v295_v55 = vpop.xlane.xlu0 %294  ;;  %379 = vadd.xlane.f32.xlu0 %v378_v52  ;;  %v381_v58 = vsel %vm141_vm0, %v351_v51, 0.0  ;;  %v45_v51 = vld [vmem:[%s7643_s6 + $0x1] sm:$0x3] }
 0x184   :  { %v298_v56 = vpop.xlane.xlu1 %297  ;;  %v348_v57 = vmul.f32 %v6225_v35, %v6225_v35  ;;  %v322_v15 = vmul.f32 0.020833334, %v295_v55  ;;  %v535_v52 = vrot.slane %v45_v51, %v6163_v3  ;;  %v539_v55 = vrot.slane %v45_v51, %v6157_v0 }
 0x185   :  { %v349_v59 = vmul.f32 %v6229_v38, %v6229_v38  ;;  %v323_v16 = vmul.f32 0.020833334, %v298_v56  ;;  %v5692_v56 = vld [vmem:[%s7641_s4 + $0x8] sm:$0xff]  }
 0x186   :  { %382 = vadd.xlane.f32.xlu1 %v381_v58  ;;  %v372_v41 = vsel %vm141_vm0, %v348_v57, 0.0  ;;  %v6265_v20 = vsub.f32 %v6136_v46, %v322_v15  ;;  %v5693_v57 = vld [vmem:[%s7641_s4 + $0x10] sm:$0xff]  }
 0x187   :  { %v289_v60 = vpop.xlane.xlu0 %288  ;;  %373 = vadd.xlane.f32.xlu0 %v372_v41  ;;  %v375_v63 = vsel %vm141_vm0, %v349_v59, 0.0  ;;  %v6268_v21 = vsub.f32 %v6141_v50, %v323_v16 }
 0x188   :  { %v320_v61 = vmul.f32 0.020833334, %v289_v60  ;;  %v292_v62 = vpop.xlane.xlu1 %291  ;;  %v354_v31 = vmul.f32 %v6265_v20, %v6265_v20 }
 0x189   :  { %v321_v42 = vmul.f32 0.020833334, %v292_v62  ;;  %v355_v32 = vmul.f32 %v6268_v21, %v6268_v21 }
 0x18a   :  { %v6239_v1 = vsub.f32 %v6146_v53, %v320_v61  ;;  %376 = vadd.xlane.f32.xlu1 %v375_v63  ;;  %v5688_v53 = vld [vmem:[%s7640_s3 + $0x20] ss:$8 sps:$4 sm:$0xff]   ;;  %v390_v50 = vsel %vm141_vm0, %v354_v31, 0.0 }
 0x18b   :  { %v6242_v2 = vsub.f32 %v6149_v54, %v321_v42  ;;  %v5690_v54 = vld [vmem:[%s7640_s3 + $0x24] ss:$8 sps:$4 sm:$0xff]   ;;  %v6260_v17 = vpop.permute.xlu0 %500  ;;  %v393_v39 = vsel %vm141_vm0, %v355_v32, 0.0 }
 0x18c   :  { %v352_v4 = vmul.f32 %v6239_v1, %v6239_v1  ;;  %v6262_v18 = vpop.permute.xlu1 %502 }
 0x18d   :  { %v353_v7 = vmul.f32 %v6242_v2, %v6242_v2 }
 0x18e   :  { %v384_v8 = vsel %vm141_vm0, %v352_v4, 0.0 }
 0x18f   :  { %385 = vadd.xlane.f32.xlu1 %v384_v8  ;;  %v387_v12 = vsel %vm141_vm0, %v353_v7, 0.0 }
 0x190   :  { %388 = vadd.xlane.f32.xlu0 %v387_v12 }
 0x1a0   :  { %572 = vrot.lane.b32.xlu1 %v5688_v53, %s5949_s17 }
 0x1a6   :  { %574 = vrot.lane.b32.xlu0 %v5690_v54, %s5949_s17 }
 0x1bc   :  { %v307_v22 = vpop.xlane.xlu0 %306 }
 0x1bd   :  { %v326_v24 = vmul.f32 0.020833334, %v307_v22  ;;  %v310_v26 = vpop.xlane.xlu1 %309 }
 0x1bf   :  { %v6271_v29 = vsub.f32 %v6169_v5, %v326_v24  ;;  %v327_v5 = vmul.f32 0.020833334, %v310_v26 }
 0x1c0   :  { %v301_v25 = vpop.xlane.xlu0 %300 }
 0x1c1   :  { %v324_v33 = vmul.f32 0.020833334, %v301_v25  ;;  %v304_v34 = vpop.xlane.xlu1 %303  ;;  %v358_v37 = vmul.f32 %v6271_v29, %v6271_v29  ;;  %v6292_v45 = vsub.f32 %v6172_v6, %v327_v5  ;;  %v5691_v6 = vld [vmem:[%s7641_s4] sm:$0xff]  }
 0x1c2   :  { %v325_v46 = vmul.f32 0.020833334, %v304_v34  ;;  %1165 = vmatpush1.bf16.msra.mxu0 %v5691_v6 }
 0x1c3   :  { %v6278_v36 = vsub.f32 %v6179_v10, %v324_v33  ;;  %v402_v44 = vsel %vm141_vm0, %v358_v37, 0.0  ;;  %v359_v48 = vmul.f32 %v6292_v45, %v6292_v45  ;;  %1166 = vmatprep.subr.bf16.mxu0 %v5951_v13 }
 0x1c4   :  { %v6284_v27 = vsub.f32 %v6182_v11, %v325_v46  ;;  %391 = vadd.xlane.f32.xlu1 %v390_v50 }
 0x1c5   :  { %394 = vadd.xlane.f32.xlu0 %v393_v39  ;;  %v356_v43 = vmul.f32 %v6278_v36, %v6278_v36  ;;  %v405_v49 = vsel %vm141_vm0, %v359_v48, 0.0 }
 0x1c6   :  { %v357_v47 = vmul.f32 %v6284_v27, %v6284_v27  ;;  %1167 = vmatpush1.bf16.msra.mxu0 %v5692_v56 }
 0x1c7   :  { %v396_v10 = vsel %vm141_vm0, %v356_v43, 0.0  ;;  %1168 = vmatprep.subr.bf16.mxu0 %v5951_v13 }
 0x1c8   :  { %403 = vadd.xlane.f32.xlu1 %v402_v44  ;;  %v399_v11 = vsel %vm141_vm0, %v357_v47, 0.0 }
 0x1c9   :  { %397 = vadd.xlane.f32.xlu0 %v396_v10 }
 0x1ca   :  { %1169 = vmatpush1.bf16.msra.mxu0 %v5693_v57 }
 0x1cb   :  { %1170 = vmatprep.subr.bf16.mxu0 %v5951_v13 }
 0x1cd   :  { %400 = vadd.xlane.f32.xlu0 %v399_v11 }
 0x1d1   :  { %406 = vadd.xlane.f32.xlu0 %v405_v49 }
 0x1d9   :  { %586 = vrot.lane.b32.xlu1 %v535_v52, %s5952_s30 }
 0x1e7   :  { %588 = vrot.lane.b32.xlu0 %v539_v55, %s5952_s30 }
 0x207   :  { %v368_v58 = vpop.xlane.xlu0 %367 }
 0x208   :  { %v410_v62 = vmul.f32 0.020833334, %v368_v58 }
 0x20a   :  { %v426_v12 = vadd.f32 1e-06, %v410_v62 }
 0x20b   :  { %v371_v59 = vpop.xlane.xlu1 %370  ;;  %v362_v41 = vpop.xlane.xlu0 %361 }
 0x20c   :  { %v411_v60 = vmul.f32 0.020833334, %v371_v59  ;;  %v408_v61 = vmul.f32 0.020833334, %v362_v41 }
 0x20e   :  { %v424_v42 = vadd.f32 1e-06, %v408_v61  ;;  %v427_v63 = vadd.f32 1e-06, %v411_v60 }
 0x20f   :  { %v365_v4 = vpop.xlane.xlu1 %364 }
 0x210   :  { %v409_v7 = vmul.f32 0.020833334, %v365_v4  ;;  %v380_v8 = vpop.xlane.xlu0 %379  ;;  %5757 = vrsqrt.f32 %v424_v42 }
 0x211   :  { %5759 = vrsqrt.f32 %v427_v63  ;;  %v414_v5 = vmul.f32 0.020833334, %v380_v8 }
 0x212   :  { %v425_v53 = vadd.f32 1e-06, %v409_v7 }
 0x213   :  { %v383_v54 = vpop.xlane.xlu1 %382  ;;  %v430_v51 = vadd.f32 1e-06, %v414_v5 }
 0x214   :  { %5761 = vrsqrt.f32 %v425_v53  ;;  %v374_v15 = vpop.xlane.xlu0 %373  ;;  %v415_v32 = vmul.f32 0.020833334, %v383_v54 }
 0x215   :  { %5763 = vrsqrt.f32 %v426_v12  ;;  %v412_v16 = vmul.f32 0.020833334, %v374_v15 }
 0x216   :  { %v431_v10 = vadd.f32 1e-06, %v415_v32 }
 0x217   :  { %v377_v22 = vpop.xlane.xlu1 %376  ;;  %v428_v26 = vadd.f32 1e-06, %v412_v16 }
 0x218   :  { %v413_v24 = vmul.f32 0.020833334, %v377_v22 }
 0x21a   :  { %v429_v31 = vadd.f32 1e-06, %v413_v24  ;;  %v5758_v25 = vpop.eup %5757 }
 0x21b   :  { %v456_v34 = vmul.f32 %v5758_v25, %v6194_v9  ;;  %v5760_v46 = vpop.eup %5759  ;;  %v6327_v9 = vsel %vm504_vm2, %v6260_v17, %v6262_v18 }
 0x21c   :  { %5765 = vrsqrt.f32 %v429_v31  ;;  %v386_v33 = vpop.xlane.xlu1 %385  ;;  %v459_v49 = vmul.f32 %v5760_v46, %v6199_v28 }
 0x21d   :  { %v389_v50 = vpop.xlane.xlu0 %388  ;;  %5767 = vrsqrt.f32 %v428_v26  ;;  %v475_v43 = vmul.f32 %v6188_v14, %v456_v34 }
 0x21e   :  { %v5762_v37 = vpop.eup %5761  ;;  %5769 = vrsqrt.f32 %v431_v10  ;;  %v417_v28 = vmul.f32 0.020833334, %v389_v50  ;;  %v478_v18 = vmul.f32 %v6188_v14, %v459_v49 }
 0x21f   :  { %v457_v39 = vmul.f32 %v5762_v37, %v6205_v23  ;;  %v5764_v44 = vpop.eup %5763  ;;  %v416_v23 = vmul.f32 0.020833334, %v386_v33  ;;  %v6331_v52 = vadd.f32 %v6327_v9, %v475_v43  ;;  %5771 = vrsqrt.f32 %v430_v51 }
 0x220   :  { %v573_v47 = vpop.permute.xlu1 %572  ;;  %v458_v56 = vmul.f32 %v5764_v44, %v6191_v19  ;;  %v433_v60 = vadd.f32 1e-06, %v417_v28  ;;  %v6344_v19 = vadd.f32 %v6327_v9, %v478_v18 }
 0x221   :  { %v575_v11 = vpop.permute.xlu0 %574  ;;  %v476_v48 = vmul.f32 %v6188_v14, %v457_v39  ;;  %v432_v58 = vadd.f32 1e-06, %v416_v23 }
 0x222   :  { %622 = vmatprep.subr.bf16.mxu1 %v575_v11  ;;  %v579_v6 = vsel %vm576_vm1, %v573_v47, %v575_v11  ;;  %v477_v59 = vmul.f32 %v6188_v14, %v458_v56 }
 0x223   :  { %623 = vmatpush1.bf16.msra.mxu1 %v579_v6  ;;  %v6334_v55 = vadd.f32 %v6327_v9, %v476_v48  ;;  %5773 = vrsqrt.f32 %v432_v58 }
 0x224   :  { %v6348_v62 = vadd.f32 %v6327_v9, %v477_v59  ;;  %5775 = vrsqrt.f32 %v433_v60 }
 0x225   :  { %v523_v17 = vpack.c.bf16 %v6334_v55, %v6331_v52 }
 0x226   :  { %v5766_v57 = vpop.eup %5765  ;;  %v524_v63 = vpack.c.bf16 %v6344_v19, %v6348_v62 }
 0x227   :  { %4893 = vmatmul.mubr.msk.bf16.vlgmr.msra.gmra.mrb[0].mxu1 %vm141_vm0, %v523_v17  ;;  %v5768_v41 = vpop.eup %5767  ;;  %v461_v61 = vmul.f32 %v5766_v57, %v6229_v38 }
 0x228   :  { %660 = vmatprep.mubr.bf16.mxu1 %v5951_v13  ;;  %v460_v42 = vmul.f32 %v5768_v41, %v6225_v35  ;;  %v5770_v7 = vpop.eup %5769 }
 0x229   :  { %v480_v4 = vmul.f32 %v6188_v14, %v461_v61  ;;  %v5772_v12 = vpop.eup %5771  ;;  %v463_v53 = vmul.f32 %v5770_v7, %v6217_v30 }
 0x22a   :  { %v479_v8 = vmul.f32 %v6188_v14, %v460_v42  ;;  %v462_v54 = vmul.f32 %v5772_v12, %v6214_v40 }
 0x22b   :  { %v6358_v38 = vadd.f32 %v6327_v9, %v480_v4  ;;  %v482_v22 = vmul.f32 %v6188_v14, %v463_v53 }
 0x22c   :  { %v6362_v35 = vadd.f32 %v6327_v9, %v479_v8  ;;  %v481_v26 = vmul.f32 %v6188_v14, %v462_v54 }
 0x22d   :  { %v5774_v15 = vpop.eup %5773  ;;  %v6372_v30 = vadd.f32 %v6327_v9, %v482_v22 }
 0x22e   :  { %v525_v16 = vpack.c.bf16 %v6358_v38, %v6362_v35  ;;  %v5776_v24 = vpop.eup %5775  ;;  %v464_v31 = vmul.f32 %v5774_v15, %v6239_v1  ;;  %v6377_v25 = vadd.f32 %v6327_v9, %v481_v26 }
 0x22f   :  { %4894 = vmatmul.mubr.msk.bf16.gmra.mrb[4].mxu1 %vm141_vm0, %v524_v63  ;;  %v465_v40 = vmul.f32 %v5776_v24, %v6242_v2 }
 0x230   :  { %670 = vmatprep.mubr.bf16.mxu1 %v5951_v13  ;;  %v526_v32 = vpack.c.bf16 %v6372_v30, %v6377_v25  ;;  %v483_v33 = vmul.f32 %v6188_v14, %v464_v31 }
 0x231   :  { %v484_v34 = vmul.f32 %v6188_v14, %v465_v40 }
 0x232   :  { %v6386_v46 = vadd.f32 %v6327_v9, %v483_v33  ;;  %v5697_v33 = vld [vmem:[%s7641_s4 + $0x30] sm:$0xff]  }
 0x233   :  { %v6389_v1 = vadd.f32 %v6327_v9, %v484_v34  ;;  %v5698_v34 = vld [vmem:[%s7641_s4 + $0x38] sm:$0xff]  }
 0x235   :  { %v527_v2 = vpack.c.bf16 %v6389_v1, %v6386_v46 }
 0x237   :  { %4895 = vmatmul.mubr.msk.bf16.gmra.mrb[8].mxu1 %vm141_vm0, %v525_v16 }
 0x238   :  { %680 = vmatprep.mubr.bf16.mxu1 %v5951_v13 }
 0x23f   :  { %4896 = vmatmul.mubr.msk.bf16.gmra.mrb[12].mxu1 %vm141_vm0, %v526_v32 }
 0x240   :  { %690 = vmatprep.mubr.bf16.mxu1 %v5951_v13 }
 0x247   :  { %4897 = vmatmul.mubr.msk.bf16.gmra.mrb[16].mxu1 %vm141_vm0, %v527_v2  ;;  %v5699_v2 = vld [vmem:[%s7641_s4 + $0x40] sm:$0xff]  }
 0x248   :  { %700 = vmatprep.mubr.bf16.mxu1 %v5951_v13 }
 0x251   :  { %v392_v50 = vpop.xlane.xlu1 %391 }
 0x252   :  { %v418_v37 = vmul.f32 0.020833334, %v392_v50  ;;  %v395_v5 = vpop.xlane.xlu0 %394  ;;  %v5700_v50 = vld [vmem:[%s7641_s4 + $0x48] sm:$0xff]  }
 0x253   :  { %v419_v39 = vmul.f32 0.020833334, %v395_v5  ;;  %v5702_v5 = vld [vmem:[%s7641_s4 + $0x58] sm:$0xff]  }
 0x254   :  { %v434_v43 = vadd.f32 1e-06, %v418_v37  ;;  %v5701_v37 = vld [vmem:[%s7641_s4 + $0x50] sm:$0xff]  }
 0x255   :  { %v435_v44 = vadd.f32 1e-06, %v419_v39  ;;  %v404_v10 = vpop.xlane.xlu1 %403  ;;  %v4901_v39 = vld [vmem:[%s7643_s6 + $0x2] ss:$0 sm:$0xff] }
 0x256   :  { %5777 = vrsqrt.f32 %v434_v43  ;;  %v398_v47 = vpop.xlane.xlu0 %397  ;;  %v422_v48 = vmul.f32 0.020833334, %v404_v10  ;;  %1136 = vrot.lane.b32.xlu1 %v4901_v39, %s5953_s0 }
 0x257   :  { %5779 = vrsqrt.f32 %v435_v44  ;;  %v420_v11 = vmul.f32 0.020833334, %v398_v47 }
 0x258   :  { %v438_v23 = vadd.f32 1e-06, %v422_v48 }
 0x259   :  { %v436_v49 = vadd.f32 1e-06, %v420_v11  ;;  %v587_v43 = vpop.permute.xlu1 %586 }
 0x25a   :  { %v401_v51 = vpop.xlane.xlu0 %400 }
 0x25b   :  { %5781 = vrsqrt.f32 %v436_v49  ;;  %v421_v6 = vmul.f32 0.020833334, %v401_v51 }
 0x25d   :  { %v437_v56 = vadd.f32 1e-06, %v421_v6 }
 0x25e   :  { %v407_v28 = vpop.xlane.xlu0 %406 }
 0x25f   :  { %5783 = vrsqrt.f32 %v437_v56  ;;  %v423_v17 = vmul.f32 0.020833334, %v407_v28 }
 0x260   :  { %v5778_v18 = vpop.eup %5777  ;;  %5785 = vrsqrt.f32 %v438_v23 }
 0x261   :  { %v5780_v57 = vpop.eup %5779  ;;  %v439_v58 = vadd.f32 1e-06, %v423_v17  ;;  %v466_v59 = vmul.f32 %v5778_v18, %v6265_v20 }
 0x262   :  { %v467_v41 = vmul.f32 %v5780_v57, %v6268_v21  ;;  %v6474_v44 = vpop.permute.xlu0 %588 }
 0x263   :  { %5787 = vrsqrt.f32 %v439_v58  ;;  %v485_v60 = vmul.f32 %v6188_v14, %v466_v59  ;;  %v6477_v10 = vsel %vm590_vm3, %v587_v43, %v6474_v44 }
 0x264   :  { %v486_v61 = vmul.f32 %v6188_v14, %v467_v41 }
 0x265   :  { %v5782_v42 = vpop.eup %5781  ;;  %v6400_v63 = vadd.f32 %v6327_v9, %v485_v60 }
 0x266   :  { %v6403_v4 = vadd.f32 %v6327_v9, %v486_v61  ;;  %v468_v7 = vmul.f32 %v5782_v42, %v6278_v36 }
 0x268   :  { %v528_v8 = vpack.c.bf16 %v6403_v4, %v6400_v63  ;;  %v487_v12 = vmul.f32 %v6188_v14, %v468_v7 }
 0x269   :  { %v5784_v20 = vpop.eup %5783 }
 0x26a   :  { %4898 = vmatmul.mubr.msk.bf16.gmra.mrb[20].mxu1 %vm141_vm0, %v528_v8  ;;  %v469_v21 = vmul.f32 %v5784_v20, %v6284_v27  ;;  %v5786_v53 = vpop.eup %5785  ;;  %v6414_v16 = vadd.f32 %v6327_v9, %v487_v12 }
 0x26b   :  { %710 = vmatprep.mubr.bf16.mxu1 %v5951_v13  ;;  %v470_v22 = vmul.f32 %v5786_v53, %v6271_v29 }
 0x26c   :  { %v488_v54 = vmul.f32 %v6188_v14, %v469_v21 }
 0x26d   :  { %v5788_v15 = vpop.eup %5787  ;;  %v489_v31 = vmul.f32 %v6188_v14, %v470_v22 }
 0x26e   :  { %v6417_v36 = vadd.f32 %v6327_v9, %v488_v54  ;;  %v471_v24 = vmul.f32 %v5788_v15, %v6292_v45  ;;  %v5694_v45 = vld [vmem:[%s7641_s4 + $0x18] sm:$0xff]  }
 0x26f   :  { %v6431_v32 = vadd.f32 %v6327_v9, %v489_v31  ;;  %1171 = vmatpush1.bf16.msra.mxu0 %v5694_v45 }
 0x270   :  { %v529_v27 = vpack.c.bf16 %v6417_v36, %v6414_v16  ;;  %v490_v26 = vmul.f32 %v6188_v14, %v471_v24  ;;  %1172 = vmatprep.subr.bf16.mxu0 %v5951_v13  ;;  %v5695_v14 = vld [vmem:[%s7641_s4 + $0x20] sm:$0xff]  }
 0x272   :  { %4899 = vmatmul.mubr.msk.bf16.gmra.mrb[24].mxu1 %vm141_vm0, %v529_v27  ;;  %v6428_v40 = vadd.f32 %v6327_v9, %v490_v26  ;;  %v5696_v9 = vld [vmem:[%s7641_s4 + $0x28] sm:$0xff]  }
 0x273   :  { %720 = vmatprep.mubr.bf16.mxu1 %v5951_v13  ;;  %1173 = vmatpush1.bf16.msra.mxu0 %v5695_v14 }
 0x274   :  { %v530_v29 = vpack.c.bf16 %v6428_v40, %v6431_v32  ;;  %1174 = vmatprep.subr.bf16.mxu0 %v5951_v13 }
 0x277   :  { %1175 = vmatpush1.bf16.msra.mxu0 %v5696_v9 }
 0x278   :  { %1176 = vmatprep.subr.bf16.mxu0 %v5951_v13 }
 0x27a   :  { %4900 = vmatmul.mubr.msk.bf16.gmra.mrb[28].mxu1 %vm141_vm0, %v530_v29 }
 0x27b   :  { %1177 = vmatpush1.bf16.msra.mxu0 %v5697_v33 }
 0x27c   :  { %1178 = vmatprep.subr.bf16.mxu0 %v5951_v13 }
 0x27f   :  { %1179 = vmatpush1.bf16.msra.mxu0 %v5698_v34 }
 0x280   :  { %1180 = vmatprep.subr.bf16.mxu0 %v5951_v13 }
 0x283   :  { %1181 = vmatpush1.bf16.msra.mxu0 %v5699_v2 }
 0x284   :  { %1182 = vmatprep.subr.bf16.mxu0 %v5951_v13 }
 0x287   :  { %1183 = vmatpush1.bf16.msra.mxu0 %v5700_v50 }
 0x288   :  { %1184 = vmatprep.subr.bf16.mxu0 %v5951_v13 }
 0x28b   :  { %1185 = vmatpush1.bf16.msra.mxu0 %v5701_v37 }
 0x28c   :  { %1186 = vmatprep.subr.bf16.mxu0 %v5951_v13 }
 0x28f   :  { %1187 = vmatpush1.bf16.msra.mxu0 %v5702_v5 }
 0x2fa   :  { %v652_v47 = vpop.f32.mrb[0].mxu1 }
 0x2fb   :  { %v6480_v11 = vadd.f32 %v652_v47, %v6477_v10  ;;  %v654_v48 = vpop.f32.mrb[1].mxu1 }
 0x2fc   :  { %v6483_v49 = vadd.f32 %v654_v48, %v6474_v44  ;;  %v656_v51 = vpop.f32.mrb[2].mxu1 }
 0x2fd   :  { %v731_v6 = vmul.f32 %v6480_v11, %v6480_v11  ;;  %v6488_v23 = vadd.f32 %v656_v51, %v6477_v10  ;;  %v658_v56 = vpop.f32.mrb[3].mxu1 }
 0x2fe   :  { %v732_v28 = vmul.f32 %v6483_v49, %v6483_v49  ;;  %v6493_v17 = vadd.f32 %v658_v56, %v6474_v44 }
 0x2ff   :  { %v763_v18 = vmul.f32 %v731_v6, %v6480_v11  ;;  %v733_v57 = vmul.f32 %v6488_v23, %v6488_v23 }
 0x300   :  { %v764_v58 = vmul.f32 %v732_v28, %v6483_v49  ;;  %v734_v59 = vmul.f32 %v6493_v17, %v6493_v17 }
 0x301   :  { %v795_v41 = vmul.f32 0.044715, %v763_v18  ;;  %v765_v60 = vmul.f32 %v733_v57, %v6488_v23 }
 0x302   :  { %v796_v61 = vmul.f32 0.044715, %v764_v58  ;;  %v766_v42 = vmul.f32 %v734_v59, %v6493_v17  ;;  %v662_v7 = vpop.f32.mrb[4].mxu1 }
 0x303   :  { %v827_v8 = vadd.f32 %v795_v41, %v6480_v11  ;;  %v797_v20 = vmul.f32 0.044715, %v765_v60  ;;  %v6505_v21 = vadd.f32 %v662_v7, %v6477_v10  ;;  %v664_v12 = vpop.f32.mrb[5].mxu1 }
 0x304   :  { %v828_v53 = vadd.f32 %v796_v61, %v6483_v49  ;;  %v798_v54 = vmul.f32 0.044715, %v766_v42  ;;  %v6509_v15 = vadd.f32 %v664_v12, %v6474_v44  ;;  %v666_v22 = vpop.f32.mrb[6].mxu1 }
 0x305   :  { %v859_v24 = vmul.f32 0.7978846, %v827_v8  ;;  %v829_v27 = vadd.f32 %v797_v20, %v6488_v23  ;;  %v735_v26 = vmul.f32 %v6505_v21, %v6505_v21  ;;  %v6515_v31 = vadd.f32 %v666_v22, %v6477_v10  ;;  %v668_v29 = vpop.f32.mrb[7].mxu1 }
 0x306   :  { %v860_v45 = vmul.f32 0.7978846, %v828_v53  ;;  %v830_v14 = vadd.f32 %v798_v54, %v6493_v17  ;;  %v736_v9 = vmul.f32 %v6509_v15, %v6509_v15  ;;  %v6521_v33 = vadd.f32 %v668_v29, %v6474_v44 }
 0x307   :  { %5789 = vtanh.f32 %v859_v24  ;;  %v861_v34 = vmul.f32 0.7978846, %v829_v27  ;;  %v767_v2 = vmul.f32 %v735_v26, %v6505_v21  ;;  %v737_v50 = vmul.f32 %v6515_v31, %v6515_v31 }
 0x308   :  { %5791 = vtanh.f32 %v860_v45  ;;  %v862_v37 = vmul.f32 0.7978846, %v830_v14  ;;  %v768_v5 = vmul.f32 %v736_v9, %v6509_v15  ;;  %v738_v39 = vmul.f32 %v6521_v33, %v6521_v33 }
 0x309   :  { %5793 = vtanh.f32 %v861_v34  ;;  %v799_v43 = vmul.f32 0.044715, %v767_v2  ;;  %v769_v47 = vmul.f32 %v737_v50, %v6515_v31 }
 0x30a   :  { %5795 = vtanh.f32 %v862_v37  ;;  %v800_v48 = vmul.f32 0.044715, %v768_v5  ;;  %v770_v51 = vmul.f32 %v738_v39, %v6521_v33  ;;  %v672_v6 = vpop.f32.mrb[8].mxu1 }
 0x30b   :  { %v831_v56 = vadd.f32 %v799_v43, %v6505_v21  ;;  %v801_v28 = vmul.f32 0.044715, %v769_v47  ;;  %v6533_v18 = vadd.f32 %v672_v6, %v6477_v10  ;;  %v674_v57 = vpop.f32.mrb[9].mxu1 }
 0x30c   :  { %v832_v58 = vadd.f32 %v800_v48, %v6509_v15  ;;  %v802_v59 = vmul.f32 0.044715, %v770_v51  ;;  %v6537_v41 = vadd.f32 %v674_v57, %v6474_v44  ;;  %v676_v60 = vpop.f32.mrb[10].mxu1 }
 0x30d   :  { %v863_v61 = vmul.f32 0.7978846, %v831_v56  ;;  %v833_v42 = vadd.f32 %v801_v28, %v6515_v31  ;;  %v739_v7 = vmul.f32 %v6533_v18, %v6533_v18  ;;  %v6543_v8 = vadd.f32 %v676_v60, %v6477_v10  ;;  %v678_v20 = vpop.f32.mrb[11].mxu1 }
 0x30e   :  { %v864_v12 = vmul.f32 0.7978846, %v832_v58  ;;  %v834_v53 = vadd.f32 %v802_v59, %v6521_v33  ;;  %v740_v54 = vmul.f32 %v6537_v41, %v6537_v41  ;;  %v6549_v22 = vadd.f32 %v678_v20, %v6474_v44 }
 0x30f   :  { %5797 = vtanh.f32 %v863_v61  ;;  %v865_v24 = vmul.f32 0.7978846, %v833_v42  ;;  %v771_v27 = vmul.f32 %v739_v7, %v6533_v18  ;;  %v741_v26 = vmul.f32 %v6543_v8, %v6543_v8 }
 0x310   :  { %5799 = vtanh.f32 %v864_v12  ;;  %v866_v29 = vmul.f32 0.7978846, %v834_v53  ;;  %v772_v45 = vmul.f32 %v740_v54, %v6537_v41  ;;  %v742_v14 = vmul.f32 %v6549_v22, %v6549_v22 }
 0x311   :  { %v5790_v9 = vpop.eup %5789  ;;  %5801 = vtanh.f32 %v865_v24  ;;  %v803_v34 = vmul.f32 0.044715, %v771_v27  ;;  %v773_v2 = vmul.f32 %v741_v26, %v6543_v8 }
 0x312   :  { %v5792_v50 = vpop.eup %5791  ;;  %v923_v37 = vadd.f32 1.0, %v5790_v9  ;;  %5803 = vtanh.f32 %v866_v29  ;;  %v804_v5 = vmul.f32 0.044715, %v772_v45  ;;  %v774_v39 = vmul.f32 %v742_v14, %v6549_v22  ;;  %v682_v43 = vpop.f32.mrb[12].mxu1 }
 0x313   :  { %v5794_v47 = vpop.eup %5793  ;;  %v924_v48 = vadd.f32 1.0, %v5792_v50  ;;  %v835_v51 = vadd.f32 %v803_v34, %v6533_v18  ;;  %v805_v6 = vmul.f32 0.044715, %v773_v2  ;;  %v6561_v56 = vadd.f32 %v682_v43, %v6477_v10  ;;  %v684_v28 = vpop.f32.mrb[13].mxu1 }
 0x314   :  { %v5796_v57 = vpop.eup %5795  ;;  %v955_v58 = vmul.f32 0.5, %v923_v37  ;;  %v925_v59 = vadd.f32 1.0, %v5794_v47  ;;  %v836_v60 = vadd.f32 %v804_v5, %v6537_v41  ;;  %v806_v61 = vmul.f32 0.044715, %v774_v39  ;;  %v686_v42 = vpop.f32.mrb[14].mxu1 }
 0x315   :  { %v956_v7 = vmul.f32 0.5, %v924_v48  ;;  %v926_v20 = vadd.f32 1.0, %v5796_v57  ;;  %v867_v12 = vmul.f32 0.7978846, %v835_v51  ;;  %v837_v53 = vadd.f32 %v805_v6, %v6543_v8  ;;  %v688_v54 = vpop.f32.mrb[15].mxu1 }
 0x316   :  { %v987_v24 = vmul.f32 %v955_v58, %v6480_v11  ;;  %v957_v27 = vmul.f32 0.5, %v925_v59  ;;  %v868_v26 = vmul.f32 0.7978846, %v836_v60  ;;  %v838_v29 = vadd.f32 %v806_v61, %v6549_v22 }
 0x317   :  { %v988_v45 = vmul.f32 %v956_v7, %v6483_v49  ;;  %v958_v14 = vmul.f32 0.5, %v926_v20  ;;  %5805 = vtanh.f32 %v867_v12  ;;  %v869_v9 = vmul.f32 0.7978846, %v837_v53 }
 0x318   :  { %v989_v34 = vmul.f32 %v957_v27, %v6488_v23  ;;  %5807 = vtanh.f32 %v868_v26  ;;  %v870_v2 = vmul.f32 0.7978846, %v838_v29  ;;  %v743_v50 = vmul.f32 %v6561_v56, %v6561_v56 }
 0x319   :  { %v6571_v37 = vpop.eup %5797  ;;  %v990_v11 = vmul.f32 %v958_v14, %v6493_v17  ;;  %5809 = vtanh.f32 %v869_v9  ;;  %v6575_v5 = vadd.f32 %v684_v28, %v6474_v44  ;;  %v6578_v49 = vadd.f32 %v686_v42, %v6477_v10 }
 0x31a   :  { %v5800_v39 = vpop.eup %5799  ;;  %v1019_v43 = vpack.c.bf16 %v989_v34, %v987_v24  ;;  %5811 = vtanh.f32 %v870_v2  ;;  %v775_v23 = vmul.f32 %v743_v50, %v6561_v56  ;;  %v6582_v47 = vadd.f32 %v688_v54, %v6474_v44  ;;  %v692_v48 = vpop.f32.mrb[16].mxu1 }
 0x31b   :  { %v6584_v51 = vpop.eup %5801  ;;  %v928_v6 = vadd.f32 1.0, %v5800_v39  ;;  %v744_v17 = vmul.f32 %v6575_v5, %v6575_v5  ;;  %v745_v28 = vmul.f32 %v6578_v49, %v6578_v49  ;;  %v6591_v57 = vadd.f32 %v692_v48, %v6477_v10  ;;  %v694_v58 = vpop.f32.mrb[17].mxu1 }
 0x31c   :  { %v5804_v59 = vpop.eup %5803  ;;  %v807_v60 = vmul.f32 0.044715, %v775_v23  ;;  %v746_v61 = vmul.f32 %v6582_v47, %v6582_v47  ;;  %v6596_v42 = vadd.f32 %v694_v58, %v6474_v44  ;;  %v696_v7 = vpop.f32.mrb[18].mxu1  ;;  %v1020_v20 = vpack.c.bf16 %v990_v11, %v988_v45 }
 0x31d   :  { %v960_v12 = vmul.f32 0.5, %v928_v6  ;;  %v930_v53 = vadd.f32 1.0, %v5804_v59  ;;  %v776_v54 = vmul.f32 %v744_v17, %v6575_v5  ;;  %v777_v24 = vmul.f32 %v745_v28, %v6578_v49  ;;  %v698_v27 = vpop.f32.mrb[19].mxu1 }
 0x31e   :  { %v839_v26 = vadd.f32 %v807_v60, %v6561_v56  ;;  %v778_v29 = vmul.f32 %v746_v61, %v6582_v47  ;;  %v747_v14 = vmul.f32 %v6591_v57, %v6591_v57  ;;  %v748_v9 = vmul.f32 %v6596_v42, %v6596_v42  ;;  %4914 = vmatprep.mubr.msk.bf16.mxu0 %vm1139_vm4, %v1020_v20 }
 0x31f   :  { %v992_v45 = vmul.f32 %v960_v12, %v6509_v15  ;;  %v962_v34 = vmul.f32 0.5, %v930_v53  ;;  %v808_v2 = vmul.f32 0.044715, %v776_v54  ;;  %v809_v50 = vmul.f32 0.044715, %v777_v24  ;;  %1197 = vmatmul.mubr.bf16.vlgmr.msra.gmra.mrb[16].mxu0 %v1019_v43 }
 0x320   :  { %v871_v11 = vmul.f32 0.7978846, %v839_v26  ;;  %v810_v39 = vmul.f32 0.044715, %v778_v29  ;;  %v779_v23 = vmul.f32 %v747_v14, %v6591_v57  ;;  %v780_v48 = vmul.f32 %v748_v9, %v6596_v42 }
 0x321   :  { %v5806_v6 = vpop.eup %5805  ;;  %v994_v17 = vmul.f32 %v962_v34, %v6521_v33  ;;  %v840_v28 = vadd.f32 %v808_v2, %v6575_v5  ;;  %v841_v58 = vadd.f32 %v809_v50, %v6578_v49  ;;  %v6614_v59 = vadd.f32 %v696_v7, %v6477_v10 }
 0x322   :  { %v5808_v15 = vpop.eup %5807  ;;  %5813 = vtanh.f32 %v871_v11  ;;  %v842_v43 = vadd.f32 %v810_v39, %v6582_v47  ;;  %v811_v60 = vmul.f32 0.044715, %v779_v23  ;;  %v812_v61 = vmul.f32 0.044715, %v780_v48 }
 0x323   :  { %v5810_v20 = vpop.eup %5809  ;;  %v932_v12 = vadd.f32 1.0, %v5808_v15  ;;  %v872_v53 = vmul.f32 0.7978846, %v840_v28  ;;  %v873_v54 = vmul.f32 0.7978846, %v841_v58  ;;  %v749_v33 = vmul.f32 %v6614_v59, %v6614_v59 }
 0x324   :  { %v5812_v24 = vpop.eup %5811  ;;  %v874_v26 = vmul.f32 0.7978846, %v842_v43  ;;  %v843_v29 = vadd.f32 %v811_v60, %v6591_v57  ;;  %v844_v7 = vadd.f32 %v812_v61, %v6596_v42  ;;  %v6622_v14 = vadd.f32 %v698_v27, %v6474_v44 }
 0x325   :  { %v964_v9 = vmul.f32 0.5, %v932_v12  ;;  %v934_v34 = vadd.f32 1.0, %v5812_v24  ;;  %5815 = vtanh.f32 %v872_v53  ;;  %v781_v2 = vmul.f32 %v749_v33, %v6614_v59 }
 0x326   :  { %5817 = vtanh.f32 %v873_v54  ;;  %v875_v50 = vmul.f32 0.7978846, %v843_v29  ;;  %v876_v11 = vmul.f32 0.7978846, %v844_v7  ;;  %v750_v39 = vmul.f32 %v6622_v14, %v6622_v14 }
 0x327   :  { %v996_v23 = vmul.f32 %v964_v9, %v6537_v41  ;;  %v966_v48 = vmul.f32 0.5, %v934_v34  ;;  %5819 = vtanh.f32 %v874_v26  ;;  %v813_v28 = vmul.f32 0.044715, %v781_v2 }
 0x328   :  { %5821 = vtanh.f32 %v875_v50  ;;  %v782_v27 = vmul.f32 %v750_v39, %v6622_v14  ;;  %v1022_v58 = vpack.c.bf16 %v994_v17, %v992_v45  ;;  %v927_v15 = vadd.f32 1.0, %v6571_v37 }
 0x329   :  { %v998_v43 = vmul.f32 %v966_v48, %v6549_v22  ;;  %5823 = vtanh.f32 %v876_v11  ;;  %v845_v60 = vadd.f32 %v813_v28, %v6614_v59  ;;  %v929_v61 = vadd.f32 1.0, %v6584_v51 }
 0x32a   :  { %v814_v12 = vmul.f32 0.044715, %v782_v27  ;;  %4915 = vmatprep.mubr.msk.bf16.mxu0 %vm1139_vm4, %v1022_v58  ;;  %v959_v41 = vmul.f32 0.5, %v927_v15  ;;  %v931_v53 = vadd.f32 1.0, %v5806_v6  ;;  %v933_v54 = vadd.f32 1.0, %v5810_v20 }
 0x32b   :  { %v877_v33 = vmul.f32 0.7978846, %v845_v60  ;;  %v961_v24 = vmul.f32 0.5, %v929_v61  ;;  %v1024_v26 = vpack.c.bf16 %v998_v43, %v996_v23 }
 0x32c   :  { %v5814_v29 = vpop.eup %5813  ;;  %v846_v45 = vadd.f32 %v814_v12, %v6622_v14  ;;  %v963_v37 = vmul.f32 0.5, %v931_v53  ;;  %v965_v17 = vmul.f32 0.5, %v933_v54  ;;  %v991_v22 = vmul.f32 %v959_v41, %v6505_v21 }
 0x32d   :  { %5825 = vtanh.f32 %v877_v33  ;;  %v993_v7 = vmul.f32 %v961_v24, %v6515_v31  ;;  %v935_v51 = vadd.f32 1.0, %v5814_v29 }
 0x32e   :  { %v878_v9 = vmul.f32 0.7978846, %v846_v45  ;;  %v995_v34 = vmul.f32 %v963_v37, %v6533_v18  ;;  %v997_v6 = vmul.f32 %v965_v17, %v6543_v8 }
 0x32f   :  { %v5816_v20 = vpop.eup %5815  ;;  %v1021_v2 = vpack.c.bf16 %v993_v7, %v991_v22  ;;  %v967_v28 = vmul.f32 0.5, %v935_v51 }
 0x330   :  { %v5818_v50 = vpop.eup %5817  ;;  %v936_v11 = vadd.f32 1.0, %v5816_v20  ;;  %5827 = vtanh.f32 %v878_v9  ;;  %v1023_v39 = vpack.c.bf16 %v997_v6, %v995_v34 }
 0x331   :  { %v5820_v23 = vpop.eup %5819  ;;  %1205 = vmatmul.mubr.bf16.gmra.mrb[20].mxu0 %v1021_v2  ;;  %v937_v48 = vadd.f32 1.0, %v5818_v50  ;;  %v999_v8 = vmul.f32 %v967_v28, %v6561_v56 }
 0x332   :  { %v5822_v27 = vpop.eup %5821  ;;  %v968_v21 = vmul.f32 0.5, %v936_v11  ;;  %v938_v58 = vadd.f32 1.0, %v5820_v23  ;;  %4916 = vmatprep.mubr.msk.bf16.mxu0 %vm1139_vm4, %v1024_v26 }
 0x333   :  { %v5824_v31 = vpop.eup %5823  ;;  %v969_v15 = vmul.f32 0.5, %v937_v48  ;;  %v939_v43 = vadd.f32 1.0, %v5822_v27 }
 0x334   :  { %v970_v18 = vmul.f32 0.5, %v938_v58  ;;  %v1000_v61 = vmul.f32 %v968_v21, %v6575_v5  ;;  %v940_v53 = vadd.f32 1.0, %v5824_v31 }
 0x335   :  { %v1001_v60 = vmul.f32 %v969_v15, %v6578_v49  ;;  %v971_v29 = vmul.f32 0.5, %v939_v43 }
 0x336   :  { %v1002_v12 = vmul.f32 %v970_v18, %v6582_v47  ;;  %v972_v37 = vmul.f32 0.5, %v940_v53 }
 0x337   :  { %v5826_v41 = vpop.eup %5825  ;;  %v1025_v54 = vpack.c.bf16 %v1001_v60, %v999_v8  ;;  %v1003_v56 = vmul.f32 %v971_v29, %v6591_v57 }
 0x338   :  { %v1026_v33 = vpack.c.bf16 %v1002_v12, %v1000_v61  ;;  %v941_v24 = vadd.f32 1.0, %v5826_v41  ;;  %v1004_v9 = vmul.f32 %v972_v37, %v6596_v42 }
 0x339   :  { %1213 = vmatmul.mubr.bf16.gmra.mrb[24].mxu0 %v1023_v39 }
 0x33a   :  { %v5828_v26 = vpop.eup %5827  ;;  %4917 = vmatprep.mubr.msk.bf16.mxu0 %vm1139_vm4, %v1026_v33  ;;  %v973_v45 = vmul.f32 0.5, %v941_v24 }
 0x33b   :  { %v942_v17 = vadd.f32 1.0, %v5828_v26 }
 0x33c   :  { %v1005_v49 = vmul.f32 %v973_v45, %v6614_v59 }
 0x33d   :  { %v974_v5 = vmul.f32 0.5, %v942_v17  ;;  %v702_v22 = vpop.f32.mrb[20].mxu1 }
 0x33e   :  { %v6648_v47 = vadd.f32 %v702_v22, %v6477_v10  ;;  %v704_v7 = vpop.f32.mrb[21].mxu1  ;;  %v1027_v51 = vpack.c.bf16 %v1005_v49, %v1003_v56 }
 0x33f   :  { %v1006_v34 = vmul.f32 %v974_v5, %v6622_v14  ;;  %v6653_v6 = vadd.f32 %v704_v7, %v6474_v44  ;;  %v706_v20 = vpop.f32.mrb[22].mxu1 }
 0x340   :  { %v751_v57 = vmul.f32 %v6648_v47, %v6648_v47  ;;  %v6658_v59 = vadd.f32 %v706_v20, %v6477_v10  ;;  %v708_v2 = vpop.f32.mrb[23].mxu1 }
 0x341   :  { %1221 = vmatmul.mubr.bf16.gmra.mrb[28].mxu0 %v1025_v54  ;;  %v1028_v50 = vpack.c.bf16 %v1006_v34, %v1004_v9  ;;  %v752_v11 = vmul.f32 %v6653_v6, %v6653_v6  ;;  %v6663_v42 = vadd.f32 %v708_v2, %v6474_v44 }
 0x342   :  { %v783_v14 = vmul.f32 %v751_v57, %v6648_v47  ;;  %v753_v39 = vmul.f32 %v6658_v59, %v6658_v59 }
 0x343   :  { %4918 = vmatprep.mubr.msk.bf16.mxu0 %vm1139_vm4, %v1028_v50  ;;  %v784_v23 = vmul.f32 %v752_v11, %v6653_v6  ;;  %v754_v48 = vmul.f32 %v6663_v42, %v6663_v42 }
 0x344   :  { %v815_v28 = vmul.f32 0.044715, %v783_v14  ;;  %v785_v27 = vmul.f32 %v753_v39, %v6658_v59 }
 0x345   :  { %v816_v21 = vmul.f32 0.044715, %v784_v23  ;;  %v786_v58 = vmul.f32 %v754_v48, %v6663_v42  ;;  %v712_v31 = vpop.f32.mrb[24].mxu1 }
 0x346   :  { %v847_v15 = vadd.f32 %v815_v28, %v6648_v47  ;;  %v817_v18 = vmul.f32 0.044715, %v785_v27  ;;  %v6676_v43 = vadd.f32 %v712_v31, %v6477_v10  ;;  %v714_v8 = vpop.f32.mrb[25].mxu1 }
 0x347   :  { %v848_v60 = vadd.f32 %v816_v21, %v6653_v6  ;;  %v818_v61 = vmul.f32 0.044715, %v786_v58  ;;  %v6680_v12 = vadd.f32 %v714_v8, %v6474_v44  ;;  %v716_v41 = vpop.f32.mrb[26].mxu1 }
 0x348   :  { %v879_v53 = vmul.f32 0.7978846, %v847_v15  ;;  %v849_v54 = vadd.f32 %v817_v18, %v6658_v59  ;;  %v755_v33 = vmul.f32 %v6676_v43, %v6676_v43  ;;  %v6686_v24 = vadd.f32 %v716_v41, %v6477_v10  ;;  %v718_v29 = vpop.f32.mrb[27].mxu1 }
 0x349   :  { %v880_v26 = vmul.f32 0.7978846, %v848_v60  ;;  %1229 = vmatmul.mubr.bf16.gmra.mrb[32].mxu0 %v1027_v51  ;;  %v850_v45 = vadd.f32 %v818_v61, %v6663_v42  ;;  %v756_v37 = vmul.f32 %v6680_v12, %v6680_v12  ;;  %v6692_v17 = vadd.f32 %v718_v29, %v6474_v44 }
 0x34a   :  { %5829 = vtanh.f32 %v879_v53  ;;  %v881_v56 = vmul.f32 0.7978846, %v849_v54  ;;  %v787_v49 = vmul.f32 %v755_v33, %v6676_v43  ;;  %v757_v5 = vmul.f32 %v6686_v24, %v6686_v24 }
 0x34b   :  { %5831 = vtanh.f32 %v880_v26  ;;  %v882_v22 = vmul.f32 0.7978846, %v850_v45  ;;  %v788_v7 = vmul.f32 %v756_v37, %v6680_v12  ;;  %v758_v51 = vmul.f32 %v6692_v17, %v6692_v17 }
 0x34c   :  { %5833 = vtanh.f32 %v881_v56  ;;  %v819_v9 = vmul.f32 0.044715, %v787_v49  ;;  %v789_v34 = vmul.f32 %v757_v5, %v6686_v24 }
 0x34d   :  { %5835 = vtanh.f32 %v882_v22  ;;  %v820_v20 = vmul.f32 0.044715, %v788_v7  ;;  %v790_v57 = vmul.f32 %v758_v51, %v6692_v17  ;;  %v722_v2 = vpop.f32.mrb[28].mxu1 }
 0x34e   :  { %v851_v50 = vadd.f32 %v819_v9, %v6676_v43  ;;  %v821_v11 = vmul.f32 0.044715, %v789_v34  ;;  %v6704_v14 = vadd.f32 %v722_v2, %v6477_v10  ;;  %v724_v39 = vpop.f32.mrb[29].mxu1 }
 0x34f   :  { %v852_v23 = vadd.f32 %v820_v20, %v6680_v12  ;;  %v822_v48 = vmul.f32 0.044715, %v790_v57  ;;  %v6708_v28 = vadd.f32 %v724_v39, %v6474_v44  ;;  %v726_v27 = vpop.f32.mrb[30].mxu1 }
 0x350   :  { %v883_v21 = vmul.f32 0.7978846, %v851_v50  ;;  %v853_v58 = vadd.f32 %v821_v11, %v6686_v24  ;;  %v759_v31 = vmul.f32 %v6704_v14, %v6704_v14  ;;  %v6714_v15 = vadd.f32 %v726_v27, %v6477_v10  ;;  %v728_v18 = vpop.f32.mrb[31].mxu1 }
 0x351   :  { %v884_v8 = vmul.f32 0.7978846, %v852_v23  ;;  %v854_v60 = vadd.f32 %v822_v48, %v6692_v17  ;;  %v760_v61 = vmul.f32 %v6708_v28, %v6708_v28  ;;  %v6720_v41 = vadd.f32 %v728_v18, %v6474_v44 }
 0x352   :  { %5837 = vtanh.f32 %v883_v21  ;;  %v885_v53 = vmul.f32 0.7978846, %v853_v58  ;;  %v791_v54 = vmul.f32 %v759_v31, %v6704_v14  ;;  %v761_v33 = vmul.f32 %v6714_v15, %v6714_v15 }
 0x353   :  { %5839 = vtanh.f32 %v884_v8  ;;  %v886_v10 = vmul.f32 0.7978846, %v854_v60  ;;  %v792_v29 = vmul.f32 %v760_v61, %v6708_v28  ;;  %v762_v26 = vmul.f32 %v6720_v41, %v6720_v41 }
 0x354   :  { %v5830_v45 = vpop.eup %5829  ;;  %5841 = vtanh.f32 %v885_v53  ;;  %v823_v37 = vmul.f32 0.044715, %v791_v54  ;;  %v793_v44 = vmul.f32 %v761_v33, %v6714_v15 }
 0x355   :  { %v5832_v56 = vpop.eup %5831  ;;  %5843 = vtanh.f32 %v886_v10  ;;  %v824_v49 = vmul.f32 0.044715, %v792_v29  ;;  %v794_v5 = vmul.f32 %v762_v26, %v6720_v41  ;;  %v943_v22 = vadd.f32 1.0, %v5830_v45 }
 0x356   :  { %v5834_v7 = vpop.eup %5833  ;;  %v944_v51 = vadd.f32 1.0, %v5832_v56  ;;  %v855_v9 = vadd.f32 %v823_v37, %v6704_v14  ;;  %v825_v34 = vmul.f32 0.044715, %v793_v44 }
 0x357   :  { %v5836_v20 = vpop.eup %5835  ;;  %v856_v57 = vadd.f32 %v824_v49, %v6708_v28  ;;  %v826_v2 = vmul.f32 0.044715, %v794_v5  ;;  %v945_v50 = vadd.f32 1.0, %v5834_v7  ;;  %v975_v11 = vmul.f32 0.5, %v943_v22 }
 0x358   :  { %v976_v39 = vmul.f32 0.5, %v944_v51  ;;  %v946_v23 = vadd.f32 1.0, %v5836_v20  ;;  %v887_v48 = vmul.f32 0.7978846, %v855_v9  ;;  %v857_v27 = vadd.f32 %v825_v34, %v6714_v15 }
 0x359   :  { %v888_v21 = vmul.f32 0.7978846, %v856_v57  ;;  %v858_v58 = vadd.f32 %v826_v2, %v6720_v41  ;;  %v977_v31 = vmul.f32 0.5, %v945_v50  ;;  %v1007_v61 = vmul.f32 %v975_v11, %v6648_v47 }
 0x35a   :  { %v978_v18 = vmul.f32 0.5, %v946_v23  ;;  %5845 = vtanh.f32 %v887_v48  ;;  %v889_v8 = vmul.f32 0.7978846, %v857_v27  ;;  %v1008_v33 = vmul.f32 %v976_v39, %v6653_v6 }
 0x35b   :  { %5847 = vtanh.f32 %v888_v21  ;;  %v890_v60 = vmul.f32 0.7978846, %v858_v58  ;;  %v1009_v53 = vmul.f32 %v977_v31, %v6658_v59 }
 0x35c   :  { %v5838_v54 = vpop.eup %5837  ;;  %v1010_v10 = vmul.f32 %v978_v18, %v6663_v42  ;;  %5849 = vtanh.f32 %v889_v8 }
 0x35d   :  { %v5840_v29 = vpop.eup %5839  ;;  %5851 = vtanh.f32 %v890_v60  ;;  %v1029_v26 = vpack.c.bf16 %v1009_v53, %v1007_v61  ;;  %v947_v45 = vadd.f32 1.0, %v5838_v54  ;;  %v5954_v53 = vmov 0.0  }
 0x35e   :  { %v5842_v37 = vpop.eup %5841  ;;  %v948_v44 = vadd.f32 1.0, %v5840_v29  ;;  %v1030_v56 = vpack.c.bf16 %v1010_v10, %v1008_v33  ;;  %5256 = vmatprep.subr.bf16.mxu1 %v5954_v53  ;;  %5296 = vmatprep.subr.bf16.mxu0 %v5954_v53 }
 0x35f   :  { %v5844_v49 = vpop.eup %5843  ;;  %v949_v5 = vadd.f32 1.0, %v5842_v37  ;;  %v979_v22 = vmul.f32 0.5, %v947_v45  ;;  %5272 = vmatprep.mubr.msk.bf16.mxu1 %vm5955_vm5, %v5954_v53 }
 0x360   :  { %v980_v7 = vmul.f32 0.5, %v948_v44  ;;  %v950_v47 = vadd.f32 1.0, %v5844_v49  ;;  %4919 = vmatprep.mubr.msk.bf16.mxu0 %vm1139_vm4, %v1030_v56 }
 0x361   :  { %1237 = vmatmul.mubr.bf16.gmra.mrb[36].mxu0 %v1029_v26  ;;  %v981_v59 = vmul.f32 0.5, %v949_v5  ;;  %v1011_v42 = vmul.f32 %v979_v22, %v6676_v43 }
 0x362   :  { %v982_v6 = vmul.f32 0.5, %v950_v47  ;;  %v1012_v34 = vmul.f32 %v980_v7, %v6680_v12 }
 0x363   :  { %v1013_v51 = vmul.f32 %v981_v59, %v6686_v24 }
 0x364   :  { %v5846_v9 = vpop.eup %5845  ;;  %v1014_v20 = vmul.f32 %v982_v6, %v6692_v17 }
 0x365   :  { %v5848_v57 = vpop.eup %5847  ;;  %v1031_v2 = vpack.c.bf16 %v1013_v51, %v1011_v42  ;;  %v951_v50 = vadd.f32 1.0, %v5846_v9 }
 0x366   :  { %v5850_v11 = vpop.eup %5849  ;;  %v952_v39 = vadd.f32 1.0, %v5848_v57  ;;  %v1032_v23 = vpack.c.bf16 %v1014_v20, %v1012_v34 }
 0x367   :  { %v5852_v48 = vpop.eup %5851  ;;  %v953_v27 = vadd.f32 1.0, %v5850_v11  ;;  %v983_v21 = vmul.f32 0.5, %v951_v50 }
 0x368   :  { %v984_v58 = vmul.f32 0.5, %v952_v39  ;;  %v954_v31 = vadd.f32 1.0, %v5852_v48  ;;  %4920 = vmatprep.mubr.msk.bf16.mxu0 %vm1139_vm4, %v1032_v23 }
 0x369   :  { %1245 = vmatmul.mubr.bf16.gmra.mrb[40].mxu0 %v1031_v2  ;;  %v985_v43 = vmul.f32 0.5, %v953_v27  ;;  %v1015_v12 = vmul.f32 %v983_v21, %v6704_v14  ;;  %v6758_v14 = vld [vmem:[%s7643_s6 + $0x3] ss:$0 sm:$0xff] }
 0x36a   :  { %v986_v24 = vmul.f32 0.5, %v954_v31  ;;  %v1016_v18 = vmul.f32 %v984_v58, %v6708_v28  ;;  %1403 = vrot.lane.b32.xlu1 %v6758_v14, %s5956_s21  ;;  %v6761_v28 = vpop.permute.xlu1 %1136 }
 0x36b   :  { %v1017_v17 = vmul.f32 %v985_v43, %v6714_v15 }
 0x36c   :  { %v1018_v8 = vmul.f32 %v986_v24, %v6720_v41 }
 0x36d   :  { %v1033_v60 = vpack.c.bf16 %v1017_v17, %v1015_v12 }
 0x36e   :  { %v1034_v61 = vpack.c.bf16 %v1018_v8, %v1016_v18 }
 0x370   :  { %4921 = vmatprep.mubr.msk.bf16.mxu0 %vm1139_vm4, %v1034_v61 }
 0x371   :  { %1253 = vmatmul.mubr.bf16.gmra.mrb[44].mxu0 %v1033_v60 }
 0x372   :  { %5298 = vmatprep.mubr.msk.bf16.mxu0 %vm5955_vm5, %v5954_v53 }
 0x3f2   :  { %v1198_v15 = vpop.f32.mrb[16].mxu0 }
 0x3f3   :  { %v1199_v41 = vadd.f32 %v1198_v15, %v6761_v28  ;;  %v1200_v54 = vpop.f32.mrb[17].mxu0 }
 0x3f4   :  { %v1201_v33 = vpop.f32.mrb[18].mxu0 }
 0x3f5   :  { %v1202_v10 = vadd.f32 %v1201_v33, %v6761_v28  ;;  %v1203_v29 = vpop.f32.mrb[19].mxu0  ;;  %v1261_v26 = vadd.f32 %v1199_v41, %v6331_v52 }
 0x3f7   :  { %v1262_v45 = vadd.f32 %v1202_v10, %v6334_v55 }
 0x3f9   :  { %v1278_v37 = vpack.c.bf16 %v1262_v45, %v1261_v26 }
 0x3fb   :  { %5257 = vmatpush3.bf16.msra.mxu1 %v1278_v37 }
 0x3fc   :  { %5258 = vmatprep.subr.bf16.mxu1 %v5954_v53 }
 0x404   :  { %v1206_v44 = vpop.f32.mrb[20].mxu0 }
 0x405   :  { %v1207_v56 = vadd.f32 %v1206_v44, %v6761_v28  ;;  %v1208_v49 = vpop.f32.mrb[21].mxu0 }
 0x406   :  { %v1209_v5 = vpop.f32.mrb[22].mxu0 }
 0x407   :  { %v1210_v22 = vadd.f32 %v1209_v5, %v6761_v28  ;;  %v1211_v7 = vpop.f32.mrb[23].mxu0  ;;  %v1263_v47 = vadd.f32 %v1207_v56, %v6348_v62 }
 0x409   :  { %v1264_v59 = vadd.f32 %v1210_v22, %v6344_v19 }
 0x40b   :  { %v1279_v6 = vpack.c.bf16 %v1264_v59, %v1263_v47  ;;  %v5957_v47 = vmov 65535  }
 0x40c   :  { %v1214_v52 = vpop.f32.mrb[24].mxu0  ;;  %v1344_v59 = vsel %vm1342_vm6, 4294967295, %v5957_v47 }
 0x40d   :  { %v1215_v55 = vadd.f32 %v1214_v52, %v6761_v28  ;;  %v1216_v42 = vpop.f32.mrb[25].mxu0  ;;  %5259 = vmatpush3.bf16.msra.mxu1 %v1279_v6  ;;  %v1330_v6 = vld [vmem:[%s7642_s5 + $0x10] sm:$0x3]  ;;  %v1345_v52 = vsel %vm1343_vm7, %v1344_v59, 0 }
 0x40e   :  { %v1217_v51 = vpop.f32.mrb[26].mxu0  ;;  %5260 = vmatprep.subr.bf16.mxu1 %v5954_v53  ;;  %v1347_v42 = vand.u32 %v1345_v52, %v1330_v6 }
 0x40f   :  { %v1218_v9 = vadd.f32 %v1217_v51, %v6761_v28  ;;  %v1219_v34 = vpop.f32.mrb[27].mxu0  ;;  %v1265_v20 = vadd.f32 %v1215_v55, %v6362_v35  ;;  %v5704_v51 = vld [vmem:[%s7642_s5 + $0x8] sm:$0xff]  }
 0x411   :  { %v1266_v57 = vadd.f32 %v1218_v9, %v6358_v38  ;;  %v5707_v9 = vld [vmem:[%s7644_s7 + $0x8] ss:$12 sps:$4 sm:$0xff]  }
 0x413   :  { %v1280_v2 = vpack.c.bf16 %v1266_v57, %v1265_v20 }
 0x414   :  { %v1222_v62 = vpop.f32.mrb[28].mxu0 }
 0x415   :  { %v1223_v19 = vadd.f32 %v1222_v62, %v6761_v28  ;;  %v1224_v50 = vpop.f32.mrb[29].mxu0  ;;  %5261 = vmatpush3.bf16.msra.mxu1 %v1280_v2 }
 0x416   :  { %v1225_v11 = vpop.f32.mrb[30].mxu0  ;;  %5262 = vmatprep.subr.bf16.mxu1 %v5954_v53 }
 0x417   :  { %v1226_v39 = vadd.f32 %v1225_v11, %v6761_v28  ;;  %v1227_v23 = vpop.f32.mrb[31].mxu0  ;;  %v1267_v48 = vadd.f32 %v1223_v19, %v6377_v25 }
 0x419   :  { %v1268_v27 = vadd.f32 %v1226_v39, %v6372_v30 }
 0x41b   :  { %v1281_v21 = vpack.c.bf16 %v1268_v27, %v1267_v48  ;;  %v5705_v48 = vld [vmem:[%s7644_s7 + $0x4] ss:$12 sps:$4 sm:$0xff]  }
 0x41c   :  { %v1230_v35 = vpop.f32.mrb[32].mxu0 }
 0x41d   :  { %v1231_v38 = vadd.f32 %v1230_v35, %v6761_v28  ;;  %v1232_v58 = vpop.f32.mrb[33].mxu0  ;;  %5263 = vmatpush3.bf16.msra.mxu1 %v1281_v21  ;;  %v5710_v21 = vld [vmem:[%s7644_s7 + $0x20] ss:$12 sps:$4 sm:$0xff]   ;;  %v5713_v35 = vld [vmem:[%s7644_s7 + $0x38] ss:$12 sps:$4 sm:$0xff]  }
 0x41e   :  { %v1233_v31 = vpop.f32.mrb[34].mxu0  ;;  %5264 = vmatprep.subr.bf16.mxu1 %v5954_v53  ;;  %v5714_v58 = vld [vmem:[%s7644_s7 + $0x4c] ss:$12 sps:$4 sm:$0xff]  }
 0x41f   :  { %v1234_v43 = vadd.f32 %v1233_v31, %v6761_v28  ;;  %v1235_v24 = vpop.f32.mrb[35].mxu0  ;;  %v1269_v12 = vadd.f32 %v1231_v38, %v6386_v46  ;;  %v5711_v38 = vld [vmem:[%s7644_s7 + $0x34] ss:$12 sps:$4 sm:$0xff]   ;;  %v5716_v31 = vld [vmem:[%s7644_s7 + $0x50] ss:$12 sps:$4 sm:$0xff]  }
 0x421   :  { %v1270_v17 = vadd.f32 %v1234_v43, %v6389_v1  ;;  %v1404_v43 = vpop.permute.xlu1 %1403 }
 0x423   :  { %v1282_v18 = vpack.c.bf16 %v1270_v17, %v1269_v12 }
 0x425   :  { %5265 = vmatpush3.bf16.msra.mxu1 %v1282_v18 }
 0x426   :  { %5266 = vmatprep.subr.bf16.mxu1 %v5954_v53 }
 0x434   :  { %v1238_v30 = vpop.f32.mrb[36].mxu0 }
 0x435   :  { %v1239_v25 = vadd.f32 %v1238_v30, %v6761_v28  ;;  %v1240_v8 = vpop.f32.mrb[37].mxu0 }
 0x436   :  { %v1241_v60 = vpop.f32.mrb[38].mxu0 }
 0x437   :  { %v1242_v61 = vadd.f32 %v1241_v60, %v6761_v28  ;;  %v1243_v15 = vpop.f32.mrb[39].mxu0  ;;  %v1271_v41 = vadd.f32 %v1239_v25, %v6400_v63 }
 0x439   :  { %v1272_v54 = vadd.f32 %v1242_v61, %v6403_v4  ;;  %v1455_v61 = vld [vmem:[%s7647_s10] sm:$0x3] }
 0x43a   :  { %v1506_v15 = vrot.slane %v1455_v61, %v6163_v3 }
 0x43b   :  { %v1283_v33 = vpack.c.bf16 %v1272_v54, %v1271_v41 }
 0x43c   :  { %v1246_v46 = vpop.f32.mrb[40].mxu0 }
 0x43d   :  { %v1247_v1 = vadd.f32 %v1246_v46, %v6761_v28  ;;  %v1248_v10 = vpop.f32.mrb[41].mxu0  ;;  %5267 = vmatpush3.bf16.msra.mxu1 %v1283_v33 }
 0x43e   :  { %v1249_v29 = vpop.f32.mrb[42].mxu0  ;;  %5268 = vmatprep.subr.bf16.mxu1 %v5954_v53  ;;  %v1510_v10 = vrot.slane %v1455_v61, %v6157_v0 }
 0x43f   :  { %v1250_v26 = vadd.f32 %v1249_v29, %v6761_v28  ;;  %v1251_v45 = vpop.f32.mrb[43].mxu0  ;;  %v1273_v37 = vadd.f32 %v1247_v1, %v6414_v16 }
 0x441   :  { %v1274_v44 = vadd.f32 %v1250_v26, %v6417_v36 }
 0x443   :  { %v1284_v56 = vpack.c.bf16 %v1274_v44, %v1273_v37 }
 0x444   :  { %v1254_v63 = vpop.f32.mrb[44].mxu0 }
 0x445   :  { %v1255_v4 = vadd.f32 %v1254_v63, %v6761_v28  ;;  %v1256_v49 = vpop.f32.mrb[45].mxu0  ;;  %5269 = vmatpush3.bf16.msra.mxu1 %v1284_v56 }
 0x446   :  { %v1257_v5 = vpop.f32.mrb[46].mxu0  ;;  %5270 = vmatprep.subr.bf16.mxu1 %v5954_v53 }
 0x447   :  { %v1258_v22 = vadd.f32 %v1257_v5, %v6761_v28  ;;  %v1259_v7 = vpop.f32.mrb[47].mxu0  ;;  %v1275_v16 = vadd.f32 %v1255_v4, %v6431_v32  ;;  %v1277_v28 = vld [vmem:[%s7639_s2] sm:$0x1] }
 0x448   :  { %v5703_v32 = vld [vmem:[%s7642_s5] sm:$0xff]  }
 0x449   :  { %v1276_v36 = vadd.f32 %v1258_v22, %v6428_v40  ;;  %v1331_v40 = vld [vmem:[%s7638_s1] sm:$0x1]  ;;  %s5958_s1 = smov 16  }
 0x44b   :  { %v1285_v55 = vpack.c.bf16 %v1276_v36, %v1275_v16 }
 0x44d   :  { %5271 = vmatpush3.bf16.msra.mxu1 %v1285_v55 }
 0x44e   :  { %5276 = vmatprep.subr.bf16.mxu1 %v5954_v53 }
 0x450   :  { %5273 = vmatmul.mubr.bf16.vlgmr.msra.gmra.mrb[32].mxu1 %v1277_v28 }
 0x451   :  { %5277 = vmatpush3.bf16.msra.mxu1 %v1347_v42  ;;  %5278 = vmatprep.mubr.msk.bf16.mxu1 %vm5955_vm5, %v5954_v53 }
 0x452   :  { %5282 = vmatprep.subr.bf16.mxu1 %v5954_v53 }
 0x458   :  { %5279 = vmatmul.mubr.msk.bf16.vlgmr.msra.gmra.mrb[36].mxu1 %vm1338_vm8, %v1331_v40 }
 0x459   :  { %5286 = vmatprep.mubr.msk.bf16.mxu1 %vm5955_vm5, %v5954_v53  ;;  %5283 = vmatpush3.bf16.msra.mxu1 %v5703_v32 }
 0x45a   :  { %5284 = vmatprep.subr.bf16.mxu1 %v5954_v53 }
 0x45d   :  { %5285 = vmatpush3.bf16.msra.mxu1 %v5704_v51 }
 0x45e   :  { %1556 = vmatprep.subr.bf16.mxu1 %v5707_v9 }
 0x523   :  { %v1320_v34 = vpop.f32.mrb[32].mxu1 }
 0x524   :  { %1450 = vrot.lane.b32.xlu1 %v1320_v34, %s5958_s1  ;;  %v5274_v20 = vpop.f32.mrb[33].mxu1  ;;  %s5963_s1 = smov 120  }
 0x525   :  { %v1323_v57 = vpop.f32.mrb[34].mxu1 }
 0x526   :  { %v5275_v2 = vpop.f32.mrb[35].mxu1 }
 0x52b   :  { %v1383_v62 = vpop.f32.mrb[36].mxu1 }
 0x52c   :  { %v1384_v19 = vadd.f32 %v6758_v14, %v1383_v62  ;;  %v5280_v50 = vpop.f32.mrb[37].mxu1  ;;  %v5708_v14 = vld [vmem:[%s7644_s7 + $0x1c] ss:$12 sps:$4 sm:$0xff]  }
 0x52d   :  { %v1386_v11 = vpop.f32.mrb[38].mxu1 }
 0x52e   :  { %v1389_v39 = vmax.f32 %v1384_v19, 0.0  ;;  %v5281_v23 = vpop.f32.mrb[39].mxu1 }
 0x530   :  { %v1390_v27 = vpack.c.bf16 %v1389_v39, %v1389_v39 }
 0x532   :  { %5287 = vmatmul.mubr.msk.bf16.vlgmr.msra.gmra.mrb[40].mxu1 %vm504_vm2, %v1390_v27 }
 0x533   :  { %1557 = vmatpush1.bf16.msra.mxu1 %v5705_v48  ;;  %1588 = vmatprep.mubr.bf16.mxu1 %v5951_v13 }
 0x534   :  { %1558 = vmatprep.subr.bf16.mxu1 %v5710_v21 }
 0x537   :  { %1559 = vmatpush1.bf16.msra.mxu1 %v5708_v14 }
 0x538   :  { %1560 = vmatprep.subr.bf16.mxu1 %v5713_v35 }
 0x53b   :  { %1561 = vmatpush1.bf16.msra.mxu1 %v5711_v38 }
 0x53c   :  { %1562 = vmatprep.subr.bf16.mxu1 %v5716_v31 }
 0x53f   :  { %1563 = vmatpush1.bf16.msra.mxu1 %v5714_v58 }
 0x540   :  { %5290 = vmatprep.subr.bf16.mxu1 %v5954_v53 }
 0x596   :  { %v1451_v18 = vpop.permute.xlu1 %1450 }
 0x605   :  { %v1443_v24 = vpop.f32.mrb[40].mxu1 }
 0x606   :  { %v1444_v12 = vadd.f32 %v1443_v24, %v1404_v43  ;;  %v5288_v17 = vpop.f32.mrb[41].mxu1 }
 0x607   :  { %v1446_v30 = vpop.f32.mrb[42].mxu1 }
 0x608   :  { %v6853_v25 = vsel %vm1453_vm9, %v1444_v12, %v1451_v18  ;;  %v5289_v8 = vpop.f32.mrb[43].mxu1 }
 0x609   :  { %v1501_v60 = vpack.c.bf16 %v6853_v25, %v6853_v25 }
 0x60b   :  { %4935 = vmatmul.mubr.msk.bf16.vlgmr.msra.gmra.mrb[44].mxu1 %vm1139_vm4, %v1501_v60 }
 0x60c   :  { %5292 = vmatprep.mubr.msk.bf16.mxu1 %vm5955_vm5, %v5954_v53 }
 0x6de   :  { %v1590_v41 = vpop.f32.mrb[44].mxu1 }
 0x6df   :  { %v1591_v54 = vadd.f32 %v1590_v41, %v1506_v15  ;;  %v1592_v33 = vpop.f32.mrb[45].mxu1 }
 0x6e0   :  { %v1594_v46 = vpop.f32.mrb[46].mxu1  ;;  %v1593_v26 = vadd.f32 %v1592_v33, %v1510_v10 }
 0x6e1   :  { %v6864_v1 = vpack.c.bf16 %v1591_v54, %v1591_v54  ;;  %v1595_v29 = vpop.f32.mrb[47].mxu1 }
 0x6e2   :  { %v1598_v45 = vpack.c.bf16 %v1593_v26, %v1593_v26 }
 0x6e3   :  { %1602 = vrot.lane.b32.xlu1 %v6864_v1, %s5949_s17  ;;  %1600 = vrot.lane.b32.xlu0 %v6864_v1, %s5959_s28 }
 0x6e7   :  { %1606 = vrot.lane.b32.xlu1 %v6864_v1, %s5950_s20  ;;  %1604 = vrot.lane.b32.xlu0 %v6864_v1, %s5960_s29 }
 0x6eb   :  { %1611 = vrot.lane.b32.xlu1 %v1598_v45, %s5961_s13  ;;  %1609 = vrot.lane.b32.xlu0 %v6864_v1, %s5961_s13 }
 0x6ef   :  { %1617 = vrot.lane.b32.xlu1 %v1598_v45, %s5962_s14  ;;  %1615 = vrot.lane.b32.xlu0 %v1598_v45, %s5952_s30 }
 0x6f3   :  { %1619 = vrot.lane.b32.xlu0 %v6864_v1, %s5963_s1 }
 0x755   :  { %v6882_v37 = vpop.permute.xlu1 %1602  ;;  %v6884_v44 = vpop.permute.xlu0 %1600 }
 0x756   :  { %1716 = vrot.lane.b32.xlu0 %v6882_v37, %s5963_s1  ;;  %1668 = vrot.lane.b32.xlu1 %v6884_v44, %s5963_s1 }
 0x759   :  { %v6890_v56 = vpop.permute.xlu1 %1606  ;;  %v6892_v63 = vpop.permute.xlu0 %1604 }
 0x75a   :  { %1812 = vrot.lane.b32.xlu0 %v6890_v56, %s5963_s1  ;;  %1764 = vrot.lane.b32.xlu1 %v6892_v63, %s5963_s1 }
 0x75d   :  { %v1612_v4 = vpop.permute.xlu1 %1611  ;;  %v1610_v49 = vpop.permute.xlu0 %1609 }
 0x75e   :  { %v6899_v5 = vsel %vm1613_vm10, %v1610_v49, %v1612_v4 }
 0x75f   :  { %1860 = vrot.lane.b32.xlu1 %v6899_v5, %s5963_s1 }
 0x761   :  { %v6903_v22 = vpop.permute.xlu1 %1617  ;;  %v6905_v7 = vpop.permute.xlu0 %1615 }
 0x762   :  { %1908 = vrot.lane.b32.xlu0 %v6905_v7, %s5963_s1 }
 0x763   :  { %1956 = vrot.lane.b32.xlu1 %v6903_v22, %s5963_s1 }
 0x765   :  { %v1620_v47 = vpop.permute.xlu0 %1619 }
 0x766   :  { %v1626_v59 = vsel %vm1613_vm10, %v1620_v47, 0 }
 0x767   :  { %5291 = vmatpush3.bf16.xpose.msra.mxu1 %v1626_v59 }
 0x768   :  { %5302 = vmatprep.subr.bf16.mxu1 %v5954_v53 }
 0x76e   :  { %5293 = vmatmul.mubr.msk.bf16.vlgmr.msra.gmra.mrb[48].mxu1 %vm1613_vm10, %v6864_v1 }
 0x76f   :  { %5304 = vmatprep.mubr.msk.bf16.mxu1 %vm5955_vm5, %v5954_v53 }
 0x7c8   :  { %v1669_v16 = vpop.permute.xlu1 %1668  ;;  %v1717_v36 = vpop.permute.xlu0 %1716 }
 0x7c9   :  { %v1674_v6 = vsel %vm1613_vm10, %v1669_v16, 0  ;;  %v1722_v52 = vsel %vm1613_vm10, %v1717_v36, 0 }
 0x7ca   :  { %5297 = vmatpush3.bf16.xpose.msra.mxu0 %v1674_v6  ;;  %5303 = vmatpush3.bf16.xpose.msra.mxu1 %v1722_v52 }
 0x7cb   :  { %5308 = vmatprep.subr.bf16.mxu0 %v5954_v53  ;;  %5314 = vmatprep.subr.bf16.mxu1 %v5954_v53 }
 0x7cc   :  { %v1765_v55 = vpop.permute.xlu1 %1764  ;;  %v1813_v28 = vpop.permute.xlu0 %1812 }
 0x7cd   :  { %v1770_v42 = vsel %vm1613_vm10, %v1765_v55, 0  ;;  %v1818_v40 = vsel %vm1613_vm10, %v1813_v28, 0 }
 0x7d1   :  { %5299 = vmatmul.mubr.msk.bf16.vlgmr.msra.gmra.mrb[48].mxu0 %vm1613_vm10, %v6884_v44  ;;  %5305 = vmatmul.mubr.msk.bf16.vlgmr.msra.gmra.mrb[52].mxu1 %vm1613_vm10, %v6882_v37  ;;  %v1861_v32 = vpop.permute.xlu1 %1860 }
 0x7d2   :  { %5309 = vmatpush3.bf16.xpose.msra.mxu0 %v1770_v42  ;;  %5315 = vmatpush3.bf16.xpose.msra.mxu1 %v1818_v40  ;;  %v1866_v9 = vsel %vm1613_vm10, %v1861_v32, 0 }
 0x7d3   :  { %5310 = vmatprep.mubr.msk.bf16.mxu0 %vm5955_vm5, %v5954_v53  ;;  %5316 = vmatprep.mubr.msk.bf16.mxu1 %vm5955_vm5, %v5954_v53 }
 0x7d4   :  { %5320 = vmatprep.subr.bf16.mxu0 %v5954_v53  ;;  %5326 = vmatprep.subr.bf16.mxu1 %v5954_v53  ;;  %v1909_v51 = vpop.permute.xlu0 %1908 }
 0x7d5   :  { %v1914_v34 = vsel %vm1613_vm10, %v1909_v51, 0  ;;  %v1957_v20 = vpop.permute.xlu1 %1956 }
 0x7d6   :  { %v1962_v57 = vsel %vm1613_vm10, %v1957_v20, 0 }
 0x7d9   :  { %5311 = vmatmul.mubr.msk.bf16.vlgmr.msra.gmra.mrb[52].mxu0 %vm1613_vm10, %v6892_v63  ;;  %5317 = vmatmul.mubr.msk.bf16.vlgmr.msra.gmra.mrb[56].mxu1 %vm1613_vm10, %v6890_v56 }
 0x7da   :  { %5321 = vmatpush3.bf16.xpose.msra.mxu0 %v1866_v9  ;;  %5327 = vmatpush3.bf16.xpose.msra.mxu1 %v1914_v34 }
 0x7db   :  { %5322 = vmatprep.mubr.msk.bf16.mxu0 %vm5955_vm5, %v5954_v53  ;;  %5328 = vmatprep.mubr.msk.bf16.mxu1 %vm5955_vm5, %v5954_v53 }
 0x7dc   :  { %5332 = vmatprep.subr.bf16.mxu0 %v5954_v53  ;;  %5338 = vmatprep.subr.bf16.mxu1 %v5954_v53 }
 0x7e1   :  { %5323 = vmatmul.mubr.msk.bf16.vlgmr.msra.gmra.mrb[56].mxu0 %vm1613_vm10, %v6899_v5  ;;  %5329 = vmatmul.mubr.msk.bf16.vlgmr.msra.gmra.mrb[60].mxu1 %vm1613_vm10, %v6905_v7 }
 0x7e2   :  { %5333 = vmatpush3.bf16.xpose.msra.mxu0 %v1962_v57  ;;  %5334 = vmatprep.mubr.msk.bf16.mxu0 %vm5955_vm5, %v5954_v53 }
 0x7e3   :  { %5344 = vmatprep.subr.bf16.mxu0 %v5954_v53  ;;  %5340 = vmatprep.mubr.msk.bf16.mxu1 %vm5955_vm5, %v5954_v53 }
 0x7e9   :  { %5335 = vmatmul.mubr.msk.bf16.vlgmr.msra.gmra.mrb[60].mxu0 %vm1613_vm10, %v6903_v22 }
 0x7ea   :  { %5346 = vmatprep.mubr.msk.bf16.mxu0 %vm5955_vm5, %v5954_v53 }
 0x841   :  { %v1662_v2 = vpop.f32.mrb[48].mxu1 }
 0x842   :  { %v5294_v62 = vpop.f32.mrb[49].mxu1  ;;  %v2005_v19 = vsel %vm2004_vm11, %v1662_v2, -inf }
 0x843   :  { %2006 = vmax.xlane.f32.xlu0 %v2005_v19  ;;  %v1665_v50 = vpop.f32.mrb[50].mxu1 }
 0x844   :  { %v5295_v11 = vpop.f32.mrb[51].mxu1 }
 0x8a4   :  { %v1710_v39 = vpop.f32.mrb[48].mxu0  ;;  %v1758_v23 = vpop.f32.mrb[52].mxu1 }
 0x8a5   :  { %v5300_v48 = vpop.f32.mrb[49].mxu0  ;;  %v5306_v27 = vpop.f32.mrb[53].mxu1  ;;  %v2008_v21 = vsel %vm2004_vm11, %v1710_v39, -inf  ;;  %v2011_v14 = vsel %vm2004_vm11, %v1758_v23, -inf }
 0x8a6   :  { %v1713_v35 = vpop.f32.mrb[50].mxu0  ;;  %2009 = vmax.xlane.f32.xlu1 %v2008_v21  ;;  %2012 = vmax.xlane.f32.xlu0 %v2011_v14  ;;  %v1761_v38 = vpop.f32.mrb[54].mxu1 }
 0x8a7   :  { %v5301_v58 = vpop.f32.mrb[51].mxu0  ;;  %v5307_v31 = vpop.f32.mrb[55].mxu1 }
 0x8ac   :  { %v1806_v43 = vpop.f32.mrb[52].mxu0  ;;  %v1854_v24 = vpop.f32.mrb[56].mxu1 }
 0x8ad   :  { %v5312_v12 = vpop.f32.mrb[53].mxu0  ;;  %v5318_v17 = vpop.f32.mrb[57].mxu1  ;;  %v2014_v18 = vsel %vm2004_vm11, %v1806_v43, -inf  ;;  %v2017_v15 = vsel %vm2004_vm11, %v1854_v24, -inf }
 0x8ae   :  { %v1809_v30 = vpop.f32.mrb[54].mxu0  ;;  %2015 = vmax.xlane.f32.xlu0 %v2014_v18  ;;  %v1857_v8 = vpop.f32.mrb[58].mxu1 }
 0x8af   :  { %v5313_v60 = vpop.f32.mrb[55].mxu0  ;;  %v5319_v61 = vpop.f32.mrb[59].mxu1 }
 0x8b2   :  { %2018 = vmax.xlane.f32.xlu0 %v2017_v15 }
 0x8b4   :  { %v6964_v41 = vpop.f32.mrb[56].mxu0  ;;  %v1950_v54 = vpop.f32.mrb[60].mxu1 }
 0x8b5   :  { %v5324_v33 = vpop.f32.mrb[57].mxu0  ;;  %v5330_v46 = vpop.f32.mrb[61].mxu1  ;;  %v2020_v10 = vsel %vm2004_vm11, %v6964_v41, -inf  ;;  %v2023_v29 = vsel %vm2004_vm11, %v1950_v54, -inf }
 0x8b6   :  { %2021 = vmax.xlane.f32.xlu1 %v2020_v10  ;;  %v1905_v26 = vpop.f32.mrb[58].mxu0  ;;  %2024 = vmax.xlane.f32.xlu0 %v2023_v29  ;;  %v1953_v45 = vpop.f32.mrb[62].mxu1 }
 0x8b7   :  { %v5325_v4 = vpop.f32.mrb[59].mxu0  ;;  %v5331_v49 = vpop.f32.mrb[63].mxu1 }
 0x8bc   :  { %v6969_v47 = vpop.f32.mrb[60].mxu0 }
 0x8bd   :  { %v5336_v59 = vpop.f32.mrb[61].mxu0  ;;  %v2026_v40 = vsel %vm2004_vm11, %v6969_v47, -inf }
 0x8be   :  { %v2001_v16 = vpop.f32.mrb[62].mxu0 }
 0x8bf   :  { %v5337_v36 = vpop.f32.mrb[63].mxu0 }
 0x8c7   :  { %2101 = vrot.lane.b32.xlu1 %v6864_v1, %s5952_s30 }
 0x8d0   :  { %v2007_v6 = vpop.xlane.xlu0 %2006 }
 0x8d1   :  { %v2029_v52 = vsub.f32 %v1662_v2, %v2007_v6 }
 0x8d3   :  { %v2037_v55 = vmul.f32 1.442695, %v2029_v52 }
 0x8d5   :  { %5853 = vpow2.f32 %v2037_v55 }
 0x8df   :  { %v5854_v28 = vpop.eup %5853 }
 0x8e0   :  { %v2053_v42 = vsel %vm2004_vm11, %v5854_v28, 0.0 }
 0x8e1   :  { %2054 = vadd.xlane.f32.xlu0 %v2053_v42 }
 0x8eb   :  { %2027 = vmax.xlane.f32.xlu1 %v2026_v40 }
 0x8f7   :  { %2150 = vrot.lane.b32.xlu0 %v6884_v44, %s5952_s30 }
 0x8fc   :  { %2198 = vrot.lane.b32.xlu1 %v6882_v37, %s5952_s30 }
 0x900   :  { %2246 = vrot.lane.b32.xlu1 %v6892_v63, %s5952_s30 }
 0x904   :  { %2294 = vrot.lane.b32.xlu1 %v6890_v56, %s5952_s30 }
 0x933   :  { %v2010_v1 = vpop.xlane.xlu1 %2009  ;;  %v2013_v32 = vpop.xlane.xlu0 %2012 }
 0x934   :  { %v2030_v51 = vsub.f32 %v1710_v39, %v2010_v1  ;;  %v2031_v9 = vsub.f32 %v1758_v23, %v2013_v32 }
 0x936   :  { %v2039_v34 = vmul.f32 1.442695, %v2030_v51  ;;  %v2041_v20 = vmul.f32 1.442695, %v2031_v9 }
 0x938   :  { %5855 = vpow2.f32 %v2039_v34 }
 0x939   :  { %5857 = vpow2.f32 %v2041_v20 }
 0x93b   :  { %v2016_v57 = vpop.xlane.xlu0 %2015 }
 0x93c   :  { %v2032_v2 = vsub.f32 %v1806_v43, %v2016_v57 }
 0x93e   :  { %v2043_v44 = vmul.f32 1.442695, %v2032_v2 }
 0x93f   :  { %v2019_v62 = vpop.xlane.xlu0 %2018 }
 0x940   :  { %5859 = vpow2.f32 %v2043_v44  ;;  %v2033_v37 = vsub.f32 %v1854_v24, %v2019_v62 }
 0x942   :  { %v6984_v19 = vpop.eup %5855  ;;  %v2045_v63 = vmul.f32 1.442695, %v2033_v37 }
 0x943   :  { %v6986_v50 = vpop.eup %5857  ;;  %v2022_v56 = vpop.xlane.xlu1 %2021  ;;  %v2056_v39 = vsel %vm2004_vm11, %v6984_v19, 0.0 }
 0x944   :  { %v2025_v11 = vpop.xlane.xlu0 %2024  ;;  %5861 = vpow2.f32 %v2045_v63  ;;  %2057 = vadd.xlane.f32.xlu1 %v2056_v39  ;;  %v2059_v48 = vsel %vm2004_vm11, %v6986_v50, 0.0  ;;  %v2034_v12 = vsub.f32 %v6964_v41, %v2022_v56  ;;  %v1493_v39 = vld [vmem:[%s7645_s8] sm:$0xf] }
 0x945   :  { %v2035_v23 = vsub.f32 %v1950_v54, %v2025_v11  ;;  %2060 = vadd.xlane.f32.xlu0 %v2059_v48 }
 0x946   :  { %v2047_v18 = vmul.f32 1.442695, %v2034_v12  ;;  %v1495_v12 = vld [vmem:[%s7645_s8 + $0x8] sm:$0xf] }
 0x947   :  { %v2049_v27 = vmul.f32 1.442695, %v2035_v23  ;;  %v2102_v21 = vpop.permute.xlu1 %2101 }
 0x948   :  { %v2108_v14 = vsel %vm1342_vm6, %v2102_v21, 0 }
 0x949   :  { %5863 = vpow2.f32 %v2049_v27  ;;  %5339 = vmatpush3.bf16.msra.mxu1 %v2108_v14  ;;  %v2499_v14 = vsel %vm2497_vm13, %v1493_v39, 0 }
 0x94a   :  { %v6993_v35 = vpop.eup %5859  ;;  %5350 = vmatprep.subr.bf16.mxu1 %v5954_v53 }
 0x94b   :  { %v2062_v38 = vsel %vm2004_vm11, %v6993_v35, 0.0 }
 0x94c   :  { %2063 = vadd.xlane.f32.xlu1 %v2062_v38 }
 0x94e   :  { %v6998_v58 = vpop.eup %5861 }
 0x94f   :  { %v2065_v31 = vsel %vm2004_vm11, %v6998_v58, 0.0 }
 0x950   :  { %2066 = vadd.xlane.f32.xlu0 %v2065_v31 }
 0x953   :  { %v7002_v43 = vpop.eup %5863 }
 0x954   :  { %v2071_v24 = vsel %vm2004_vm11, %v7002_v43, 0.0 }
 0x955   :  { %2072 = vadd.xlane.f32.xlu0 %v2071_v24 }
 0x95d   :  { %2342 = vrot.lane.b32.xlu1 %v6899_v5, %s5952_s30 }
 0x96e   :  { %v2055_v17 = vpop.xlane.xlu0 %2054 }
 0x96f   :  { %5865 = vrcp.f32 %v2055_v17 }
 0x970   :  { %5867 = vpow2.f32 %v2047_v18 }
 0x972   :  { %v2151_v30 = vpop.permute.xlu0 %2150 }
 0x973   :  { %v2156_v8 = vsel %vm1342_vm6, %v2151_v30, 0 }
 0x974   :  { %5345 = vmatpush3.bf16.msra.mxu0 %v2156_v8  ;;  %v2591_v8 = vsel %vm2497_vm13, %v1495_v12, 0 }
 0x975   :  { %5356 = vmatprep.subr.bf16.mxu0 %v5954_v53 }
 0x978   :  { %v2028_v60 = vpop.xlane.xlu1 %2027 }
 0x979   :  { %v5866_v61 = vpop.eup %5865  ;;  %v2036_v15 = vsub.f32 %v6969_v47, %v2028_v60 }
 0x97a   :  { %v2085_v54 = vmul.f32 %v5866_v61, %v5854_v28  ;;  %v7012_v41 = vpop.eup %5867 }
 0x97b   :  { %v2051_v33 = vmul.f32 1.442695, %v2036_v15  ;;  %v2068_v29 = vsel %vm2004_vm11, %v7012_v41, 0.0  ;;  %v4960_v15 = vld [vmem:[%s7647_s10 + $0x1] ss:$0 sm:$0xff] }
 0x97c   :  { %v2199_v5 = vpop.permute.xlu1 %2198  ;;  %v2093_v46 = vpack.c.bf16 %v2085_v54, %v2085_v54  ;;  %v1496_v54 = vld [vmem:[%s7645_s8 + $0xc] sm:$0xf] }
 0x97d   :  { %5869 = vpow2.f32 %v2051_v33  ;;  %v2204_v10 = vsel %vm1342_vm6, %v2199_v5, 0  ;;  %v1497_v33 = vld [vmem:[%s7645_s8 + $0x10] sm:$0xf] }
 0x97e   :  { %5341 = vmatmul.mubr.msk.bf16.vlgmr.msra.gmra.mrb[64].mxu1 %vm2103_vm12, %v2093_v46 }
 0x97f   :  { %5351 = vmatpush3.bf16.msra.mxu1 %v2204_v10  ;;  %5352 = vmatprep.mubr.msk.bf16.mxu1 %vm5955_vm5, %v5954_v53 }
 0x980   :  { %5362 = vmatprep.subr.bf16.mxu1 %v5954_v53  ;;  %v2247_v4 = vpop.permute.xlu1 %2246 }
 0x981   :  { %2069 = vadd.xlane.f32.xlu1 %v2068_v29  ;;  %v2637_v29 = vsel %vm2497_vm13, %v1496_v54, 0 }
 0x984   :  { %v2295_v49 = vpop.permute.xlu1 %2294 }
 0x985   :  { %v2300_v40 = vsel %vm1342_vm6, %v2295_v49, 0  ;;  %v2683_v49 = vsel %vm2497_vm13, %v1497_v33, 0 }
 0x987   :  { %v7021_v26 = vpop.eup %5869 }
 0x988   :  { %v2074_v45 = vsel %vm2004_vm11, %v7021_v26, 0.0 }
 0x989   :  { %2075 = vadd.xlane.f32.xlu0 %v2074_v45 }
 0x992   :  { %2438 = vrot.lane.b32.xlu1 %v6903_v22, %s5952_s30 }
 0x99f   :  { %2390 = vrot.lane.b32.xlu0 %v6905_v7, %s5952_s30  ;;  %v2252_v7 = vsel %vm1342_vm6, %v2247_v4, 0 }
 0x9a3   :  { %2884 = vrot.lane.b32.xlu0 %v4960_v15, %s5964_s22 }
 0x9d1   :  { %v2058_v47 = vpop.xlane.xlu1 %2057 }
 0x9d2   :  { %5871 = vrcp.f32 %v2058_v47  ;;  %v2061_v59 = vpop.xlane.xlu0 %2060 }
 0x9d3   :  { %5873 = vrcp.f32 %v2061_v59 }
 0x9d9   :  { %v2064_v16 = vpop.xlane.xlu1 %2063 }
 0x9da   :  { %5875 = vrcp.f32 %v2064_v16 }
 0x9dc   :  { %v5872_v36 = vpop.eup %5871 }
 0x9dd   :  { %v5874_v6 = vpop.eup %5873  ;;  %v2086_v52 = vmul.f32 %v5872_v36, %v6984_v19  ;;  %v2067_v55 = vpop.xlane.xlu0 %2066  ;;  %v1498_v36 = vld [vmem:[%s7645_s8 + $0x14] sm:$0xf] }
 0x9de   :  { %v2087_v28 = vmul.f32 %v5874_v6, %v6986_v50  ;;  %5877 = vrcp.f32 %v2067_v55  ;;  %v2343_v51 = vpop.permute.xlu1 %2342 }
 0x9df   :  { %v2094_v22 = vpack.c.bf16 %v2086_v52, %v2086_v52  ;;  %v2348_v20 = vsel %vm1342_vm6, %v2343_v51, 0 }
 0x9e0   :  { %v2095_v42 = vpack.c.bf16 %v2087_v28, %v2087_v28  ;;  %v2729_v28 = vsel %vm2497_vm13, %v1498_v36, 0 }
 0x9e1   :  { %5347 = vmatmul.mubr.msk.bf16.vlgmr.msra.gmra.mrb[64].mxu0 %vm2103_vm12, %v2094_v22 }
 0x9e2   :  { %5353 = vmatmul.mubr.msk.bf16.vlgmr.msra.gmra.mrb[68].mxu1 %vm2103_vm12, %v2095_v42  ;;  %5357 = vmatpush3.bf16.msra.mxu0 %v2252_v7  ;;  %v2073_v44 = vpop.xlane.xlu0 %2072  ;;  %v1499_v42 = vld [vmem:[%s7645_s8 + $0x18] sm:$0xf] }
 0x9e3   :  { %5363 = vmatpush3.bf16.msra.mxu1 %v2300_v40  ;;  %5358 = vmatprep.mubr.msk.bf16.mxu0 %vm5955_vm5, %v5954_v53  ;;  %5879 = vrcp.f32 %v2073_v44  ;;  %v2775_v51 = vsel %vm2497_vm13, %v1499_v42, 0 }
 0x9e4   :  { %v5876_v1 = vpop.eup %5875  ;;  %5368 = vmatprep.subr.bf16.mxu0 %v5954_v53  ;;  %5364 = vmatprep.mubr.msk.bf16.mxu1 %vm5955_vm5, %v5954_v53 }
 0x9e5   :  { %v2088_v32 = vmul.f32 %v5876_v1, %v6993_v35  ;;  %5374 = vmatprep.subr.bf16.mxu1 %v5954_v53 }
 0x9e7   :  { %v2096_v9 = vpack.c.bf16 %v2088_v32, %v2088_v32 }
 0x9e8   :  { %v5878_v34 = vpop.eup %5877 }
 0x9e9   :  { %v2089_v57 = vmul.f32 %v5878_v34, %v6998_v58  ;;  %5359 = vmatmul.mubr.msk.bf16.vlgmr.msra.gmra.mrb[68].mxu0 %vm2103_vm12, %v2096_v9 }
 0x9ea   :  { %5369 = vmatpush3.bf16.msra.mxu0 %v2348_v20  ;;  %5370 = vmatprep.mubr.msk.bf16.mxu0 %vm5955_vm5, %v5954_v53  ;;  %v1500_v20 = vld [vmem:[%s7645_s8 + $0x1c] sm:$0xf] }
 0x9eb   :  { %v2097_v2 = vpack.c.bf16 %v2089_v57, %v2089_v57  ;;  %5380 = vmatprep.subr.bf16.mxu0 %v5954_v53 }
 0x9ed   :  { %5365 = vmatmul.mubr.msk.bf16.vlgmr.msra.gmra.mrb[72].mxu1 %vm2103_vm12, %v2097_v2  ;;  %v5880_v37 = vpop.eup %5879 }
 0x9ee   :  { %5376 = vmatprep.mubr.msk.bf16.mxu1 %vm5955_vm5, %v5954_v53  ;;  %v2091_v50 = vmul.f32 %v5880_v37, %v7002_v43  ;;  %v1494_v43 = vld [vmem:[%s7645_s8 + $0x4] sm:$0xf]  ;;  %v2821_v37 = vsel %vm2497_vm13, %v1500_v20, 0 }
 0x9ef   :  { %v2545_v24 = vsel %vm2497_vm13, %v1494_v43, 0 }
 0x9f0   :  { %v2099_v21 = vpack.c.bf16 %v2091_v50, %v2091_v50 }
 0xa0e   :  { %v2070_v62 = vpop.xlane.xlu1 %2069 }
 0xa0f   :  { %5881 = vrcp.f32 %v2070_v62 }
 0xa12   :  { %v2439_v23 = vpop.permute.xlu1 %2438 }
 0xa13   :  { %v2444_v35 = vsel %vm1342_vm6, %v2439_v23, 0 }
 0xa16   :  { %v2076_v19 = vpop.xlane.xlu0 %2075 }
 0xa17   :  { %5883 = vrcp.f32 %v2076_v19 }
 0xa19   :  { %v5882_v63 = vpop.eup %5881 }
 0xa1a   :  { %v2090_v56 = vmul.f32 %v5882_v63, %v7012_v41  ;;  %v2391_v11 = vpop.permute.xlu0 %2390 }
 0xa1b   :  { %v2396_v48 = vsel %vm1342_vm6, %v2391_v11, 0 }
 0xa1c   :  { %5375 = vmatpush3.bf16.msra.mxu1 %v2396_v48  ;;  %v2098_v27 = vpack.c.bf16 %v2090_v56, %v2090_v56 }
 0xa1d   :  { %5386 = vmatprep.subr.bf16.mxu1 %v5954_v53 }
 0xa1e   :  { %5371 = vmatmul.mubr.msk.bf16.vlgmr.msra.gmra.mrb[72].mxu0 %vm2103_vm12, %v2098_v27 }
 0xa1f   :  { %5381 = vmatpush3.bf16.msra.mxu0 %v2444_v35  ;;  %5377 = vmatmul.mubr.msk.bf16.vlgmr.msra.gmra.mrb[76].mxu1 %vm2103_vm12, %v2099_v21 }
 0xa20   :  { %5382 = vmatprep.mubr.msk.bf16.mxu0 %vm5955_vm5, %v5954_v53  ;;  %5387 = vmatpush3.bf16.msra.mxu1 %v2499_v14 }
 0xa21   :  { %v5884_v38 = vpop.eup %5883  ;;  %5388 = vmatprep.mubr.msk.bf16.mxu1 %vm5955_vm5, %v5954_v53  ;;  %5392 = vmatprep.subr.bf16.mxu0 %v5954_v53 }
 0xa22   :  { %v2092_v58 = vmul.f32 %v5884_v38, %v7021_v26  ;;  %5398 = vmatprep.subr.bf16.mxu1 %v5954_v53 }
 0xa24   :  { %v2100_v31 = vpack.c.bf16 %v2092_v58, %v2092_v58 }
 0xa26   :  { %5383 = vmatmul.mubr.msk.bf16.vlgmr.msra.gmra.mrb[76].mxu0 %vm2103_vm12, %v2100_v31 }
 0xa27   :  { %5394 = vmatprep.mubr.msk.bf16.mxu0 %vm5955_vm5, %v5954_v53  ;;  %5393 = vmatpush3.bf16.msra.mxu0 %v2545_v24 }
 0xa28   :  { %5404 = vmatprep.subr.bf16.mxu0 %v5954_v53 }
 0xa51   :  { %v2144_v17 = vpop.f32.mrb[64].mxu1 }
 0xa52   :  { %v2486_v18 = vpack.c.bf16 %v2144_v17, %v2144_v17  ;;  %v5342_v30 = vpop.f32.mrb[65].mxu1 }
 0xa53   :  { %v2147_v60 = vpop.f32.mrb[66].mxu1 }
 0xa54   :  { %v5343_v61 = vpop.f32.mrb[67].mxu1  ;;  %5389 = vmatmul.mubr.msk.bf16.vlgmr.msra.gmra.mrb[80].mxu1 %vm1613_vm10, %v2486_v18 }
 0xa55   :  { %5399 = vmatpush3.bf16.msra.mxu1 %v2591_v8  ;;  %5400 = vmatprep.mubr.msk.bf16.mxu1 %vm5955_vm5, %v5954_v53 }
 0xa56   :  { %5410 = vmatprep.subr.bf16.mxu1 %v5954_v53 }
 0xab4   :  { %v2192_v5 = vpop.f32.mrb[64].mxu0 }
 0xab5   :  { %v2487_v46 = vpack.c.bf16 %v2192_v5, %v2192_v5  ;;  %v2240_v41 = vpop.f32.mrb[68].mxu1  ;;  %v5348_v10 = vpop.f32.mrb[65].mxu0 }
 0xab6   :  { %v2488_v26 = vpack.c.bf16 %v2240_v41, %v2240_v41  ;;  %v5354_v45 = vpop.f32.mrb[69].mxu1  ;;  %v2195_v4 = vpop.f32.mrb[66].mxu0 }
 0xab7   :  { %v2243_v47 = vpop.f32.mrb[70].mxu1  ;;  %v5349_v59 = vpop.f32.mrb[67].mxu0  ;;  %5395 = vmatmul.mubr.msk.bf16.vlgmr.msra.gmra.mrb[80].mxu0 %vm1613_vm10, %v2487_v46 }
 0xab8   :  { %v5355_v16 = vpop.f32.mrb[71].mxu1  ;;  %5401 = vmatmul.mubr.msk.bf16.vlgmr.msra.gmra.mrb[84].mxu1 %vm1613_vm10, %v2488_v26  ;;  %5405 = vmatpush3.bf16.msra.mxu0 %v2637_v29 }
 0xab9   :  { %5406 = vmatprep.mubr.msk.bf16.mxu0 %vm5955_vm5, %v5954_v53  ;;  %5411 = vmatpush3.bf16.msra.mxu1 %v2683_v49 }
 0xaba   :  { %5412 = vmatprep.mubr.msk.bf16.mxu1 %vm5955_vm5, %v5954_v53  ;;  %5416 = vmatprep.subr.bf16.mxu0 %v5954_v53 }
 0xabb   :  { %5422 = vmatprep.subr.bf16.mxu1 %v5954_v53 }
 0xabc   :  { %v2288_v6 = vpop.f32.mrb[68].mxu0 }
 0xabd   :  { %v2489_v52 = vpack.c.bf16 %v2288_v6, %v2288_v6  ;;  %v5360_v55 = vpop.f32.mrb[69].mxu0 }
 0xabe   :  { %v2291_v22 = vpop.f32.mrb[70].mxu0 }
 0xabf   :  { %v5361_v7 = vpop.f32.mrb[71].mxu0  ;;  %5407 = vmatmul.mubr.msk.bf16.vlgmr.msra.gmra.mrb[84].mxu0 %vm1613_vm10, %v2489_v52 }
 0xac0   :  { %v2336_v40 = vpop.f32.mrb[72].mxu1  ;;  %5417 = vmatpush3.bf16.msra.mxu0 %v2729_v28  ;;  %5418 = vmatprep.mubr.msk.bf16.mxu0 %vm5955_vm5, %v5954_v53 }
 0xac1   :  { %v2490_v1 = vpack.c.bf16 %v2336_v40, %v2336_v40  ;;  %v5366_v32 = vpop.f32.mrb[73].mxu1  ;;  %5428 = vmatprep.subr.bf16.mxu0 %v5954_v53 }
 0xac2   :  { %v2339_v9 = vpop.f32.mrb[74].mxu1 }
 0xac3   :  { %v5367_v34 = vpop.f32.mrb[75].mxu1  ;;  %5413 = vmatmul.mubr.msk.bf16.vlgmr.msra.gmra.mrb[88].mxu1 %vm1613_vm10, %v2490_v1 }
 0xac4   :  { %5423 = vmatpush3.bf16.msra.mxu1 %v2775_v51  ;;  %5424 = vmatprep.mubr.msk.bf16.mxu1 %vm5955_vm5, %v5954_v53 }
 0xac5   :  { %5434 = vmatprep.subr.bf16.mxu1 %v5954_v53 }
 0xaf1   :  { %v2384_v57 = vpop.f32.mrb[72].mxu0 }
 0xaf2   :  { %v2491_v2 = vpack.c.bf16 %v2384_v57, %v2384_v57  ;;  %v5372_v44 = vpop.f32.mrb[73].mxu0  ;;  %v2432_v62 = vpop.f32.mrb[76].mxu1 }
 0xaf3   :  { %v2492_v19 = vpack.c.bf16 %v2432_v62, %v2432_v62  ;;  %v2387_v63 = vpop.f32.mrb[74].mxu0  ;;  %v5378_v50 = vpop.f32.mrb[77].mxu1 }
 0xaf4   :  { %v5373_v56 = vpop.f32.mrb[75].mxu0  ;;  %v2435_v11 = vpop.f32.mrb[78].mxu1  ;;  %5419 = vmatmul.mubr.msk.bf16.vlgmr.msra.gmra.mrb[88].mxu0 %vm1613_vm10, %v2491_v2 }
 0xaf5   :  { %v5379_v39 = vpop.f32.mrb[79].mxu1  ;;  %5425 = vmatmul.mubr.msk.bf16.vlgmr.msra.gmra.mrb[92].mxu1 %vm1613_vm10, %v2492_v19  ;;  %5429 = vmatpush3.bf16.msra.mxu0 %v2821_v37  ;;  %v2885_v2 = vpop.permute.xlu0 %2884 }
 0xaf6   :  { %5430 = vmatprep.mubr.msk.bf16.mxu0 %vm5955_vm5, %v5954_v53  ;;  %5442 = vmatprep.mubr.msk.bf16.mxu1 %vm5955_vm5, %v5954_v53 }
 0xaf7   :  { %5446 = vmatprep.subr.bf16.mxu0 %v5954_v53 }
 0xaf9   :  { %v2480_v23 = vpop.f32.mrb[76].mxu0 }
 0xafa   :  { %v2493_v48 = vpack.c.bf16 %v2480_v23, %v2480_v23  ;;  %v5384_v27 = vpop.f32.mrb[77].mxu0 }
 0xafb   :  { %v2483_v21 = vpop.f32.mrb[78].mxu0  ;;  %v5717_v27 = vld [vmem:[%s7644_s7] ss:$12 sps:$4 sm:$0xff]  }
 0xafc   :  { %v5385_v14 = vpop.f32.mrb[79].mxu0  ;;  %5431 = vmatmul.mubr.msk.bf16.vlgmr.msra.gmra.mrb[92].mxu0 %vm1613_vm10, %v2493_v48  ;;  %v4961_v21 = vld [vmem:[%s7647_s10 + $0x2] ss:$0 sm:$0xff]  ;;  %5435 = vmatpush3.bf16.msra.mxu1 %v5717_v27  ;;  %v4978_v27 = vld [vmem:[%s7647_s10 + $0x6] sm:$0x3] }
 0xafd   :  { %5462 = vmatprep.mubr.msk.bf16.mxu0 %vm5955_vm5, %v5954_v53  ;;  %5436 = vmatprep.subr.bf16.mxu1 %v5954_v53  ;;  %v5719_v14 = vld [vmem:[%s7644_s7 + $0x30] ss:$12 sps:$4 sm:$0xff]  }
 0xb27   :  { %v2535_v35 = vpop.f32.mrb[80].mxu1 }
 0xb28   :  { %v5390_v38 = vpop.f32.mrb[81].mxu1  ;;  %v2864_v24 = vsel %vm2863_vm14, %v2535_v35, 0.0  ;;  %v5720_v35 = vld [vmem:[%s7644_s7 + $0x48] ss:$12 sps:$4 sm:$0xff]  }
 0xb29   :  { %v2538_v58 = vpop.f32.mrb[82].mxu1  ;;  %v5721_v38 = vld [vmem:[%s7646_s9] sm:$0xff]  }
 0xb2a   :  { %v5391_v31 = vpop.f32.mrb[83].mxu1  ;;  %5447 = vmatpush3.bf16.msra.mxu0 %v5721_v38  ;;  %v5722_v58 = vld [vmem:[%s7646_s9 + $0x8] sm:$0xff]  }
 0xb2b   :  { %5448 = vmatprep.subr.bf16.mxu0 %v5954_v53  ;;  %v5723_v31 = vld [vmem:[%s7646_s9 + $0x10] sm:$0xff]  }
 0xb2e   :  { %5449 = vmatpush3.bf16.msra.mxu0 %v5722_v58 }
 0xb2f   :  { %5450 = vmatprep.subr.bf16.mxu0 %v5954_v53 }
 0xb32   :  { %5451 = vmatpush3.bf16.msra.mxu0 %v5723_v31  ;;  %v3168_v31 = vrot.slane %v4978_v27, %v6157_v0 }
 0xb33   :  { %5452 = vmatprep.subr.bf16.mxu0 %v5954_v53 }
 0xb8a   :  { %v2581_v43 = vpop.f32.mrb[80].mxu0 }
 0xb8b   :  { %v2865_v12 = vsel %vm2863_vm14, %v2581_v43, 0.0  ;;  %v2627_v17 = vpop.f32.mrb[84].mxu1  ;;  %v5396_v18 = vpop.f32.mrb[81].mxu0  ;;  %v5724_v43 = vld [vmem:[%s7646_s9 + $0x18] sm:$0xff]  }
 0xb8c   :  { %v2866_v30 = vadd.f32 %v2865_v12, %v2864_v24  ;;  %v5402_v8 = vpop.f32.mrb[85].mxu1  ;;  %v2584_v60 = vpop.f32.mrb[82].mxu0  ;;  %v2867_v61 = vsel %vm2863_vm14, %v2627_v17, 0.0  ;;  %5453 = vmatpush3.bf16.msra.mxu0 %v5724_v43  ;;  %v5725_v24 = vld [vmem:[%s7646_s9 + $0x20] sm:$0xff]   ;;  %v5726_v12 = vld [vmem:[%s7646_s9 + $0x28] sm:$0xff]  }
 0xb8d   :  { %v2630_v15 = vpop.f32.mrb[86].mxu1  ;;  %v5397_v54 = vpop.f32.mrb[83].mxu0  ;;  %5454 = vmatprep.subr.bf16.mxu0 %v5954_v53 }
 0xb8e   :  { %v2868_v33 = vadd.f32 %v2867_v61, %v2866_v30  ;;  %v5403_v5 = vpop.f32.mrb[87].mxu1 }
 0xb8f   :  { %v5727_v5 = vld [vmem:[%s7646_s9 + $0x30] sm:$0xff]  }
 0xb90   :  { %5455 = vmatpush3.bf16.msra.mxu0 %v5725_v24 }
 0xb91   :  { %5456 = vmatprep.subr.bf16.mxu0 %v5954_v53 }
 0xb92   :  { %v2673_v46 = vpop.f32.mrb[84].mxu0 }
 0xb93   :  { %v2869_v41 = vsel %vm2863_vm14, %v2673_v46, 0.0  ;;  %v5408_v10 = vpop.f32.mrb[85].mxu0  ;;  %v5728_v46 = vld [vmem:[%s7646_s9 + $0x38] sm:$0xff]  }
 0xb94   :  { %v2870_v29 = vadd.f32 %v2869_v41, %v2868_v33  ;;  %v2676_v26 = vpop.f32.mrb[86].mxu0  ;;  %5457 = vmatpush3.bf16.msra.mxu0 %v5726_v12  ;;  %v4962_v41 = vld [vmem:[%s7647_s10 + $0x3] ss:$0 sm:$0xff] }
 0xb95   :  { %v5409_v45 = vpop.f32.mrb[87].mxu0  ;;  %5458 = vmatprep.subr.bf16.mxu0 %v5954_v53 }
 0xb96   :  { %v2719_v4 = vpop.f32.mrb[88].mxu1 }
 0xb97   :  { %v2871_v49 = vsel %vm2863_vm14, %v2719_v4, 0.0  ;;  %v5414_v47 = vpop.f32.mrb[89].mxu1 }
 0xb98   :  { %v2872_v59 = vadd.f32 %v2871_v49, %v2870_v29  ;;  %v2722_v16 = vpop.f32.mrb[90].mxu1  ;;  %5459 = vmatpush3.bf16.msra.mxu0 %v5727_v5  ;;  %v4968_v47 = vld [vmem:[%s7647_s10 + $0x4] ss:$0 sm:$0xff] }
 0xb99   :  { %v5415_v36 = vpop.f32.mrb[91].mxu1  ;;  %5460 = vmatprep.subr.bf16.mxu0 %v5954_v53 }
 0xb9c   :  { %5461 = vmatpush3.bf16.msra.mxu0 %v5728_v46 }
 0xb9d   :  { %5472 = vmatprep.subr.bf16.mxu0 %v5954_v53 }
 0xbc7   :  { %v2765_v6 = vpop.f32.mrb[88].mxu0 }
 0xbc8   :  { %v2873_v52 = vsel %vm2863_vm14, %v2765_v6, 0.0  ;;  %v5420_v55 = vpop.f32.mrb[89].mxu0  ;;  %v2811_v28 = vpop.f32.mrb[92].mxu1 }
 0xbc9   :  { %v2874_v22 = vadd.f32 %v2873_v52, %v2872_v59  ;;  %v2875_v42 = vsel %vm2863_vm14, %v2811_v28, 0.0  ;;  %v2768_v7 = vpop.f32.mrb[90].mxu0  ;;  %v5426_v40 = vpop.f32.mrb[93].mxu1 }
 0xbca   :  { %v5421_v1 = vpop.f32.mrb[91].mxu0  ;;  %v2814_v32 = vpop.f32.mrb[94].mxu1 }
 0xbcb   :  { %v2876_v51 = vadd.f32 %v2875_v42, %v2874_v22  ;;  %v5427_v9 = vpop.f32.mrb[95].mxu1  ;;  %v5729_v32 = vld [vmem:[%s7644_s7 + $0x64] ss:$12 sps:$4 sm:$0xff]  }
 0xbcc   :  { %v5734_v9 = vld [vmem:[%s7644_s7 + $0x80] ss:$12 sps:$4 sm:$0xff]  }
 0xbcf   :  { %v2857_v34 = vpop.f32.mrb[92].mxu0 }
 0xbd0   :  { %v2877_v20 = vsel %vm2863_vm14, %v2857_v34, 0.0  ;;  %v5432_v57 = vpop.f32.mrb[93].mxu0  ;;  %v5732_v34 = vld [vmem:[%s7644_s7 + $0x7c] ss:$12 sps:$4 sm:$0xff]  }
 0xbd1   :  { %v2878_v44 = vadd.f32 %v2877_v20, %v2876_v51  ;;  %v2860_v62 = vpop.f32.mrb[94].mxu0  ;;  %v5731_v51 = vld [vmem:[%s7644_s7 + $0x68] ss:$12 sps:$4 sm:$0xff]   ;;  %v5737_v20 = vld [vmem:[%s7644_s7 + $0x98] ss:$12 sps:$4 sm:$0xff]  }
 0xbd2   :  { %v5433_v37 = vpop.f32.mrb[95].mxu0  ;;  %v5735_v57 = vld [vmem:[%s7644_s7 + $0x94] ss:$12 sps:$4 sm:$0xff]  }
 0xbd3   :  { %v2887_v19 = vadd.f32 %v2885_v2, %v2878_v44  ;;  %v5738_v2 = vld [vmem:[%s7644_s7 + $0xac] ss:$12 sps:$4 sm:$0xff]   ;;  %v5740_v44 = vld [vmem:[%s7644_s7 + $0xb0] ss:$12 sps:$4 sm:$0xff]  }
 0xbd5   :  { %v2888_v63 = vadd.f32 %v2887_v19, %v6853_v25  ;;  %v5718_v25 = vld [vmem:[%s7644_s7 + $0x18] ss:$12 sps:$4 sm:$0xff]  }
 0xbd6   :  { %5437 = vmatpush3.bf16.msra.mxu1 %v5718_v25 }
 0xbd7   :  { %v2889_v50 = vsel %vm2863_vm14, %v2888_v63, 0.0  ;;  %5438 = vmatprep.subr.bf16.mxu1 %v5954_v53 }
 0xbd8   :  { %2890 = vadd.xlane.f32.xlu1 %v2889_v50 }
 0xbda   :  { %5439 = vmatpush3.bf16.msra.mxu1 %v5719_v14 }
 0xbdb   :  { %5440 = vmatprep.subr.bf16.mxu1 %v5954_v53 }
 0xbde   :  { %5441 = vmatpush3.bf16.msra.mxu1 %v5720_v35 }
 0xbdf   :  { %3214 = vmatprep.subr.bf16.mxu1 %v5731_v51 }
 0xc65   :  { %v2891_v56 = vpop.xlane.xlu1 %2890 }
 0xc66   :  { %v2893_v11 = vmul.f32 0.015625, %v2891_v56 }
 0xc68   :  { %v2894_v39 = vsub.f32 %v2888_v63, %v2893_v11  ;;  %v4977_v11 = vld [vmem:[%s7647_s10 + $0x5] ss:$0 sm:$0xff] }
 0xc6a   :  { %v2895_v23 = vmul.f32 %v2894_v39, %v2894_v39 }
 0xc6c   :  { %v2896_v48 = vsel %vm2863_vm14, %v2895_v23, 0.0 }
 0xc6d   :  { %2897 = vadd.xlane.f32.xlu0 %v2896_v48 }
 0xc83   :  { %2910 = vrot.lane.b32.xlu0 %v4961_v21, %s5964_s22 }
 0xcfa   :  { %v2898_v17 = vpop.xlane.xlu0 %2897 }
 0xcfb   :  { %v2899_v18 = vmul.f32 0.015625, %v2898_v17 }
 0xcfd   :  { %v2900_v30 = vadd.f32 1e-05, %v2899_v18 }
 0xcfe   :  { %v2911_v61 = vpop.permute.xlu0 %2910 }
 0xcff   :  { %5885 = vrsqrt.f32 %v2900_v30 }
 0xd09   :  { %v5886_v8 = vpop.eup %5885 }
 0xd0a   :  { %v2902_v60 = vmul.f32 %v5886_v8, %v2894_v39 }
 0xd0c   :  { %v2909_v15 = vmul.f32 %v4961_v21, %v2902_v60  ;;  %v3164_v21 = vrot.slane %v4978_v27, %v6163_v3 }
 0xd0e   :  { %v2913_v54 = vadd.f32 %v2911_v61, %v2909_v15 }
 0xd10   :  { %v2914_v33 = vpack.c.bf16 %v2913_v54, %v2913_v54 }
 0xd12   :  { %5443 = vmatmul.mubr.msk.bf16.vlgmr.msra.gmra.mrb[96].mxu1 %vm1139_vm4, %v2914_v33 }
 0xd13   :  { %3246 = vmatprep.mubr.bf16.mxu1 %v5951_v13  ;;  %3215 = vmatpush1.bf16.msra.mxu1 %v5729_v32 }
 0xd14   :  { %3216 = vmatprep.subr.bf16.mxu1 %v5734_v9 }
 0xd17   :  { %3217 = vmatpush1.bf16.msra.mxu1 %v5732_v34 }
 0xd18   :  { %3218 = vmatprep.subr.bf16.mxu1 %v5737_v20 }
 0xd1b   :  { %3219 = vmatpush1.bf16.msra.mxu1 %v5735_v57 }
 0xd1c   :  { %3220 = vmatprep.subr.bf16.mxu1 %v5740_v44 }
 0xd1f   :  { %3221 = vmatpush1.bf16.msra.mxu1 %v5738_v2 }
 0xd20   :  { %5466 = vmatprep.subr.bf16.mxu1 %v5954_v53 }
 0xde5   :  { %v2982_v10 = vpop.f32.mrb[96].mxu1 }
 0xde6   :  { %v2983_v13 = vadd.f32 %v4962_v41, %v2982_v10  ;;  %v5444_v29 = vpop.f32.mrb[97].mxu1 }
 0xde7   :  { %v2985_v26 = vpop.f32.mrb[98].mxu1 }
 0xde8   :  { %v2988_v45 = vmax.f32 %v2983_v13, 0.0  ;;  %v5445_v4 = vpop.f32.mrb[99].mxu1 }
 0xdea   :  { %v2989_v49 = vpack.c.bf16 %v2988_v45, %v2988_v45 }
 0xdec   :  { %5463 = vmatmul.mubr.bf16.vlgmr.msra.gmra.mrb[96].mxu0 %v2989_v49 }
 0xded   :  { %5474 = vmatprep.mubr.msk.bf16.mxu0 %vm5955_vm5, %v5954_v53 }
 0xebf   :  { %v3078_v59 = vpop.f32.mrb[96].mxu0 }
 0xec0   :  { %v3079_v16 = vadd.f32 %v4968_v47, %v3078_v59  ;;  %v5464_v36 = vpop.f32.mrb[97].mxu0 }
 0xec1   :  { %v3081_v6 = vpop.f32.mrb[98].mxu0 }
 0xec2   :  { %v5465_v52 = vpop.f32.mrb[99].mxu0  ;;  %v3084_v55 = vadd.f32 %v3079_v16, %v2913_v54 }
 0xec4   :  { %v3085_v28 = vsel %vm2863_vm14, %v3084_v55, 0.0 }
 0xec5   :  { %3086 = vadd.xlane.f32.xlu1 %v3085_v28 }
 0xf52   :  { %v3087_v22 = vpop.xlane.xlu1 %3086 }
 0xf53   :  { %v3088_v42 = vmul.f32 0.015625, %v3087_v22 }
 0xf55   :  { %v3089_v7 = vsub.f32 %v3084_v55, %v3088_v42 }
 0xf57   :  { %v3090_v40 = vmul.f32 %v3089_v7, %v3089_v7 }
 0xf59   :  { %v3091_v1 = vsel %vm2863_vm14, %v3090_v40, 0.0 }
 0xf5a   :  { %3092 = vadd.xlane.f32.xlu1 %v3091_v1 }
 0xf6b   :  { %3098 = vrot.lane.b32.xlu1 %v4968_v47, %s5964_s22 }
 0xfe7   :  { %v3093_v62 = vpop.xlane.xlu1 %3092 }
 0xfe8   :  { %v3094_v37 = vmul.f32 0.015625, %v3093_v62 }
 0xfea   :  { %v3095_v19 = vadd.f32 1e-05, %v3094_v37 }
 0xfeb   :  { %v3099_v50 = vpop.permute.xlu1 %3098 }
 0xfec   :  { %5887 = vrsqrt.f32 %v3095_v19 }
 0xff6   :  { %v5888_v63 = vpop.eup %5887 }
 0xff7   :  { %v3097_v56 = vmul.f32 %v5888_v63, %v3089_v7 }
 0xff9   :  { %v3101_v39 = vmul.f32 %v3099_v50, %v3097_v56 }
 0xffb   :  { %v7238_v23 = vadd.f32 %v4977_v11, %v3101_v39 }
 0xffd   :  { %v3159_v48 = vpack.c.bf16 %v7238_v23, %v7238_v23 }
 0xfff   :  { %5032 = vmatmul.mubr.msk.bf16.vlgmr.msra.gmra.mrb[100].mxu1 %vm1139_vm4, %v3159_v48 }
0x1000   :  { %5468 = vmatprep.mubr.msk.bf16.mxu1 %vm5955_vm5, %v5954_v53 }
0x10d2   :  { %v3248_v25 = vpop.f32.mrb[100].mxu1 }
0x10d3   :  { %v3249_v14 = vadd.f32 %v3248_v25, %v3164_v21  ;;  %v3250_v35 = vpop.f32.mrb[101].mxu1 }
0x10d4   :  { %v3252_v38 = vpop.f32.mrb[102].mxu1  ;;  %v3251_v24 = vadd.f32 %v3250_v35, %v3168_v31 }
0x10d5   :  { %v7249_v58 = vpack.c.bf16 %v3249_v14, %v3249_v14  ;;  %v3253_v43 = vpop.f32.mrb[103].mxu1 }
0x10d6   :  { %v3256_v12 = vpack.c.bf16 %v3251_v24, %v3251_v24 }
0x10d7   :  { %3262 = vrot.lane.b32.xlu1 %v7249_v58, %s5960_s29  ;;  %3258 = vrot.lane.b32.xlu0 %v7249_v58, %s5959_s28 }
0x10db   :  { %3267 = vrot.lane.b32.xlu1 %v7249_v58, %s5961_s13  ;;  %3260 = vrot.lane.b32.xlu0 %v7249_v58, %s5949_s17 }
0x10df   :  { %3272 = vrot.lane.b32.xlu1 %v3256_v12, %s5952_s30  ;;  %3264 = vrot.lane.b32.xlu0 %v7249_v58, %s5950_s20 }
0x10e3   :  { %3276 = vrot.lane.b32.xlu1 %v7249_v58, %s5963_s1  ;;  %3269 = vrot.lane.b32.xlu0 %v3256_v12, %s5961_s13 }
0x10e7   :  { %3274 = vrot.lane.b32.xlu0 %v3256_v12, %s5962_s14 }
0x1149   :  { %v7267_v17 = vpop.permute.xlu1 %3262  ;;  %v7269_v18 = vpop.permute.xlu0 %3258 }
0x114a   :  { %3324 = vrot.lane.b32.xlu0 %v7269_v18, %s5963_s1 }
0x114d   :  { %v3268_v30 = vpop.permute.xlu1 %3267  ;;  %v7273_v8 = vpop.permute.xlu0 %3260 }
0x114e   :  { %3420 = vrot.lane.b32.xlu0 %v7267_v17, %s5963_s1  ;;  %3372 = vrot.lane.b32.xlu1 %v7273_v8, %s5963_s1 }
0x1151   :  { %v7279_v60 = vpop.permute.xlu1 %3272  ;;  %v7281_v61 = vpop.permute.xlu0 %3264 }
0x1152   :  { %3468 = vrot.lane.b32.xlu1 %v7281_v61, %s5963_s1 }
0x1155   :  { %v3277_v15 = vpop.permute.xlu1 %3276  ;;  %v3270_v54 = vpop.permute.xlu0 %3269 }
0x1156   :  { %v3282_v33 = vsel %vm1613_vm10, %v3277_v15, 0  ;;  %v7287_v5 = vsel %vm1613_vm10, %v3268_v30, %v3270_v54  ;;  %3564 = vrot.lane.b32.xlu1 %v7279_v60, %s5963_s1 }
0x1157   :  { %5467 = vmatpush3.bf16.xpose.msra.mxu1 %v3282_v33  ;;  %3516 = vrot.lane.b32.xlu0 %v7287_v5, %s5963_s1 }
0x1158   :  { %5478 = vmatprep.subr.bf16.mxu1 %v5954_v53 }
0x1159   :  { %v7294_v46 = vpop.permute.xlu0 %3274 }
0x115b   :  { %3612 = vrot.lane.b32.xlu0 %v7294_v46, %s5963_s1 }
0x115e   :  { %5469 = vmatmul.mubr.msk.bf16.vlgmr.msra.gmra.mrb[104].mxu1 %vm1613_vm10, %v7249_v58 }
0x115f   :  { %5480 = vmatprep.mubr.msk.bf16.mxu1 %vm5955_vm5, %v5954_v53 }
0x11bc   :  { %v3325_v41 = vpop.permute.xlu0 %3324 }
0x11bd   :  { %v3330_v10 = vsel %vm1613_vm10, %v3325_v41, 0 }
0x11be   :  { %5473 = vmatpush3.bf16.xpose.msra.mxu0 %v3330_v10 }
0x11bf   :  { %5484 = vmatprep.subr.bf16.mxu0 %v5954_v53 }
0x11c0   :  { %v3373_v13 = vpop.permute.xlu1 %3372  ;;  %v3421_v26 = vpop.permute.xlu0 %3420 }
0x11c1   :  { %v3378_v29 = vsel %vm1613_vm10, %v3373_v13, 0  ;;  %v3426_v45 = vsel %vm1613_vm10, %v3421_v26, 0 }
0x11c2   :  { %5479 = vmatpush3.bf16.xpose.msra.mxu1 %v3378_v29 }
0x11c3   :  { %5490 = vmatprep.subr.bf16.mxu1 %v5954_v53 }
0x11c4   :  { %v3469_v4 = vpop.permute.xlu1 %3468 }
0x11c5   :  { %5475 = vmatmul.mubr.msk.bf16.vlgmr.msra.gmra.mrb[100].mxu0 %vm1613_vm10, %v7269_v18  ;;  %v3474_v49 = vsel %vm1613_vm10, %v3469_v4, 0 }
0x11c6   :  { %5485 = vmatpush3.bf16.xpose.msra.mxu0 %v3426_v45  ;;  %5486 = vmatprep.mubr.msk.bf16.mxu0 %vm5955_vm5, %v5954_v53 }
0x11c7   :  { %5496 = vmatprep.subr.bf16.mxu0 %v5954_v53 }
0x11c8   :  { %v3565_v16 = vpop.permute.xlu1 %3564 }
0x11c9   :  { %5481 = vmatmul.mubr.msk.bf16.vlgmr.msra.gmra.mrb[108].mxu1 %vm1613_vm10, %v7273_v8  ;;  %v3517_v47 = vpop.permute.xlu0 %3516  ;;  %v3570_v36 = vsel %vm1613_vm10, %v3565_v16, 0 }
0x11ca   :  { %5491 = vmatpush3.bf16.xpose.msra.mxu1 %v3474_v49  ;;  %5492 = vmatprep.mubr.msk.bf16.mxu1 %vm5955_vm5, %v5954_v53  ;;  %v3522_v59 = vsel %vm1613_vm10, %v3517_v47, 0 }
0x11cb   :  { %5502 = vmatprep.subr.bf16.mxu1 %v5954_v53 }
0x11cd   :  { %5487 = vmatmul.mubr.msk.bf16.vlgmr.msra.gmra.mrb[104].mxu0 %vm1613_vm10, %v7267_v17  ;;  %v3613_v6 = vpop.permute.xlu0 %3612 }
0x11ce   :  { %5497 = vmatpush3.bf16.xpose.msra.mxu0 %v3522_v59  ;;  %5498 = vmatprep.mubr.msk.bf16.mxu0 %vm5955_vm5, %v5954_v53  ;;  %v3618_v52 = vsel %vm1613_vm10, %v3613_v6, 0 }
0x11cf   :  { %5508 = vmatprep.subr.bf16.mxu0 %v5954_v53 }
0x11d1   :  { %5493 = vmatmul.mubr.msk.bf16.vlgmr.msra.gmra.mrb[112].mxu1 %vm1613_vm10, %v7281_v61 }
0x11d2   :  { %5503 = vmatpush3.bf16.xpose.msra.mxu1 %v3570_v36  ;;  %5504 = vmatprep.mubr.msk.bf16.mxu1 %vm5955_vm5, %v5954_v53 }
0x11d3   :  { %5514 = vmatprep.subr.bf16.mxu1 %v5954_v53 }
0x11d5   :  { %5499 = vmatmul.mubr.msk.bf16.vlgmr.msra.gmra.mrb[108].mxu0 %vm1613_vm10, %v7287_v5 }
0x11d6   :  { %5509 = vmatpush3.bf16.xpose.msra.mxu0 %v3618_v52  ;;  %5510 = vmatprep.mubr.msk.bf16.mxu0 %vm5955_vm5, %v5954_v53 }
0x11d7   :  { %5520 = vmatprep.subr.bf16.mxu0 %v5954_v53 }
0x11d9   :  { %5505 = vmatmul.mubr.msk.bf16.vlgmr.msra.gmra.mrb[116].mxu1 %vm1613_vm10, %v7279_v60 }
0x11da   :  { %5516 = vmatprep.mubr.msk.bf16.mxu1 %vm5955_vm5, %v5954_v53 }
0x11dd   :  { %5511 = vmatmul.mubr.msk.bf16.vlgmr.msra.gmra.mrb[112].mxu0 %vm1613_vm10, %v7294_v46 }
0x11de   :  { %5522 = vmatprep.mubr.msk.bf16.mxu0 %vm5955_vm5, %v5954_v53 }
0x1231   :  { %v3318_v55 = vpop.f32.mrb[104].mxu1 }
0x1232   :  { %v5470_v28 = vpop.f32.mrb[105].mxu1  ;;  %v3660_v22 = vsel %vm2004_vm11, %v3318_v55, -inf }
0x1233   :  { %v3321_v42 = vpop.f32.mrb[106].mxu1  ;;  %3661 = vmax.xlane.f32.xlu1 %v3660_v22 }
0x1234   :  { %v5471_v7 = vpop.f32.mrb[107].mxu1 }
0x1298   :  { %v3366_v40 = vpop.f32.mrb[100].mxu0 }
0x1299   :  { %v5476_v1 = vpop.f32.mrb[101].mxu0  ;;  %v3663_v32 = vsel %vm2004_vm11, %v3366_v40, -inf }
0x129a   :  { %3664 = vmax.xlane.f32.xlu0 %v3663_v32  ;;  %v3369_v51 = vpop.f32.mrb[102].mxu0 }
0x129b   :  { %v5477_v9 = vpop.f32.mrb[103].mxu0 }
0x129c   :  { %v3414_v34 = vpop.f32.mrb[108].mxu1 }
0x129d   :  { %v5482_v20 = vpop.f32.mrb[109].mxu1  ;;  %v3666_v57 = vsel %vm2004_vm11, %v3414_v34, -inf }
0x129e   :  { %v3417_v2 = vpop.f32.mrb[110].mxu1  ;;  %3667 = vmax.xlane.f32.xlu0 %v3666_v57 }
0x129f   :  { %v5483_v44 = vpop.f32.mrb[111].mxu1 }
0x12a0   :  { %v7347_v62 = vpop.f32.mrb[104].mxu0 }
0x12a1   :  { %v5488_v37 = vpop.f32.mrb[105].mxu0  ;;  %v3669_v19 = vsel %vm2004_vm11, %v7347_v62, -inf }
0x12a2   :  { %3670 = vmax.xlane.f32.xlu0 %v3669_v19  ;;  %v3465_v63 = vpop.f32.mrb[106].mxu0 }
0x12a3   :  { %v5489_v50 = vpop.f32.mrb[107].mxu0 }
0x12a4   :  { %v3510_v56 = vpop.f32.mrb[112].mxu1 }
0x12a5   :  { %v5494_v11 = vpop.f32.mrb[113].mxu1  ;;  %v3672_v39 = vsel %vm2004_vm11, %v3510_v56, -inf }
0x12a6   :  { %3673 = vmax.xlane.f32.xlu1 %v3672_v39  ;;  %v3513_v48 = vpop.f32.mrb[114].mxu1 }
0x12a7   :  { %v5495_v27 = vpop.f32.mrb[115].mxu1 }
0x12a8   :  { %v7352_v21 = vpop.f32.mrb[108].mxu0 }
0x12a9   :  { %v5500_v25 = vpop.f32.mrb[109].mxu0  ;;  %v3675_v14 = vsel %vm2004_vm11, %v7352_v21, -inf }
0x12aa   :  { %3676 = vmax.xlane.f32.xlu0 %v3675_v14  ;;  %v3561_v35 = vpop.f32.mrb[110].mxu0 }
0x12ab   :  { %v5501_v38 = vpop.f32.mrb[111].mxu0 }
0x12ac   :  { %v3606_v31 = vpop.f32.mrb[116].mxu1 }
0x12ad   :  { %v5506_v43 = vpop.f32.mrb[117].mxu1  ;;  %v3678_v24 = vsel %vm2004_vm11, %v3606_v31, -inf }
0x12ae   :  { %3679 = vmax.xlane.f32.xlu1 %v3678_v24  ;;  %v3609_v12 = vpop.f32.mrb[118].mxu1 }
0x12af   :  { %v5507_v30 = vpop.f32.mrb[119].mxu1 }
0x12b0   :  { %v3654_v15 = vpop.f32.mrb[112].mxu0 }
0x12b1   :  { %v5512_v54 = vpop.f32.mrb[113].mxu0  ;;  %v3681_v33 = vsel %vm2004_vm11, %v3654_v15, -inf }
0x12b2   :  { %3682 = vmax.xlane.f32.xlu0 %v3681_v33  ;;  %v3657_v41 = vpop.f32.mrb[114].mxu0 }
0x12b3   :  { %v5513_v10 = vpop.f32.mrb[115].mxu0 }
0x12bf   :  { %3804 = vrot.lane.b32.xlu1 %v7269_v18, %s5952_s30 }
0x12c0   :  { %v3662_v13 = vpop.xlane.xlu1 %3661 }
0x12c1   :  { %v3684_v29 = vsub.f32 %v3318_v55, %v3662_v13 }
0x12c3   :  { %3852 = vrot.lane.b32.xlu1 %v7273_v8, %s5952_s30  ;;  %v3692_v26 = vmul.f32 1.442695, %v3684_v29 }
0x12c5   :  { %5889 = vpow2.f32 %v3692_v26 }
0x12c8   :  { %3756 = vrot.lane.b32.xlu0 %v7249_v58, %s5952_s30 }
0x12cf   :  { %v7364_v45 = vpop.eup %5889 }
0x12d0   :  { %v3708_v4 = vsel %vm2004_vm11, %v7364_v45, 0.0 }
0x12e7   :  { %3709 = vadd.xlane.f32.xlu1 %v3708_v4 }
0x12f8   :  { %3948 = vrot.lane.b32.xlu1 %v7281_v61, %s5952_s30 }
0x1327   :  { %v3665_v18 = vpop.xlane.xlu0 %3664 }
0x1328   :  { %v3685_v49 = vsub.f32 %v3366_v40, %v3665_v18 }
0x132a   :  { %v3694_v47 = vmul.f32 1.442695, %v3685_v49 }
0x132b   :  { %v3668_v8 = vpop.xlane.xlu0 %3667 }
0x132c   :  { %5891 = vpow2.f32 %v3694_v47  ;;  %v3686_v59 = vsub.f32 %v3414_v34, %v3668_v8 }
0x132e   :  { %v3696_v58 = vmul.f32 1.442695, %v3686_v59 }
0x132f   :  { %v3671_v55 = vpop.xlane.xlu0 %3670 }
0x1330   :  { %5893 = vpow2.f32 %v3696_v58  ;;  %v3687_v11 = vsub.f32 %v7347_v62, %v3671_v55 }
0x1332   :  { %v3698_v39 = vmul.f32 1.442695, %v3687_v11 }
0x1333   :  { %v3674_v16 = vpop.xlane.xlu1 %3673 }
0x1334   :  { %v3688_v36 = vsub.f32 %v3510_v56, %v3674_v16  ;;  %v5016_v16 = vld [vmem:[%s7645_s8 + $0x20] sm:$0xf] }
0x1336   :  { %v7370_v6 = vpop.eup %5891  ;;  %v3700_v52 = vmul.f32 1.442695, %v3688_v36 }
0x1337   :  { %v3711_v28 = vsel %vm2004_vm11, %v7370_v6, 0.0  ;;  %v3677_v22 = vpop.xlane.xlu0 %3676 }
0x1338   :  { %5895 = vpow2.f32 %v3700_v52  ;;  %3712 = vadd.xlane.f32.xlu0 %v3711_v28  ;;  %v3689_v48 = vsub.f32 %v7352_v21, %v3677_v22  ;;  %v4152_v52 = vsel %vm2497_vm13, %v5016_v16, 0 }
0x133a   :  { %v7374_v61 = vpop.eup %5893  ;;  %v3702_v27 = vmul.f32 1.442695, %v3689_v48 }
0x133b   :  { %v3680_v42 = vpop.xlane.xlu1 %3679  ;;  %v3714_v7 = vsel %vm2004_vm11, %v7374_v61, 0.0 }
0x133c   :  { %v3690_v40 = vsub.f32 %v3606_v31, %v3680_v42  ;;  %3715 = vadd.xlane.f32.xlu1 %v3714_v7 }
0x133e   :  { %v3704_v1 = vmul.f32 1.442695, %v3690_v40 }
0x133f   :  { %v3805_v32 = vpop.permute.xlu1 %3804  ;;  %v3683_v51 = vpop.xlane.xlu0 %3682 }
0x1340   :  { %5897 = vpow2.f32 %v3704_v1  ;;  %v3810_v9 = vsel %vm1342_vm6, %v3805_v32, 0  ;;  %v3691_v34 = vsub.f32 %v3654_v15, %v3683_v51 }
0x1341   :  { %5521 = vmatpush3.bf16.msra.mxu0 %v3810_v9 }
0x1342   :  { %v7379_v20 = vpop.eup %5895  ;;  %v3706_v57 = vmul.f32 1.442695, %v3691_v34  ;;  %5532 = vmatprep.subr.bf16.mxu0 %v5954_v53 }
0x1343   :  { %v3757_v2 = vpop.permute.xlu0 %3756  ;;  %v3720_v44 = vsel %vm2004_vm11, %v7379_v20, 0.0  ;;  %v3853_v35 = vpop.permute.xlu1 %3852 }
0x1344   :  { %5899 = vpow2.f32 %v3706_v57  ;;  %v3762_v37 = vsel %vm1342_vm6, %v3757_v2, 0  ;;  %3721 = vadd.xlane.f32.xlu1 %v3720_v44  ;;  %v3858_v43 = vsel %vm1342_vm6, %v3853_v35, 0  ;;  %v5017_v44 = vld [vmem:[%s7645_s8 + $0x24] sm:$0xf] }
0x1345   :  { %5515 = vmatpush3.bf16.msra.mxu1 %v3762_v37  ;;  %5901 = vpow2.f32 %v3698_v39  ;;  %v4198_v37 = vsel %vm2497_vm13, %v5017_v44, 0 }
0x1346   :  { %5526 = vmatprep.subr.bf16.mxu1 %v5954_v53  ;;  %5903 = vpow2.f32 %v3702_v27  ;;  %v5019_v27 = vld [vmem:[%s7645_s8 + $0x2c] sm:$0xf] }
0x1347   :  { %v4290_v35 = vsel %vm2497_vm13, %v5019_v27, 0 }
0x134a   :  { %v7386_v19 = vpop.eup %5897 }
0x134b   :  { %v3726_v63 = vsel %vm2004_vm11, %v7386_v19, 0.0 }
0x134c   :  { %3727 = vadd.xlane.f32.xlu1 %v3726_v63 }
0x134e   :  { %v7390_v50 = vpop.eup %5899  ;;  %3900 = vrot.lane.b32.xlu0 %v7267_v17, %s5952_s30 }
0x134f   :  { %v3729_v56 = vsel %vm2004_vm11, %v7390_v50, 0.0  ;;  %v7400_v25 = vpop.eup %5901 }
0x1350   :  { %3730 = vadd.xlane.f32.xlu1 %v3729_v56  ;;  %v3717_v17 = vsel %vm2004_vm11, %v7400_v25, 0.0  ;;  %v7404_v14 = vpop.eup %5903 }
0x1351   :  { %v3723_v62 = vsel %vm2004_vm11, %v7404_v14, 0.0 }
0x1361   :  { %4044 = vrot.lane.b32.xlu1 %v7279_v60, %s5952_s30 }
0x136d   :  { %3718 = vadd.xlane.f32.xlu0 %v3717_v17 }
0x1371   :  { %3724 = vadd.xlane.f32.xlu0 %v3723_v62 }
0x1374   :  { %v3710_v21 = vpop.xlane.xlu1 %3709 }
0x1375   :  { %5905 = vrcp.f32 %v3710_v21  ;;  %v5020_v21 = vld [vmem:[%s7645_s8 + $0x30] sm:$0xf] }
0x1378   :  { %v3949_v24 = vpop.permute.xlu1 %3948 }
0x1379   :  { %v3954_v26 = vsel %vm1342_vm6, %v3949_v24, 0  ;;  %v4336_v24 = vsel %vm2497_vm13, %v5020_v21, 0 }
0x137f   :  { %v5906_v38 = vpop.eup %5905 }
0x1380   :  { %v3740_v31 = vmul.f32 %v5906_v38, %v7364_v45 }
0x1382   :  { %v3748_v60 = vpack.c.bf16 %v3740_v31, %v3740_v31 }
0x1384   :  { %5517 = vmatmul.mubr.msk.bf16.vlgmr.msra.gmra.mrb[120].mxu1 %vm2103_vm12, %v3748_v60 }
0x1385   :  { %5527 = vmatpush3.bf16.msra.mxu1 %v3858_v43  ;;  %5528 = vmatprep.mubr.msk.bf16.mxu1 %vm5955_vm5, %v5954_v53 }
0x1386   :  { %5538 = vmatprep.subr.bf16.mxu1 %v5954_v53 }
0x1387   :  { %3996 = vrot.lane.b32.xlu0 %v7287_v5, %s5952_s30 }
0x138b   :  { %4092 = vrot.lane.b32.xlu0 %v7294_v46, %s5952_s30 }
0x13c5   :  { %v3713_v12 = vpop.xlane.xlu0 %3712 }
0x13c6   :  { %5907 = vrcp.f32 %v3713_v12 }
0x13c9   :  { %v3716_v30 = vpop.xlane.xlu1 %3715  ;;  %v3901_v41 = vpop.permute.xlu0 %3900 }
0x13ca   :  { %5909 = vrcp.f32 %v3716_v30  ;;  %v3906_v5 = vsel %vm1342_vm6, %v3901_v41, 0 }
0x13d0   :  { %v5908_v15 = vpop.eup %5907 }
0x13d1   :  { %v3741_v54 = vmul.f32 %v5908_v15, %v7370_v6  ;;  %v3722_v33 = vpop.xlane.xlu1 %3721  ;;  %v5057_v15 = vld [vmem:[%s7647_s10 + $0x7] ss:$0 sm:$0xff] }
0x13d2   :  { %5911 = vrcp.f32 %v3722_v33  ;;  %4536 = vrot.lane.b32.xlu1 %v5057_v15, %s5964_s22 }
0x13d3   :  { %v3749_v10 = vpack.c.bf16 %v3741_v54, %v3741_v54  ;;  %v5022_v54 = vld [vmem:[%s7645_s8 + $0x38] sm:$0xf] }
0x13d4   :  { %v5910_v13 = vpop.eup %5909 }
0x13d5   :  { %v3742_v29 = vmul.f32 %v5910_v13, %v7374_v61  ;;  %5523 = vmatmul.mubr.msk.bf16.vlgmr.msra.gmra.mrb[116].mxu0 %vm2103_vm12, %v3749_v10  ;;  %v4428_v13 = vsel %vm2497_vm13, %v5022_v54, 0 }
0x13d6   :  { %5533 = vmatpush3.bf16.msra.mxu0 %v3906_v5  ;;  %5534 = vmatprep.mubr.msk.bf16.mxu0 %vm5955_vm5, %v5954_v53 }
0x13d7   :  { %v3750_v46 = vpack.c.bf16 %v3742_v29, %v3742_v29  ;;  %5544 = vmatprep.subr.bf16.mxu0 %v5954_v53 }
0x13d9   :  { %v3728_v45 = vpop.xlane.xlu1 %3727  ;;  %5529 = vmatmul.mubr.msk.bf16.vlgmr.msra.gmra.mrb[124].mxu1 %vm2103_vm12, %v3750_v46 }
0x13da   :  { %5913 = vrcp.f32 %v3728_v45  ;;  %5539 = vmatpush3.bf16.msra.mxu1 %v3954_v26  ;;  %5540 = vmatprep.mubr.msk.bf16.mxu1 %vm5955_vm5, %v5954_v53 }
0x13db   :  { %5550 = vmatprep.subr.bf16.mxu1 %v5954_v53 }
0x13dc   :  { %v5912_v4 = vpop.eup %5911 }
0x13dd   :  { %v3744_v18 = vmul.f32 %v5912_v4, %v7379_v20  ;;  %v3731_v49 = vpop.xlane.xlu1 %3730 }
0x13df   :  { %v3752_v47 = vpack.c.bf16 %v3744_v18, %v3744_v18 }
0x13e1   :  { %v4045_v8 = vpop.permute.xlu1 %4044  ;;  %5541 = vmatmul.mubr.msk.bf16.vlgmr.msra.gmra.mrb[128].mxu1 %vm2103_vm12, %v3752_v47 }
0x13e2   :  { %v4050_v59 = vsel %vm1342_vm6, %v4045_v8, 0  ;;  %5552 = vmatprep.mubr.msk.bf16.mxu1 %vm5955_vm5, %v5954_v53 }
0x13e3   :  { %5551 = vmatpush3.bf16.msra.mxu1 %v4050_v59 }
0x13e4   :  { %v5914_v58 = vpop.eup %5913  ;;  %5562 = vmatprep.subr.bf16.mxu1 %v5954_v53 }
0x13e5   :  { %v3746_v36 = vmul.f32 %v5914_v58, %v7386_v19  ;;  %v5018_v19 = vld [vmem:[%s7645_s8 + $0x28] sm:$0xf] }
0x13e6   :  { %v4244_v11 = vsel %vm2497_vm13, %v5018_v19, 0 }
0x13e7   :  { %v3754_v6 = vpack.c.bf16 %v3746_v36, %v3746_v36 }
0x13e9   :  { %5553 = vmatmul.mubr.msk.bf16.vlgmr.msra.gmra.mrb[132].mxu1 %vm2103_vm12, %v3754_v6  ;;  %v5023_v6 = vld [vmem:[%s7645_s8 + $0x3c] sm:$0xf] }
0x13ea   :  { %5563 = vmatpush3.bf16.msra.mxu1 %v4152_v52  ;;  %5564 = vmatprep.mubr.msk.bf16.mxu1 %vm5955_vm5, %v5954_v53 }
0x13eb   :  { %5574 = vmatprep.subr.bf16.mxu1 %v5954_v53 }
0x13fa   :  { %v3719_v55 = vpop.xlane.xlu0 %3718 }
0x13fb   :  { %5915 = vrcp.f32 %v3719_v55 }
0x13fe   :  { %v3725_v28 = vpop.xlane.xlu0 %3724 }
0x13ff   :  { %5917 = vrcp.f32 %v3725_v28 }
0x1400   :  { %5919 = vrcp.f32 %v3731_v49  ;;  %v5021_v49 = vld [vmem:[%s7645_s8 + $0x34] sm:$0xf] }
0x1401   :  { %v4382_v58 = vsel %vm2497_vm13, %v5021_v49, 0 }
0x1402   :  { %v3997_v42 = vpop.permute.xlu0 %3996 }
0x1403   :  { %v4002_v1 = vsel %vm1342_vm6, %v3997_v42, 0 }
0x1405   :  { %v5916_v61 = vpop.eup %5915 }
0x1406   :  { %v3743_v22 = vmul.f32 %v5916_v61, %v7400_v25  ;;  %v4093_v51 = vpop.permute.xlu0 %4092  ;;  %v4474_v61 = vsel %vm2497_vm13, %v5023_v6, 0 }
0x1407   :  { %v4098_v20 = vsel %vm1342_vm6, %v4093_v51, 0 }
0x1408   :  { %v3751_v7 = vpack.c.bf16 %v3743_v22, %v3743_v22 }
0x1409   :  { %v5918_v40 = vpop.eup %5917 }
0x140a   :  { %5535 = vmatmul.mubr.msk.bf16.vlgmr.msra.gmra.mrb[120].mxu0 %vm2103_vm12, %v3751_v7  ;;  %v3745_v32 = vmul.f32 %v5918_v40, %v7404_v14  ;;  %v5920_v34 = vpop.eup %5919 }
0x140b   :  { %5545 = vmatpush3.bf16.msra.mxu0 %v4002_v1  ;;  %5546 = vmatprep.mubr.msk.bf16.mxu0 %vm5955_vm5, %v5954_v53  ;;  %v3747_v57 = vmul.f32 %v5920_v34, %v7390_v50 }
0x140c   :  { %5556 = vmatprep.subr.bf16.mxu0 %v5954_v53  ;;  %v3753_v9 = vpack.c.bf16 %v3745_v32, %v3745_v32 }
0x140d   :  { %v3755_v2 = vpack.c.bf16 %v3747_v57, %v3747_v57 }
0x1412   :  { %5547 = vmatmul.mubr.msk.bf16.vlgmr.msra.gmra.mrb[124].mxu0 %vm2103_vm12, %v3753_v9 }
0x1413   :  { %5557 = vmatpush3.bf16.msra.mxu0 %v4098_v20  ;;  %5558 = vmatprep.mubr.msk.bf16.mxu0 %vm5955_vm5, %v5954_v53 }
0x1414   :  { %5568 = vmatprep.subr.bf16.mxu0 %v5954_v53 }
0x141a   :  { %5559 = vmatmul.mubr.msk.bf16.vlgmr.msra.gmra.mrb[128].mxu0 %vm2103_vm12, %v3755_v2 }
0x141b   :  { %5570 = vmatprep.mubr.msk.bf16.mxu0 %vm5955_vm5, %v5954_v53  ;;  %5569 = vmatpush3.bf16.msra.mxu0 %v4198_v37 }
0x141c   :  { %5580 = vmatprep.subr.bf16.mxu0 %v5954_v53 }
0x1457   :  { %v3798_v63 = vpop.f32.mrb[120].mxu1 }
0x1458   :  { %v4140_v50 = vpack.c.bf16 %v3798_v63, %v3798_v63  ;;  %v5518_v56 = vpop.f32.mrb[121].mxu1 }
0x1459   :  { %v3801_v39 = vpop.f32.mrb[122].mxu1 }
0x145a   :  { %v5519_v48 = vpop.f32.mrb[123].mxu1  ;;  %5565 = vmatmul.mubr.msk.bf16.vlgmr.msra.gmra.mrb[136].mxu1 %vm1613_vm10, %v4140_v50 }
0x145b   :  { %5575 = vmatpush3.bf16.msra.mxu1 %v4244_v11  ;;  %5576 = vmatprep.mubr.msk.bf16.mxu1 %vm5955_vm5, %v5954_v53 }
0x145c   :  { %5586 = vmatprep.subr.bf16.mxu1 %v5954_v53 }
0x14a8   :  { %v3846_v25 = vpop.f32.mrb[116].mxu0 }
0x14a9   :  { %v4141_v17 = vpack.c.bf16 %v3846_v25, %v3846_v25  ;;  %v5524_v14 = vpop.f32.mrb[117].mxu0 }
0x14aa   :  { %v3849_v62 = vpop.f32.mrb[118].mxu0 }
0x14ab   :  { %v5525_v38 = vpop.f32.mrb[119].mxu0  ;;  %5571 = vmatmul.mubr.msk.bf16.vlgmr.msra.gmra.mrb[132].mxu0 %vm1613_vm10, %v4141_v17 }
0x14ac   :  { %v3894_v31 = vpop.f32.mrb[124].mxu1  ;;  %5581 = vmatpush3.bf16.msra.mxu0 %v4290_v35  ;;  %5582 = vmatprep.mubr.msk.bf16.mxu0 %vm5955_vm5, %v5954_v53 }
0x14ad   :  { %v4142_v60 = vpack.c.bf16 %v3894_v31, %v3894_v31  ;;  %v5530_v43 = vpop.f32.mrb[125].mxu1  ;;  %5592 = vmatprep.subr.bf16.mxu0 %v5954_v53 }
0x14ae   :  { %v3897_v12 = vpop.f32.mrb[126].mxu1 }
0x14af   :  { %v5531_v30 = vpop.f32.mrb[127].mxu1  ;;  %5577 = vmatmul.mubr.msk.bf16.vlgmr.msra.gmra.mrb[140].mxu1 %vm1613_vm10, %v4142_v60 }
0x14b0   :  { %5587 = vmatpush3.bf16.msra.mxu1 %v4336_v24  ;;  %5588 = vmatprep.mubr.msk.bf16.mxu1 %vm5955_vm5, %v5954_v53 }
0x14b1   :  { %5598 = vmatprep.subr.bf16.mxu1 %v5954_v53 }
0x14b4   :  { %v3990_v33 = vpop.f32.mrb[128].mxu1 }
0x14b5   :  { %v4144_v41 = vpack.c.bf16 %v3990_v33, %v3990_v33  ;;  %v5542_v10 = vpop.f32.mrb[129].mxu1 }
0x14b6   :  { %v3993_v29 = vpop.f32.mrb[130].mxu1 }
0x14b7   :  { %v5543_v5 = vpop.f32.mrb[131].mxu1  ;;  %5589 = vmatmul.mubr.msk.bf16.vlgmr.msra.gmra.mrb[144].mxu1 %vm1613_vm10, %v4144_v41 }
0x14b8   :  { %5599 = vmatpush3.bf16.msra.mxu1 %v4428_v13  ;;  %5600 = vmatprep.mubr.msk.bf16.mxu1 %vm5955_vm5, %v5954_v53 }
0x14b9   :  { %5610 = vmatprep.subr.bf16.mxu1 %v5954_v53 }
0x14bc   :  { %v4086_v46 = vpop.f32.mrb[132].mxu1 }
0x14bd   :  { %v4146_v26 = vpack.c.bf16 %v4086_v46, %v4086_v46  ;;  %v5554_v45 = vpop.f32.mrb[133].mxu1 }
0x14be   :  { %v4089_v4 = vpop.f32.mrb[134].mxu1 }
0x14bf   :  { %v5555_v18 = vpop.f32.mrb[135].mxu1  ;;  %5601 = vmatmul.mubr.msk.bf16.vlgmr.msra.gmra.mrb[148].mxu1 %vm1613_vm10, %v4146_v26 }
0x14c0   :  { %5618 = vmatprep.mubr.msk.bf16.mxu1 %vm5955_vm5, %v5954_v53 }
0x14dd   :  { %v3942_v47 = vpop.f32.mrb[120].mxu0 }
0x14de   :  { %v4143_v8 = vpack.c.bf16 %v3942_v47, %v3942_v47  ;;  %v5536_v59 = vpop.f32.mrb[121].mxu0 }
0x14df   :  { %v3945_v16 = vpop.f32.mrb[122].mxu0  ;;  %v4537_v59 = vpop.permute.xlu1 %4536 }
0x14e0   :  { %v5537_v36 = vpop.f32.mrb[123].mxu0  ;;  %5583 = vmatmul.mubr.msk.bf16.vlgmr.msra.gmra.mrb[136].mxu0 %vm1613_vm10, %v4143_v8 }
0x14e1   :  { %5593 = vmatpush3.bf16.msra.mxu0 %v4382_v58  ;;  %5594 = vmatprep.mubr.msk.bf16.mxu0 %vm5955_vm5, %v5954_v53 }
0x14e2   :  { %5604 = vmatprep.subr.bf16.mxu0 %v5954_v53 }
0x14e5   :  { %v4038_v52 = vpop.f32.mrb[124].mxu0 }
0x14e6   :  { %v4145_v55 = vpack.c.bf16 %v4038_v52, %v4038_v52  ;;  %v5548_v28 = vpop.f32.mrb[125].mxu0 }
0x14e7   :  { %v4041_v22 = vpop.f32.mrb[126].mxu0  ;;  %v5058_v28 = vld [vmem:[%s7647_s10 + $0x8] ss:$0 sm:$0xff] }
0x14e8   :  { %v5549_v42 = vpop.f32.mrb[127].mxu0  ;;  %5595 = vmatmul.mubr.msk.bf16.vlgmr.msra.gmra.mrb[140].mxu0 %vm1613_vm10, %v4145_v55 }
0x14e9   :  { %5605 = vmatpush3.bf16.msra.mxu0 %v4474_v61  ;;  %5606 = vmatprep.mubr.msk.bf16.mxu0 %vm5955_vm5, %v5954_v53 }
0x14ea   :  { %5622 = vmatprep.subr.bf16.mxu0 %v5954_v53 }
0x14ed   :  { %v4134_v7 = vpop.f32.mrb[128].mxu0 }
0x14ee   :  { %v4147_v40 = vpack.c.bf16 %v4134_v7, %v4134_v7  ;;  %v5560_v1 = vpop.f32.mrb[129].mxu0 }
0x14ef   :  { %v4137_v32 = vpop.f32.mrb[130].mxu0  ;;  %v5742_v1 = vld [vmem:[%s7644_s7 + $0x78] ss:$12 sps:$4 sm:$0xff]  }
0x14f0   :  { %v5561_v51 = vpop.f32.mrb[131].mxu0  ;;  %5607 = vmatmul.mubr.msk.bf16.vlgmr.msra.gmra.mrb[144].mxu0 %vm1613_vm10, %v4147_v40  ;;  %v5743_v32 = vld [vmem:[%s7644_s7 + $0x90] ss:$12 sps:$4 sm:$0xff]  }
0x14f1   :  { %5638 = vmatprep.mubr.msk.bf16.mxu0 %vm5955_vm5, %v5954_v53  ;;  %v5744_v51 = vld [vmem:[%s7644_s7 + $0xa8] ss:$12 sps:$4 sm:$0xff]  }
0x152d   :  { %v4188_v9 = vpop.f32.mrb[136].mxu1 }
0x152e   :  { %v5566_v34 = vpop.f32.mrb[137].mxu1  ;;  %v4516_v44 = vsel %vm2863_vm14, %v4188_v9, 0.0  ;;  %v5745_v9 = vld [vmem:[%s7646_s9 + $0x40] sm:$0xff]  }
0x152f   :  { %v4191_v20 = vpop.f32.mrb[138].mxu1  ;;  %5623 = vmatpush3.bf16.msra.mxu0 %v5745_v9  ;;  %v5746_v34 = vld [vmem:[%s7646_s9 + $0x48] sm:$0xff]  }
0x1530   :  { %v5567_v57 = vpop.f32.mrb[139].mxu1  ;;  %5624 = vmatprep.subr.bf16.mxu0 %v5954_v53  ;;  %v5747_v20 = vld [vmem:[%s7646_s9 + $0x50] sm:$0xff]  }
0x1531   :  { %v5748_v57 = vld [vmem:[%s7646_s9 + $0x58] sm:$0xff]  }
0x1533   :  { %5625 = vmatpush3.bf16.msra.mxu0 %v5746_v34 }
0x1534   :  { %5626 = vmatprep.subr.bf16.mxu0 %v5954_v53 }
0x1537   :  { %5627 = vmatpush3.bf16.msra.mxu0 %v5747_v20 }
0x1538   :  { %5628 = vmatprep.subr.bf16.mxu0 %v5954_v53 }
0x153b   :  { %5629 = vmatpush3.bf16.msra.mxu0 %v5748_v57 }
0x153c   :  { %5630 = vmatprep.subr.bf16.mxu0 %v5954_v53 }
0x157e   :  { %v4234_v2 = vpop.f32.mrb[132].mxu0 }
0x157f   :  { %v4517_v37 = vsel %vm2863_vm14, %v4234_v2, 0.0  ;;  %v5572_v19 = vpop.f32.mrb[133].mxu0  ;;  %v5749_v2 = vld [vmem:[%s7646_s9 + $0x60] sm:$0xff]  }
0x1580   :  { %v4518_v63 = vadd.f32 %v4517_v37, %v4516_v44  ;;  %v4237_v50 = vpop.f32.mrb[134].mxu0  ;;  %5631 = vmatpush3.bf16.msra.mxu0 %v5749_v2  ;;  %v5750_v44 = vld [vmem:[%s7646_s9 + $0x68] sm:$0xff]  }
0x1581   :  { %v5573_v56 = vpop.f32.mrb[135].mxu0  ;;  %5632 = vmatprep.subr.bf16.mxu0 %v5954_v53 }
0x1582   :  { %v4280_v11 = vpop.f32.mrb[140].mxu1 }
0x1583   :  { %v4519_v39 = vsel %vm2863_vm14, %v4280_v11, 0.0  ;;  %v5578_v48 = vpop.f32.mrb[141].mxu1 }
0x1584   :  { %v4520_v27 = vadd.f32 %v4519_v39, %v4518_v63  ;;  %v4283_v25 = vpop.f32.mrb[142].mxu1  ;;  %5633 = vmatpush3.bf16.msra.mxu0 %v5750_v44 }
0x1585   :  { %v5579_v17 = vpop.f32.mrb[143].mxu1  ;;  %5634 = vmatprep.subr.bf16.mxu0 %v5954_v53  ;;  %v5751_v25 = vld [vmem:[%s7646_s9 + $0x70] sm:$0xff]  }
0x1586   :  { %v5752_v17 = vld [vmem:[%s7646_s9 + $0x78] sm:$0xff]  }
0x1588   :  { %5635 = vmatpush3.bf16.msra.mxu0 %v5751_v25 }
0x1589   :  { %5636 = vmatprep.subr.bf16.mxu0 %v5954_v53 }
0x158a   :  { %v4372_v14 = vpop.f32.mrb[144].mxu1 }
0x158b   :  { %v5590_v35 = vpop.f32.mrb[145].mxu1  ;;  %v4523_v33 = vsel %vm2863_vm14, %v4372_v14, 0.0  ;;  %v5059_v14 = vld [vmem:[%s7647_s10 + $0x9] ss:$0 sm:$0xff] }
0x158c   :  { %v4375_v62 = vpop.f32.mrb[146].mxu1  ;;  %5637 = vmatpush3.bf16.msra.mxu0 %v5752_v17 }
0x158d   :  { %v5591_v21 = vpop.f32.mrb[147].mxu1 }
0x1592   :  { %v4464_v38 = vpop.f32.mrb[148].mxu1 }
0x1593   :  { %v5602_v31 = vpop.f32.mrb[149].mxu1  ;;  %v4527_v45 = vsel %vm2863_vm14, %v4464_v38, 0.0 }
0x1594   :  { %v4467_v60 = vpop.f32.mrb[150].mxu1 }
0x1595   :  { %v5603_v43 = vpop.f32.mrb[151].mxu1 }
0x15b3   :  { %v4326_v24 = vpop.f32.mrb[136].mxu0 }
0x15b4   :  { %v4521_v12 = vsel %vm2863_vm14, %v4326_v24, 0.0  ;;  %v5584_v30 = vpop.f32.mrb[137].mxu0  ;;  %v5065_v24 = vld [vmem:[%s7647_s10 + $0xa] ss:$0 sm:$0xff] }
0x15b5   :  { %v4522_v15 = vadd.f32 %v4521_v12, %v4520_v27  ;;  %v4329_v54 = vpop.f32.mrb[138].mxu0 }
0x15b6   :  { %v5585_v41 = vpop.f32.mrb[139].mxu0 }
0x15b7   :  { %v4524_v10 = vadd.f32 %v4523_v33, %v4522_v15 }
0x15bb   :  { %v4418_v13 = vpop.f32.mrb[140].mxu0 }
0x15bc   :  { %v4525_v29 = vsel %vm2863_vm14, %v4418_v13, 0.0  ;;  %v5596_v5 = vpop.f32.mrb[141].mxu0 }
0x15bd   :  { %v4526_v46 = vadd.f32 %v4525_v29, %v4524_v10  ;;  %v4421_v26 = vpop.f32.mrb[142].mxu0 }
0x15be   :  { %v5597_v4 = vpop.f32.mrb[143].mxu0 }
0x15bf   :  { %v4528_v18 = vadd.f32 %v4527_v45, %v4526_v46  ;;  %v5753_v45 = vld [vmem:[%s7648_s11] sm:$0xff]   ;;  %v5754_v4 = vld [vmem:[%s7648_s11 + $0x8] sm:$0xff]  }
0x15c3   :  { %v4510_v49 = vpop.f32.mrb[144].mxu0 }
0x15c4   :  { %v4529_v47 = vsel %vm2863_vm14, %v4510_v49, 0.0  ;;  %v5608_v8 = vpop.f32.mrb[145].mxu0  ;;  %v5756_v49 = vld [vmem:[%s7648_s11 + $0x18] sm:$0xff]  }
0x15c5   :  { %v4530_v58 = vadd.f32 %v4529_v47, %v4528_v18  ;;  %v4513_v16 = vpop.f32.mrb[146].mxu0  ;;  %v5755_v18 = vld [vmem:[%s7648_s11 + $0x10] sm:$0xff]   ;;  %v48_v47 = vld [vmem:[%s7643_s6 + $0x3] sm:$0x3]  ;;  %s5965_s6 = smov [#allocation2]  }
0x15c6   :  { %v5609_v36 = vpop.f32.mrb[147].mxu0  ;;  %v4773_v8 = vrot.slane %v48_v47, %v6163_v3 }
0x15c7   :  { %v4539_v6 = vadd.f32 %v4537_v59, %v4530_v58  ;;  %v4777_v59 = vrot.slane %v48_v47, %v6157_v0 }
0x15c9   :  { %v4540_v52 = vadd.f32 %v4539_v6, %v7238_v23  ;;  %v5741_v23 = vld [vmem:[%s7644_s7 + $0x60] ss:$12 sps:$4 sm:$0xff]  }
0x15ca   :  { %5611 = vmatpush3.bf16.msra.mxu1 %v5741_v23 }
0x15cb   :  { %v4541_v55 = vsel %vm2863_vm14, %v4540_v52, 0.0  ;;  %5612 = vmatprep.subr.bf16.mxu1 %v5954_v53 }
0x15cc   :  { %4542 = vadd.xlane.f32.xlu0 %v4541_v55  ;;  %v5074_v55 = vld [vmem:[%s7647_s10 + $0xb] ss:$0 sm:$0xff] }
0x15ce   :  { %5613 = vmatpush3.bf16.msra.mxu1 %v5742_v1 }
0x15cf   :  { %5614 = vmatprep.subr.bf16.mxu1 %v5954_v53 }
0x15d2   :  { %5615 = vmatpush3.bf16.msra.mxu1 %v5743_v32 }
0x15d3   :  { %5616 = vmatprep.subr.bf16.mxu1 %v5954_v53 }
0x15d6   :  { %5617 = vmatpush3.bf16.msra.mxu1 %v5744_v51 }
0x15d7   :  { %5642 = vmatprep.subr.bf16.mxu1 %v5954_v53 }
0x15e2   :  { %4561 = vrot.lane.b32.xlu0 %v5058_v28, %s5964_s22 }
0x15e6   :  { %4802 = vrot.lane.b32.xlu0 %v4773_v8, %s5949_s17 }
0x15ea   :  { %4804 = vrot.lane.b32.xlu0 %v4777_v59, %s5949_s17  ;;  %s4859_s17 = sshll.u32 %s5965_s6, 4  ;;  %s4860_s17 = int_to_ptr.vmem [resolvable:$true] %s4859_s17 }
0x15eb   :  { %s5925_s25 = scalar_lea.vmem %s4860_s17, 32  ;;  %p5930_p1 = scmp.lt.s32.totalorder %s4860_s17, %s4860_s17 }
0x15ec   :  { %p5926_p0 = scmp.ne.s32.totalorder %s4860_s17, %s5925_s25  ;;  %p5931_p2 = scmp.lt.s32.totalorder %s5925_s25, %s5925_s25 }
0x15ee   :  { %p5932_p3 = por %p5931_p2, %p5930_p1 }
0x15f0   :  { %p5933_p4 = pnand %p5932_p3, %p5926_p0 }
0x1659   :  { %v4543_v61 = vpop.xlane.xlu0 %4542 }
0x165a   :  { %v4544_v22 = vmul.f32 0.015625, %v4543_v61 }
0x165c   :  { %v4545_v42 = vsub.f32 %v4540_v52, %v4544_v22 }
0x165d   :  { %v4562_v11 = vpop.permute.xlu0 %4561 }
0x165e   :  { %v4546_v7 = vmul.f32 %v4545_v42, %v4545_v42 }
0x1660   :  { %v4547_v40 = vsel %vm2863_vm14, %v4546_v7, 0.0 }
0x1661   :  { %4548 = vadd.xlane.f32.xlu1 %v4547_v40  ;;  %v4803_v22 = vpop.permute.xlu0 %4802 }
0x1665   :  { %v4805_v0 = vpop.permute.xlu0 %4804 }
0x16ee   :  { %v4549_v37 = vpop.xlane.xlu1 %4548 }
0x16ef   :  { %v4550_v19 = vmul.f32 0.015625, %v4549_v37 }
0x16f1   :  { %v4551_v63 = vadd.f32 1e-05, %v4550_v19 }
0x16f3   :  { %5921 = vrsqrt.f32 %v4551_v63 }
0x16fd   :  { %v5922_v50 = vpop.eup %5921 }
0x16fe   :  { %v4553_v56 = vmul.f32 %v5922_v50, %v4545_v42  ;;  %v4807_v42 = vsel %vm576_vm1, %v4803_v22, %v4805_v0 }
0x1700   :  { %v4560_v39 = vmul.f32 %v5058_v28, %v4553_v56 }
0x1702   :  { %v4564_v48 = vadd.f32 %v4562_v11, %v4560_v39 }
0x1704   :  { %v4565_v27 = vpack.c.bf16 %v4564_v48, %v4564_v48 }
0x1706   :  { %5619 = vmatmul.mubr.msk.bf16.vlgmr.msra.gmra.mrb[152].mxu1 %vm1139_vm4, %v4565_v27 }
0x1707   :  { %5650 = vmatprep.mubr.msk.bf16.mxu1 %vm5955_vm5, %v5954_v53  ;;  %5643 = vmatpush3.bf16.msra.mxu1 %v5753_v45 }
0x1708   :  { %5644 = vmatprep.subr.bf16.mxu1 %v5954_v53 }
0x170b   :  { %5645 = vmatpush3.bf16.msra.mxu1 %v5754_v4 }
0x170c   :  { %5646 = vmatprep.subr.bf16.mxu1 %v5954_v53 }
0x170f   :  { %5647 = vmatpush3.bf16.msra.mxu1 %v5755_v18 }
0x1710   :  { %5648 = vmatprep.subr.bf16.mxu1 %v5954_v53 }
0x1713   :  { %5649 = vmatpush3.bf16.msra.mxu1 %v5756_v49 }
0x17d9   :  { %v4633_v35 = vpop.f32.mrb[152].mxu1 }
0x17da   :  { %v4634_v62 = vadd.f32 %v5059_v14, %v4633_v35  ;;  %v5620_v21 = vpop.f32.mrb[153].mxu1 }
0x17db   :  { %v4636_v38 = vpop.f32.mrb[154].mxu1 }
0x17dc   :  { %v4639_v31 = vmax.f32 %v4634_v62, 0.0  ;;  %v5621_v60 = vpop.f32.mrb[155].mxu1 }
0x17de   :  { %v4640_v43 = vpack.c.bf16 %v4639_v31, %v4639_v31 }
0x17e0   :  { %5639 = vmatmul.mubr.bf16.vlgmr.msra.gmra.mrb[148].mxu0 %v4640_v43 }
0x18b3   :  { %v4729_v12 = vpop.f32.mrb[148].mxu0 }
0x18b4   :  { %v4730_v30 = vadd.f32 %v5065_v24, %v4729_v12  ;;  %v5640_v15 = vpop.f32.mrb[149].mxu0 }
0x18b5   :  { %v4732_v54 = vpop.f32.mrb[150].mxu0 }
0x18b6   :  { %v4735_v33 = vadd.f32 %v4730_v30, %v4564_v48  ;;  %v5641_v41 = vpop.f32.mrb[151].mxu0 }
0x18b8   :  { %v4736_v10 = vsel %vm2863_vm14, %v4735_v33, 0.0 }
0x18b9   :  { %4737 = vadd.xlane.f32.xlu1 %v4736_v10 }
0x1946   :  { %v4738_v13 = vpop.xlane.xlu1 %4737 }
0x1947   :  { %v4739_v29 = vmul.f32 0.015625, %v4738_v13 }
0x1949   :  { %v4740_v5 = vsub.f32 %v4735_v33, %v4739_v29 }
0x194b   :  { %v4741_v46 = vmul.f32 %v4740_v5, %v4740_v5 }
0x194d   :  { %v4742_v26 = vsel %vm2863_vm14, %v4741_v46, 0.0 }
0x194e   :  { %4743 = vadd.xlane.f32.xlu1 %v4742_v26 }
0x195f   :  { %4749 = vrot.lane.b32.xlu1 %v5065_v24, %s5964_s22 }
0x19db   :  { %v4744_v58 = vpop.xlane.xlu1 %4743 }
0x19dc   :  { %v4745_v16 = vmul.f32 0.015625, %v4744_v58 }
0x19de   :  { %v4746_v53 = vadd.f32 1e-05, %v4745_v16 }
0x19df   :  { %v4750_v6 = vpop.permute.xlu1 %4749 }
0x19e0   :  { %5923 = vrsqrt.f32 %v4746_v53 }
0x19ea   :  { %v5924_v36 = vpop.eup %5923 }
0x19eb   :  { %v4748_v52 = vmul.f32 %v5924_v36, %v4740_v5 }
0x19ed   :  { %v4752_v28 = vmul.f32 %v4750_v6, %v4748_v52 }
0x19ef   :  { %v4759_v61 = vadd.f32 %v5074_v55, %v4752_v28 }
0x19f1   :  { %v4760_v3 = vpack.c.bf16 %v4759_v61, %v4759_v61 }
0x19f3   :  { %5651 = vmatmul.mubr.msk.bf16.vlgmr.msra.gmra.mrb[156].mxu1 %vm1139_vm4, %v4760_v3 }
0x1ac6   :  { %v4846_v7 = vpop.f32.mrb[156].mxu1 }
0x1ac7   :  { %v4847_v40 = vadd.f32 %v4846_v7, %v4807_v42  ;;  %v5652_v23 = vpop.f32.mrb[157].mxu1 }
0x1ac8   :  { %v4849_v1 = vpop.f32.mrb[158].mxu1 }
0x1ac9   :  { %4852 = vst [vmem:[#allocation2] sm:$0x3] %v4847_v40  ;;  %v5653_v32 = vpop.f32.mrb[159].mxu1 }
0x1aca   :  { %5936 = shalt.err (!%p5933_p4)
}
0x1acb   :  { %s5937_s26 = scalar_lea.hbm %s7649_s12, 32 }
0x1acc   :  { %p5938_p5 = scmp.ne.s32.totalorder %s7649_s12, %s5937_s26  ;;  %p5941_p6 = scmp.lt.u32.totalorder %s5937_s26, %s7649_s12 }
0x1ace   :  { %p5943_p7 = pnand %p5941_p6, %p5938_p5 }
0x1ad0   :  { %5946 = shalt.err (!%p5943_p7)
}
0x1ad1   :  { %4862 = dma.vmem_to_hbm [thread:$0]  %s4860_s17, 32, %s7649_s12, [#allocation3]  }
0x1ad2   :  { %5947 = dma.done.wait [#allocation3], 32  }
0x1ad3   :  { %5948 = vsyncadd [#allocation3], 4294967264 }
0x1ad4   :  { %4866 = vsyncpa [#allocation3], 1 }

</bundles_post_ra>
